<compile_context>
chip_gen: v6e
topology: v6e:2x2x1
jax: 0.10.0
libtpu: 0.0.40
codegen_flags: <defaults>
</compile_context>

<pallas_src>
import jax
import jax.numpy as jnp
from jax import lax
from jax.experimental import pallas as pl
from jax.experimental.pallas import tpu as pltpu


def _residual_block_kernel(x_ref, w1_ref, w2_ref, bn_ref, out_ref, pad_ref):
    # x_ref:   (1, H, W, C)  f32   un-padded input tile (one batch element)
    # w1_ref:  (9*C, C)      bf16  conv1 weights, row index = (kh*3+kw)*C + cin
    # w2_ref:  (9*C, C)      bf16  conv2 weights
    # bn_ref:  (5, C)        f32   rows: scale1, bias1, scale2, bias2, prelu_alpha
    # out_ref: (1, H, W, C)  f32
    # pad_ref: (H+2, W+2, C) f32   VMEM scratch shared by conv1/conv2 (1-px halo)
    H, W, C = x_ref.shape[1], x_ref.shape[2], x_ref.shape[3]
    Hp, Wp = H + 2, W + 2
    HW = H * W

    x = x_ref[0]                    # (H, W, C) f32
    bn = bn_ref[...]                # (5, C)

    # TODO(synk): act1/act2 (DDTB_quant_act_asym_dynamic_quantized) and the
    # asymmetric weight fake-quant of quant_conv3x3_asym99 are treated as
    # identity (the quantizer definitions are not provided); conv / BatchNorm /
    # PReLU / residual math is exact (bf16 MXU operands, f32 accumulation).

    # ---- re-zero only the 1-px border of the shared padded scratch ----
    # (interior is fully overwritten below; per-step border zeroing keeps the
    #  kernel correct when the parallel batch axis is split across cores)
    zrow = jnp.zeros((1, Wp, C), jnp.float32)
    pad_ref[0:1] = zrow
    pad_ref[Hp - 1:Hp] = zrow
    zcol = jnp.zeros((Hp, 1, C), jnp.float32)
    pad_ref[:, 0:1] = zcol
    pad_ref[:, Wp - 1:Wp] = zcol

    def conv3x3(w_ref):
        # One big-K im2col matmul per conv: (HW, 9C) x (9C, C) on the MXU.
        p = pad_ref[...]            # (Hp, Wp, C) f32
        cols = [p[kh:kh + H, kw:kw + W, :].reshape(HW, C)
                for kh in range(3) for kw in range(3)]
        patches = jnp.concatenate(cols, axis=-1).astype(jnp.bfloat16)
        return jnp.dot(patches, w_ref[...],
                       preferred_element_type=jnp.float32)   # (HW, C) f32

    # ---- conv1 + folded BatchNorm1 + PReLU ----
    pad_ref[1:H + 1, 1:W + 1, :] = x
    y = conv3x3(w1_ref) * bn[0:1, :] + bn[1:2, :]
    alpha = bn[4:5, :]                       # single PReLU slope, broadcast
    y = jnp.where(y > 0, y, alpha * y)

    # ---- conv2 + folded BatchNorm2 + residual add ----
    pad_ref[1:H + 1, 1:W + 1, :] = y.reshape(H, W, C)
    z = conv3x3(w2_ref) * bn[2:3, :] + bn[3:4, :]
    z = z + x.reshape(HW, C)

    out_ref[0] = z.reshape(H, W, C).astype(out_ref.dtype)


def residual_block_nchw(x_nchw, w1, w2, g1, b1, m1, v1, g2, b2, m2, v2, alpha,
                        eps=1e-5):
    """Forward of _Residual_Block. x_nchw: (N, 64, H, W); conv weights OIHW."""
    N, C, H, W = x_nchw.shape
    x = jnp.transpose(x_nchw, (0, 2, 3, 1)).astype(jnp.float32)       # NHWC

    # PyTorch conv weight (Cout, Cin, 3, 3) -> (9*Cin, Cout), tap-major rows
    # (matches the in-kernel im2col concat order).  bf16 for the MXU.
    w1k = jnp.transpose(w1, (2, 3, 1, 0)).reshape(9 * C, C).astype(jnp.bfloat16)
    w2k = jnp.transpose(w2, (2, 3, 1, 0)).reshape(9 * C, C).astype(jnp.bfloat16)

    # Fold eval-mode BatchNorm into scale/bias; append PReLU slope as row 4.
    s1 = g1 / jnp.sqrt(v1 + eps)
    s2 = g2 / jnp.sqrt(v2 + eps)
    bn = jnp.stack([s1, b1 - m1 * s1, s2, b2 - m2 * s2,
                    jnp.full((C,), alpha, jnp.float32)]).astype(jnp.float32)

    out_nhwc = pl.pallas_call(
        _residual_block_kernel,
        out_shape=jax.ShapeDtypeStruct((N, H, W, C), jnp.float32),
        grid_spec=pltpu.PrefetchScalarGridSpec(
            num_scalar_prefetch=0,
            grid=(N,),
            in_specs=[
                pl.BlockSpec((1, H, W, C), lambda n: (n, 0, 0, 0)),
                pl.BlockSpec((9 * C, C), lambda n: (0, 0)),
                pl.BlockSpec((9 * C, C), lambda n: (0, 0)),
                pl.BlockSpec((5, C), lambda n: (0, 0)),
            ],
            out_specs=pl.BlockSpec((1, H, W, C), lambda n: (n, 0, 0, 0)),
            scratch_shapes=[pltpu.VMEM((H + 2, W + 2, C), jnp.float32)],
        ),
        compiler_params=pltpu.CompilerParams(
            dimension_semantics=("parallel",)),
    )(x, w1k, w2k, bn)
    return jnp.transpose(out_nhwc, (0, 3, 1, 2))                      # NCHW


def _ref_forward(x, w1, w2, g1, b1, m1, v1, g2, b2, m2, v2, alpha, eps=1e-5):
    """Pure-JAX f32 reference (NCHW, matches PyTorch eval-mode semantics)."""
    def conv(inp, w):
        return lax.conv_general_dilated(
            inp, w, window_strides=(1, 1), padding=((1, 1), (1, 1)),
            dimension_numbers=("NCHW", "OIHW", "NCHW"),
            precision=lax.Precision.HIGHEST)

    def bnorm(inp, g, b, m, v):
        return ((inp - m[None, :, None, None])
                / jnp.sqrt(v[None, :, None, None] + eps)
                * g[None, :, None, None] + b[None, :, None, None])

    y = bnorm(conv(x, w1), g1, b1, m1, v1)
    y = jnp.where(y > 0, y, alpha * y)          # PReLU, single shared slope
    y = bnorm(conv(y, w2), g2, b2, m2, v2)
    return y + x


if __name__ == "__main__":
    N, C, H, W = 2, 64, 16, 16                  # channels fixed at 64 by the module
    key = jax.random.PRNGKey(0)
    ks = jax.random.split(key, 11)

    x = jax.random.normal(ks[0], (N, C, H, W), jnp.float32)
    w1 = jax.random.normal(ks[1], (C, C, 3, 3), jnp.float32) * 0.05
    w2 = jax.random.normal(ks[2], (C, C, 3, 3), jnp.float32) * 0.05
    g1 = 1.0 + 0.1 * jax.random.normal(ks[3], (C,), jnp.float32)
    b1 = 0.1 * jax.random.normal(ks[4], (C,), jnp.float32)
    m1 = 0.1 * jax.random.normal(ks[5], (C,), jnp.float32)
    v1 = 0.5 + jnp.abs(jax.random.normal(ks[6], (C,), jnp.float32))
    g2 = 1.0 + 0.1 * jax.random.normal(ks[7], (C,), jnp.float32)
    b2 = 0.1 * jax.random.normal(ks[8], (C,), jnp.float32)
    m2 = 0.1 * jax.random.normal(ks[9], (C,), jnp.float32)
    v2 = 0.5 + jnp.abs(jax.random.normal(ks[10], (C,), jnp.float32))
    alpha = 0.25                                # nn.PReLU() default init

    out = residual_block_nchw(x, w1, w2, g1, b1, m1, v1, g2, b2, m2, v2, alpha)
    out = jax.block_until_ready(out)

    ref = _ref_forward(x, w1, w2, g1, b1, m1, v1, g2, b2, m2, v2, alpha)
    assert out.shape == (N, C, H, W)
    err = float(jnp.max(jnp.abs(out - ref)))
    # bf16 MXU operands (f32 accumulation) vs. the exact f32 reference:
    # tolerance is loosened accordingly (per review), error stays well bounded.
    assert jnp.allclose(out, ref, rtol=5e-2, atol=5e-2), f"max abs err {err}"
    print("KERNEL_OK")
</pallas_src>

<mosaic_0001>
module attributes {stable_mosaic.version = 11 : i64} {
  func.func @_residual_block_kernel(%arg0: i32, %arg1: memref<1x16x16x64xf32, #tpu.memory_space<vmem>>, %arg2: memref<576x64xbf16, #tpu.memory_space<vmem>>, %arg3: memref<576x64xbf16, #tpu.memory_space<vmem>>, %arg4: memref<5x64xf32, #tpu.memory_space<vmem>>, %arg5: memref<1x16x16x64xf32, #tpu.memory_space<vmem>>, %arg6: memref<18x18x64xf32, #tpu.memory_space<vmem>>) attributes {dimension_semantics = [#tpu.dimension_semantics<parallel>], iteration_bounds = array<i64: 2>, scalar_prefetch = 0 : i64, scratch_operands = 1 : i64, tpu.core_type = #tpu.core_type<tc>, window_params = [{transform_indices = @transform_0, window_bounds = array<i64: 1, 16, 16, 64>}, {pipeline_mode = #tpu.pipeline_mode<synchronous>, transform_indices = @transform_1, window_bounds = array<i64: 576, 64>}, {pipeline_mode = #tpu.pipeline_mode<synchronous>, transform_indices = @transform_2, window_bounds = array<i64: 576, 64>}, {pipeline_mode = #tpu.pipeline_mode<synchronous>, transform_indices = @transform_3, window_bounds = array<i64: 5, 64>}, {transform_indices = @transform_4, window_bounds = array<i64: 1, 16, 16, 64>}]} {
    %c0 = arith.constant 0 : index
    %c0_0 = arith.constant 0 : index
    %c0_1 = arith.constant 0 : index
    %c0_2 = arith.constant 0 : index
    %0 = vector.load %arg1[%c0, %c0_0, %c0_1, %c0_2] : memref<1x16x16x64xf32, #tpu.memory_space<vmem>>, vector<1x16x16x64xf32>
    %1 = vector.shape_cast %0 : vector<1x16x16x64xf32> to vector<16x16x64xf32>
    %c0_3 = arith.constant 0 : index
    %c0_4 = arith.constant 0 : index
    %2 = vector.load %arg4[%c0_3, %c0_4] : memref<5x64xf32, #tpu.memory_space<vmem>>, vector<5x64xf32>
    %cst = arith.constant 0.000000e+00 : f32
    %3 = vector.broadcast %cst : f32 to vector<1x18x64xf32>
    %c0_5 = arith.constant 0 : index
    %c0_6 = arith.constant 0 : index
    %c0_7 = arith.constant 0 : index
    %4 = vector.load %arg6[%c0_5, %c0_6, %c0_7] : memref<18x18x64xf32, #tpu.memory_space<vmem>>, vector<1x18x64xf32>
    tpu.vector_store %arg6[%c0_5, %c0_6, %c0_7], %3 {strides = array<i32>} : memref<18x18x64xf32, #tpu.memory_space<vmem>>, vector<1x18x64xf32>,
    %c17 = arith.constant 17 : index
    %c0_8 = arith.constant 0 : index
    %c0_9 = arith.constant 0 : index
    %5 = vector.load %arg6[%c17, %c0_8, %c0_9] : memref<18x18x64xf32, #tpu.memory_space<vmem>>, vector<1x18x64xf32>
    tpu.vector_store %arg6[%c17, %c0_8, %c0_9], %3 {strides = array<i32>} : memref<18x18x64xf32, #tpu.memory_space<vmem>>, vector<1x18x64xf32>,
    %cst_10 = arith.constant 0.000000e+00 : f32
    %6 = vector.broadcast %cst_10 : f32 to vector<18x1x64xf32>
    %c0_11 = arith.constant 0 : index
    %c0_12 = arith.constant 0 : index
    %c0_13 = arith.constant 0 : index
    %7 = vector.load %arg6[%c0_11, %c0_12, %c0_13] : memref<18x18x64xf32, #tpu.memory_space<vmem>>, vector<18x1x64xf32>
    tpu.vector_store %arg6[%c0_11, %c0_12, %c0_13], %6 {strides = array<i32>} : memref<18x18x64xf32, #tpu.memory_space<vmem>>, vector<18x1x64xf32>,
    %c0_14 = arith.constant 0 : index
    %c17_15 = arith.constant 17 : index
    %c0_16 = arith.constant 0 : index
    %8 = vector.load %arg6[%c0_14, %c17_15, %c0_16] : memref<18x18x64xf32, #tpu.memory_space<vmem>>, vector<18x1x64xf32>
    tpu.vector_store %arg6[%c0_14, %c17_15, %c0_16], %6 {strides = array<i32>} : memref<18x18x64xf32, #tpu.memory_space<vmem>>, vector<18x1x64xf32>,
    %c1 = arith.constant 1 : index
    %c1_17 = arith.constant 1 : index
    %c0_18 = arith.constant 0 : index
    %9 = vector.load %arg6[%c1, %c1_17, %c0_18] : memref<18x18x64xf32, #tpu.memory_space<vmem>>, vector<16x16x64xf32>
    tpu.vector_store %arg6[%c1, %c1_17, %c0_18], %1 {strides = array<i32>} : memref<18x18x64xf32, #tpu.memory_space<vmem>>, vector<16x16x64xf32>,
    %c0_19 = arith.constant 0 : index
    %c0_20 = arith.constant 0 : index
    %c0_21 = arith.constant 0 : index
    %10 = vector.load %arg6[%c0_19, %c0_20, %c0_21] : memref<18x18x64xf32, #tpu.memory_space<vmem>>, vector<18x18x64xf32>
    %11 = vector.extract_strided_slice %10 {offsets = [0, 0, 0], sizes = [16, 16, 64], strides = [1, 1, 1]} : vector<18x18x64xf32> to vector<16x16x64xf32>
    %12 = vector.shape_cast %11 : vector<16x16x64xf32> to vector<256x64xf32>
    %13 = vector.extract_strided_slice %10 {offsets = [0, 1, 0], sizes = [16, 16, 64], strides = [1, 1, 1]} : vector<18x18x64xf32> to vector<16x16x64xf32>
    %14 = vector.shape_cast %13 : vector<16x16x64xf32> to vector<256x64xf32>
    %15 = vector.extract_strided_slice %10 {offsets = [0, 2, 0], sizes = [16, 16, 64], strides = [1, 1, 1]} : vector<18x18x64xf32> to vector<16x16x64xf32>
    %16 = vector.shape_cast %15 : vector<16x16x64xf32> to vector<256x64xf32>
    %17 = vector.extract_strided_slice %10 {offsets = [1, 0, 0], sizes = [16, 16, 64], strides = [1, 1, 1]} : vector<18x18x64xf32> to vector<16x16x64xf32>
    %18 = vector.shape_cast %17 : vector<16x16x64xf32> to vector<256x64xf32>
    %19 = vector.extract_strided_slice %10 {offsets = [1, 1, 0], sizes = [16, 16, 64], strides = [1, 1, 1]} : vector<18x18x64xf32> to vector<16x16x64xf32>
    %20 = vector.shape_cast %19 : vector<16x16x64xf32> to vector<256x64xf32>
    %21 = vector.extract_strided_slice %10 {offsets = [1, 2, 0], sizes = [16, 16, 64], strides = [1, 1, 1]} : vector<18x18x64xf32> to vector<16x16x64xf32>
    %22 = vector.shape_cast %21 : vector<16x16x64xf32> to vector<256x64xf32>
    %23 = vector.extract_strided_slice %10 {offsets = [2, 0, 0], sizes = [16, 16, 64], strides = [1, 1, 1]} : vector<18x18x64xf32> to vector<16x16x64xf32>
    %24 = vector.shape_cast %23 : vector<16x16x64xf32> to vector<256x64xf32>
    %25 = vector.extract_strided_slice %10 {offsets = [2, 1, 0], sizes = [16, 16, 64], strides = [1, 1, 1]} : vector<18x18x64xf32> to vector<16x16x64xf32>
    %26 = vector.shape_cast %25 : vector<16x16x64xf32> to vector<256x64xf32>
    %27 = vector.extract_strided_slice %10 {offsets = [2, 2, 0], sizes = [16, 16, 64], strides = [1, 1, 1]} : vector<18x18x64xf32> to vector<16x16x64xf32>
    %28 = vector.shape_cast %27 : vector<16x16x64xf32> to vector<256x64xf32>
    %29 = tpu.concatenate %12, %14, %16, %18, %20, %22, %24, %26, %28 in 1 : vector<256x64xf32>, vector<256x64xf32>, vector<256x64xf32>, vector<256x64xf32>, vector<256x64xf32>, vector<256x64xf32>, vector<256x64xf32>, vector<256x64xf32>, vector<256x64xf32> -> vector<256x576xf32>
    %30 = arith.truncf %29 : vector<256x576xf32> to vector<256x576xbf16>
    %c0_22 = arith.constant 0 : index
    %c0_23 = arith.constant 0 : index
    %31 = vector.load %arg2[%c0_22, %c0_23] : memref<576x64xbf16, #tpu.memory_space<vmem>>, vector<576x64xbf16>
    %cst_24 = arith.constant dense<0.000000e+00> : vector<256x64xf32>
    %32 = tpu.matmul %30, %31, %cst_24 {dimension_numbers = #tpu.dot_dimension_numbers<[1], [0], [0], [1], [0, 0, 1, 1], [], []>} : vector<256x576xbf16>, vector<576x64xbf16>, vector<256x64xf32> -> vector<256x64xf32>
    %33 = vector.extract_strided_slice %2 {offsets = [0, 0], sizes = [1, 64], strides = [1, 1]} : vector<5x64xf32> to vector<1x64xf32>
    %34 = vector.broadcast %33 : vector<1x64xf32> to vector<256x64xf32>
    %35 = arith.mulf %32, %34 : vector<256x64xf32>
    %36 = vector.extract_strided_slice %2 {offsets = [1, 0], sizes = [1, 64], strides = [1, 1]} : vector<5x64xf32> to vector<1x64xf32>
    %37 = vector.broadcast %36 : vector<1x64xf32> to vector<256x64xf32>
    %38 = arith.addf %35, %37 : vector<256x64xf32>
    %39 = vector.extract_strided_slice %2 {offsets = [4, 0], sizes = [1, 64], strides = [1, 1]} : vector<5x64xf32> to vector<1x64xf32>
    %cst_25 = arith.constant 0.000000e+00 : f32
    %40 = vector.broadcast %cst_25 : f32 to vector<256x64xf32>
    %41 = arith.cmpf ogt, %38, %40 : vector<256x64xf32>
    %42 = vector.broadcast %39 : vector<1x64xf32> to vector<256x64xf32>
    %43 = arith.mulf %42, %38 : vector<256x64xf32>
    %44 = arith.select %41, %38, %43 : vector<256x64xi1>, vector<256x64xf32>
    %45 = vector.shape_cast %44 : vector<256x64xf32> to vector<16x16x64xf32>
    %c1_26 = arith.constant 1 : index
    %c1_27 = arith.constant 1 : index
    %c0_28 = arith.constant 0 : index
    %46 = vector.load %arg6[%c1_26, %c1_27, %c0_28] : memref<18x18x64xf32, #tpu.memory_space<vmem>>, vector<16x16x64xf32>
    tpu.vector_store %arg6[%c1_26, %c1_27, %c0_28], %45 {strides = array<i32>} : memref<18x18x64xf32, #tpu.memory_space<vmem>>, vector<16x16x64xf32>,
    %c0_29 = arith.constant 0 : index
    %c0_30 = arith.constant 0 : index
    %c0_31 = arith.constant 0 : index
    %47 = vector.load %arg6[%c0_29, %c0_30, %c0_31] : memref<18x18x64xf32, #tpu.memory_space<vmem>>, vector<18x18x64xf32>
    %48 = vector.extract_strided_slice %47 {offsets = [0, 0, 0], sizes = [16, 16, 64], strides = [1, 1, 1]} : vector<18x18x64xf32> to vector<16x16x64xf32>
    %49 = vector.shape_cast %48 : vector<16x16x64xf32> to vector<256x64xf32>
    %50 = vector.extract_strided_slice %47 {offsets = [0, 1, 0], sizes = [16, 16, 64], strides = [1, 1, 1]} : vector<18x18x64xf32> to vector<16x16x64xf32>
    %51 = vector.shape_cast %50 : vector<16x16x64xf32> to vector<256x64xf32>
    %52 = vector.extract_strided_slice %47 {offsets = [0, 2, 0], sizes = [16, 16, 64], strides = [1, 1, 1]} : vector<18x18x64xf32> to vector<16x16x64xf32>
    %53 = vector.shape_cast %52 : vector<16x16x64xf32> to vector<256x64xf32>
    %54 = vector.extract_strided_slice %47 {offsets = [1, 0, 0], sizes = [16, 16, 64], strides = [1, 1, 1]} : vector<18x18x64xf32> to vector<16x16x64xf32>
    %55 = vector.shape_cast %54 : vector<16x16x64xf32> to vector<256x64xf32>
    %56 = vector.extract_strided_slice %47 {offsets = [1, 1, 0], sizes = [16, 16, 64], strides = [1, 1, 1]} : vector<18x18x64xf32> to vector<16x16x64xf32>
    %57 = vector.shape_cast %56 : vector<16x16x64xf32> to vector<256x64xf32>
    %58 = vector.extract_strided_slice %47 {offsets = [1, 2, 0], sizes = [16, 16, 64], strides = [1, 1, 1]} : vector<18x18x64xf32> to vector<16x16x64xf32>
    %59 = vector.shape_cast %58 : vector<16x16x64xf32> to vector<256x64xf32>
    %60 = vector.extract_strided_slice %47 {offsets = [2, 0, 0], sizes = [16, 16, 64], strides = [1, 1, 1]} : vector<18x18x64xf32> to vector<16x16x64xf32>
    %61 = vector.shape_cast %60 : vector<16x16x64xf32> to vector<256x64xf32>
    %62 = vector.extract_strided_slice %47 {offsets = [2, 1, 0], sizes = [16, 16, 64], strides = [1, 1, 1]} : vector<18x18x64xf32> to vector<16x16x64xf32>
    %63 = vector.shape_cast %62 : vector<16x16x64xf32> to vector<256x64xf32>
    %64 = vector.extract_strided_slice %47 {offsets = [2, 2, 0], sizes = [16, 16, 64], strides = [1, 1, 1]} : vector<18x18x64xf32> to vector<16x16x64xf32>
    %65 = vector.shape_cast %64 : vector<16x16x64xf32> to vector<256x64xf32>
    %66 = tpu.concatenate %49, %51, %53, %55, %57, %59, %61, %63, %65 in 1 : vector<256x64xf32>, vector<256x64xf32>, vector<256x64xf32>, vector<256x64xf32>, vector<256x64xf32>, vector<256x64xf32>, vector<256x64xf32>, vector<256x64xf32>, vector<256x64xf32> -> vector<256x576xf32>
    %67 = arith.truncf %66 : vector<256x576xf32> to vector<256x576xbf16>
    %c0_32 = arith.constant 0 : index
    %c0_33 = arith.constant 0 : index
    %68 = vector.load %arg3[%c0_32, %c0_33] : memref<576x64xbf16, #tpu.memory_space<vmem>>, vector<576x64xbf16>
    %cst_34 = arith.constant dense<0.000000e+00> : vector<256x64xf32>
    %69 = tpu.matmul %67, %68, %cst_34 {dimension_numbers = #tpu.dot_dimension_numbers<[1], [0], [0], [1], [0, 0, 1, 1], [], []>} : vector<256x576xbf16>, vector<576x64xbf16>, vector<256x64xf32> -> vector<256x64xf32>
    %70 = vector.extract_strided_slice %2 {offsets = [2, 0], sizes = [1, 64], strides = [1, 1]} : vector<5x64xf32> to vector<1x64xf32>
    %71 = vector.broadcast %70 : vector<1x64xf32> to vector<256x64xf32>
    %72 = arith.mulf %69, %71 : vector<256x64xf32>
    %73 = vector.extract_strided_slice %2 {offsets = [3, 0], sizes = [1, 64], strides = [1, 1]} : vector<5x64xf32> to vector<1x64xf32>
    %74 = vector.broadcast %73 : vector<1x64xf32> to vector<256x64xf32>
    %75 = arith.addf %72, %74 : vector<256x64xf32>
    %76 = vector.shape_cast %1 : vector<16x16x64xf32> to vector<256x64xf32>
    %77 = arith.addf %75, %76 : vector<256x64xf32>
    %78 = vector.shape_cast %77 : vector<256x64xf32> to vector<16x16x64xf32>
    %c0_35 = arith.constant 0 : index
    %c0_36 = arith.constant 0 : index
    %c0_37 = arith.constant 0 : index
    %c0_38 = arith.constant 0 : index
    %79 = vector.load %arg5[%c0_35, %c0_36, %c0_37, %c0_38] : memref<1x16x16x64xf32, #tpu.memory_space<vmem>>, vector<1x16x16x64xf32>
    %80 = vector.shape_cast %79 : vector<1x16x16x64xf32> to vector<16x16x64xf32>
    %81 = vector.shape_cast %78 : vector<16x16x64xf32> to vector<1x16x16x64xf32>
    tpu.vector_store %arg5[%c0_35, %c0_36, %c0_37, %c0_38], %81 {strides = array<i32>} : memref<1x16x16x64xf32, #tpu.memory_space<vmem>>, vector<1x16x16x64xf32>,
    return
  }
  func.func @transform_0(%arg0: i32) -> (i32, i32, i32, i32) {
    %c0_i32 = arith.constant 0 : i32
    %c0_i32_0 = arith.constant 0 : i32
    %c0_i32_1 = arith.constant 0 : i32
    %c0_i32_2 = arith.constant 0 : i32
    return %arg0, %c0_i32, %c0_i32_0, %c0_i32_1 : i32, i32, i32, i32
  }
  func.func @transform_1(%arg0: i32) -> (i32, i32) {
    %c0_i32 = arith.constant 0 : i32
    %c0_i32_0 = arith.constant 0 : i32
    %c0_i32_1 = arith.constant 0 : i32
    return %c0_i32, %c0_i32_0 : i32, i32
  }
  func.func @transform_2(%arg0: i32) -> (i32, i32) {
    %c0_i32 = arith.constant 0 : i32
    %c0_i32_0 = arith.constant 0 : i32
    %c0_i32_1 = arith.constant 0 : i32
    return %c0_i32, %c0_i32_0 : i32, i32
  }
  func.func @transform_3(%arg0: i32) -> (i32, i32) {
    %c0_i32 = arith.constant 0 : i32
    %c0_i32_0 = arith.constant 0 : i32
    %c0_i32_1 = arith.constant 0 : i32
    return %c0_i32, %c0_i32_0 : i32, i32
  }
  func.func @transform_4(%arg0: i32) -> (i32, i32, i32, i32) {
    %c0_i32 = arith.constant 0 : i32
    %c0_i32_0 = arith.constant 0 : i32
    %c0_i32_1 = arith.constant 0 : i32
    %c0_i32_2 = arith.constant 0 : i32
    return %arg0, %c0_i32, %c0_i32_0, %c0_i32_1 : i32, i32, i32, i32
  }
}

</mosaic_0001>

<bundles_post_ra>
// kernel: tpu_custom_call.1
= control target key start
LH: loop header
LB: loop body
LE: loop exit
PB: predicated region body
PF: predicated region fallthrough
CT: control target
= control target key end

     0   :  { %9 = vsyncpa [#allocation4], 0  ;;  %s8740_s0 = inlined_call_operand.vmem [shape: f32[2,16,16,64], index: 0, kind: input, shape index: {}]   ;;  %s8741_s1 = inlined_call_operand.vmem [shape: bf16[576,64], index: 1, kind: input, shape index: {}]   ;;  %s8742_s2 = inlined_call_operand.vmem [shape: bf16[576,64], index: 2, kind: input, shape index: {}]   ;;  %s8743_s3 = inlined_call_operand.vmem [shape: f32[5,64], index: 3, kind: input, shape index: {}]   ;;  %s8744_s4 = inlined_call_operand.hbm [shape: f32[2,16,16,64], index: 4, kind: output, shape index: {}]  }
   0x1   :  { %11 = vsyncpa [#allocation4 + $0x1], 0  ;;  %s5451_s15 = smov 0   ;;  %s5453_s16 = smov 0  }
   0x2   :  { %s5455_s17 = smov 0   ;;  %s5457_s18 = smov 0  }
   0x3 LB: > { %s5472_s19 = sadd.s32 4294967295, %s5419_s18   ;;  %s4009_s20 = sadd.s32 4294967294, %s5419_s18   ;;  %s5419_s18 = sphi %s5457_s18, %s9289_s18   ;;  %s5415_s17 = sphi %s5455_s17, %s9288_s17   ;;  %s5411_s16 = sphi %s5453_s16, %s9287_s16   ;;  %s5407_s15 = sphi %s5451_s15, %s9286_s15  }
   0x4   : > { %s5476_s21 = sadd.s32 1, %s5419_s18   ;;  %s113_s22 = sadd.s32 1, %s5415_s17 }
   0x5   : > { %s110_s23 = ssub.s32 %s5419_s18, %s5476_s21  ;;  %p123_p0 = scmp.ne.s32.totalorder %s5415_s17, %s5411_s16 }
   0x6   : > { %p111_p1 = scmp.eq.s32.totalorder %s110_s23, 0  ;;  %p124_p2 = scmp.eq.s32.totalorder %s5472_s19, 1 }
   0x7   : > { %p129_p3 = scmp.ne.s32.totalorder %s5411_s16, %s5407_s15  ;;  %p130_p4 = scmp.eq.s32.totalorder %s4009_s20, 1 }
   0x8   : > { %s5487_s24 = scalar_select %p111_p1, %s5415_s17, %s113_s22  }
   0x9   : > { %p5489_p5 = por %p124_p2, %p123_p0  ;;  %p5493_p6 = por %p130_p4, %p129_p3 }
   0xa   : > { %p4012_p7 = scmp.ge.s32.totalorder %s5419_s18, 1  ;;  %p165_p8 = scmp.lt.s32.totalorder %s5419_s18, 3 }
   0xc   : > { %p166_p9 = pnand %p4012_p7, %p165_p8 }
   0xe   : > { %169 = sbr.rel (%p166_p9) target bundleno = 1051 (0x41b), region = 36 }
  0x13   : > { %p191_p10 = scmp.lt.s32.totalorder %s5472_s19, 1  ;;  %vm230_vm0 = vcmask 523264   ;;  %vm239_vm1 = vcmask 516096   ;;  %vm233_vm2 = vcmask 517120   ;;  %v5421_v0 = vmov 0.0   ;;  %v5238_v1 = vld [vmem:[%s8741_s1 + $0x78] sm:$0xff]  }
  0x14   : > { %241 = vst.msk [vmem:[#allocation2 + $0x18] sm:$0x1] %vm239_vm1, %v5421_v0  ;;  %242 = vst.msk [vmem:[#allocation2 + $0x30] sm:$0x1] %vm239_vm1, %v5421_v0  ;;  %v5239_v2 = vld [vmem:[%s8741_s1 + $0x38] sm:$0xff]   ;;  %4127 = vmatprep.subr.bf16.mxu0 %v5238_v1  ;;  %v5240_v3 = vld [vmem:[%s8741_s1 + $0x70] sm:$0xff]  }
  0x15   : > { %231 = vst.msk [vmem:[#allocation2] sm:$0xff] %vm230_vm0, %v5421_v0  ;;  %232 = vst.msk [vmem:[#allocation2 + $0x8] sm:$0xff] %vm230_vm0, %v5421_v0  ;;  %s192_s27 = scalar_select %p191_p10, %s5472_s19, 1  ;;  %4128 = vmatpush3.bf16.msra.mxu0 %v5239_v2  ;;  %v5241_v4 = vld [vmem:[%s8741_s1 + $0x30] sm:$0xff]   ;;  %vm411_vm3 = vcmask 1046528   ;;  %vm492_vm4 = vcmask 1045504  }
  0x16   : > { %236 = vst.msk [vmem:[#allocation2 + $0x198] sm:$0xff] %vm230_vm0, %v5421_v0  ;;  %237 = vst.msk [vmem:[#allocation2 + $0x1a0] sm:$0xff] %vm230_vm0, %v5421_v0  ;;  %4129 = vmatprep.subr.bf16.mxu0 %v5240_v3  ;;  %s5422_s14 = smov 64   ;;  %s4126_s20 = sshll.u32 %s5472_s19, 12 }
  0x17   : > { %243 = vst.msk [vmem:[#allocation2 + $0x48] sm:$0x1] %vm239_vm1, %v5421_v0  ;;  %244 = vst.msk [vmem:[#allocation2 + $0x60] sm:$0x1] %vm239_vm1, %v5421_v0  ;;  %s4125_s6 = sshll.u32 %s192_s27, 8  ;;  %s8689_s28 = scalar_lea.hbm %s8744_s4, %s4126_s20 }
  0x18   : > { %245 = vst.msk [vmem:[#allocation2 + $0x78] sm:$0x1] %vm239_vm1, %v5421_v0  ;;  %246 = vst.msk [vmem:[#allocation2 + $0x90] sm:$0x1] %vm239_vm1, %v5421_v0  ;;  %s5557_s11 = scalar_lea.vmem %s8740_s0, %s4125_s6 }
  0x19   : > { %247 = vst.msk [vmem:[#allocation2 + $0xa8] sm:$0x1] %vm239_vm1, %v5421_v0  ;;  %248 = vst.msk [vmem:[#allocation2 + $0xc0] sm:$0x1] %vm239_vm1, %v5421_v0  ;;  %v5563_v5 = vld [vmem:[%s5557_s11] sm:$0xff]  ;;  %v5566_v6 = vld [vmem:[%s5557_s11 + $0x8] sm:$0xff]  ;;  %4130 = vmatpush3.bf16.msra.mxu0 %v5241_v4 }
  0x1a   : > { %249 = vst.msk [vmem:[#allocation2 + $0xd8] sm:$0x1] %vm239_vm1, %v5421_v0  ;;  %250 = vst.msk [vmem:[#allocation2 + $0xf0] sm:$0x1] %vm239_vm1, %v5421_v0  ;;  %v5569_v7 = vld [vmem:[%s5557_s11 + $0x10] sm:$0xff]  ;;  %v5576_v8 = vld [vmem:[%s5557_s11 + $0x18] sm:$0xff] }
  0x1b   : > { %251 = vst.msk [vmem:[#allocation2 + $0x108] sm:$0x1] %vm239_vm1, %v5421_v0  ;;  %252 = vst.msk [vmem:[#allocation2 + $0x120] sm:$0x1] %vm239_vm1, %v5421_v0  ;;  %v5581_v9 = vld [vmem:[%s5557_s11 + $0x20] sm:$0xff]  ;;  %v5584_v10 = vld [vmem:[%s5557_s11 + $0x28] sm:$0xff] }
  0x1c   : > { %253 = vst.msk [vmem:[#allocation2 + $0x138] sm:$0x1] %vm239_vm1, %v5421_v0  ;;  %254 = vst.msk [vmem:[#allocation2 + $0x150] sm:$0x1] %vm239_vm1, %v5421_v0  ;;  %v310_v11 = vld [vmem:[#allocation2 + $0x8] sm:$0xff]  ;;  %v5593_v12 = vld [vmem:[%s5557_s11 + $0x30] sm:$0xff] }
  0x1d   : > { %255 = vst.msk [vmem:[#allocation2 + $0x168] sm:$0x1] %vm239_vm1, %v5421_v0  ;;  %256 = vst.msk [vmem:[#allocation2 + $0x180] sm:$0x1] %vm239_vm1, %v5421_v0  ;;  %v5596_v13 = vld [vmem:[%s5557_s11 + $0x38] sm:$0xff]  ;;  %v5603_v16 = vld [vmem:[%s5557_s11 + $0x40] sm:$0xff] }
  0x1e   : > { %259 = vst.msk [vmem:[#allocation2 + $0x29] sm:$0x1] %vm239_vm1, %v5421_v0  ;;  %260 = vst.msk [vmem:[#allocation2 + $0x41] sm:$0x1] %vm239_vm1, %v5421_v0  ;;  %v413_v18 = vrot.slane %v310_v11, 1  ;;  %v5606_v20 = vld [vmem:[%s5557_s11 + $0x48] sm:$0xff] }
  0x1f   : > { %261 = vst.msk [vmem:[#allocation2 + $0x59] sm:$0x1] %vm239_vm1, %v5421_v0  ;;  %262 = vst.msk [vmem:[#allocation2 + $0x71] sm:$0x1] %vm239_vm1, %v5421_v0  ;;  %v5611_v21 = vld [vmem:[%s5557_s11 + $0x50] sm:$0xff]  ;;  %v5614_v22 = vld [vmem:[%s5557_s11 + $0x58] sm:$0xff] }
  0x20   : > { %263 = vst.msk [vmem:[#allocation2 + $0x89] sm:$0x1] %vm239_vm1, %v5421_v0  ;;  %264 = vst.msk [vmem:[#allocation2 + $0xa1] sm:$0x1] %vm239_vm1, %v5421_v0  ;;  %v5623_v23 = vld [vmem:[%s5557_s11 + $0x60] sm:$0xff]  ;;  %v5626_v24 = vld [vmem:[%s5557_s11 + $0x68] sm:$0xff] }
  0x21   : > { %265 = vst.msk [vmem:[#allocation2 + $0xb9] sm:$0x1] %vm239_vm1, %v5421_v0  ;;  %266 = vst.msk [vmem:[#allocation2 + $0xd1] sm:$0x1] %vm239_vm1, %v5421_v0  ;;  %v5629_v25 = vld [vmem:[%s5557_s11 + $0x70] sm:$0xff]  ;;  %v5636_v26 = vld [vmem:[%s5557_s11 + $0x78] sm:$0xff] }
  0x22   : > { %267 = vst.msk [vmem:[#allocation2 + $0xe9] sm:$0x1] %vm239_vm1, %v5421_v0  ;;  %268 = vst.msk [vmem:[#allocation2 + $0x101] sm:$0x1] %vm239_vm1, %v5421_v0  ;;  %v5641_v27 = vld [vmem:[%s5557_s11 + $0x80] sm:$0xff]  ;;  %v5644_v28 = vld [vmem:[%s5557_s11 + $0x88] sm:$0xff] }
  0x23   : > { %269 = vst.msk [vmem:[#allocation2 + $0x119] sm:$0x1] %vm239_vm1, %v5421_v0  ;;  %270 = vst.msk [vmem:[#allocation2 + $0x131] sm:$0x1] %vm239_vm1, %v5421_v0  ;;  %v5653_v29 = vld [vmem:[%s5557_s11 + $0x90] sm:$0xff]  ;;  %v5656_v30 = vld [vmem:[%s5557_s11 + $0x98] sm:$0xff] }
  0x24   : > { %271 = vst.msk [vmem:[#allocation2 + $0x149] sm:$0x1] %vm239_vm1, %v5421_v0  ;;  %272 = vst.msk [vmem:[#allocation2 + $0x161] sm:$0x1] %vm239_vm1, %v5421_v0  ;;  %v5659_v31 = vld [vmem:[%s5557_s11 + $0xa0] sm:$0xff]  ;;  %v5730_v2 = vld [vmem:[%s5557_s11 + $0xa8] sm:$0xff] }
  0x25   : > { %273 = vst.msk [vmem:[#allocation2 + $0x179] sm:$0x1] %vm239_vm1, %v5421_v0  ;;  %274 = vst.msk [vmem:[#allocation2 + $0x191] sm:$0x1] %vm239_vm1, %v5421_v0 }
  0x26   : > { %234 = vst.msk [vmem:[#allocation2 + $0x10] sm:$0x3] %vm233_vm2, %v5421_v0  ;;  %238 = vst.msk [vmem:[#allocation2 + $0x1a8] sm:$0x3] %vm233_vm2, %v5421_v0 }
  0x27   : > { %240 = vst.msk [vmem:[#allocation2] sm:$0x1] %vm239_vm1, %v5421_v0  ;;  %258 = vst.msk [vmem:[#allocation2 + $0x11] sm:$0x1] %vm239_vm1, %v5421_v0 }
  0x28   : > { %257 = vst.msk [vmem:[#allocation2 + $0x198] sm:$0x1] %vm239_vm1, %v5421_v0  ;;  %275 = vst.msk [vmem:[#allocation2 + $0x1a9] sm:$0x1] %vm239_vm1, %v5421_v0 }
  0x29   : > { %8876 = vst [vmem:[#allocation6_spill] sm:$0xff] %v5563_v5  ;;  %8877 = vst [vmem:[#allocation7_spill] sm:$0xff] %v5566_v6 }
  0x2a   : > { %8878 = vst [vmem:[#allocation8_spill] sm:$0xff] %v5569_v7  ;;  %277 = vst.msk [vmem:[#allocation2 + $0x19] sm:$0xff] %vm230_vm0, %v5563_v5 }
  0x2b   : > { %278 = vst.msk [vmem:[#allocation2 + $0x21] sm:$0xff] %vm230_vm0, %v5566_v6  ;;  %8879 = vst [vmem:[#allocation9_spill] sm:$0xff] %v5576_v8 }
  0x2c   : > { %279 = vst.msk [vmem:[#allocation2 + $0x31] sm:$0xff] %vm230_vm0, %v5569_v7  ;;  %8880 = vst [vmem:[#allocation10_spill] sm:$0xff] %v5581_v9  ;;  %v5252_v7 = vld [vmem:[%s8741_s1 + $0x40] sm:$0xff]  }
  0x2d   : > { %8881 = vst [vmem:[#allocation11_spill] sm:$0xff] %v5584_v10  ;;  %280 = vst.msk [vmem:[#allocation2 + $0x39] sm:$0xff] %vm230_vm0, %v5576_v8 }
  0x2e   : > { %281 = vst.msk [vmem:[#allocation2 + $0x49] sm:$0xff] %vm230_vm0, %v5581_v9  ;;  %282 = vst.msk [vmem:[#allocation2 + $0x51] sm:$0xff] %vm230_vm0, %v5584_v10  ;;  %v309_v14 = vld [vmem:[#allocation2] sm:$0xff]  ;;  %v311_v15 = vld [vmem:[#allocation2 + $0x10] sm:$0x3] }
  0x2f   : > { %8882 = vst [vmem:[#allocation12_spill] sm:$0xff] %v5593_v12  ;;  %8883 = vst [vmem:[#allocation13_spill] sm:$0xff] %v5596_v13  ;;  %v412_v17 = vrot.slane %v309_v14, 1  ;;  %v415_v19 = vrot.slane %v311_v15, 1  ;;  %v5743_v15 = vld [vmem:[%s5557_s11 + $0xb0] sm:$0xff]  ;;  %v5247_v9 = vld [vmem:[%s8741_s1 + $0x18] sm:$0xff]  }
  0x30   : > { %283 = vst.msk [vmem:[#allocation2 + $0x61] sm:$0xff] %vm230_vm0, %v5593_v12  ;;  %284 = vst.msk [vmem:[#allocation2 + $0x69] sm:$0xff] %vm230_vm0, %v5596_v13  ;;  %v5248_v13 = vld [vmem:[%s8741_s1 + $0x50] sm:$0xff]  }
  0x31   : > { %8884 = vst [vmem:[#allocation14_spill] sm:$0xff] %v5603_v16  ;;  %8885 = vst [vmem:[#allocation15_spill] sm:$0xff] %v5606_v20  ;;  %v5661_v32 = vld [vmem:[#allocation2 + $0x18] sm:$0xff]  ;;  %v414_v34 = vsel %vm411_vm3, %v412_v17, %v413_v18  ;;  %v416_v35 = vsel %vm411_vm3, %v413_v18, %v415_v19  ;;  %v5753_v19 = vld [vmem:[%s5557_s11 + $0xc0] sm:$0xff] }
  0x32   : > { %285 = vst.msk [vmem:[#allocation2 + $0x79] sm:$0xff] %vm230_vm0, %v5603_v16  ;;  %8886 = vst [vmem:[#allocation16_spill] sm:$0xff] %v5611_v21  ;;  %v5663_v33 = vld [vmem:[#allocation2 + $0x20] sm:$0xff]  ;;  %v417_v39 = vrot.slane %v5661_v32, 1  ;;  %v5684_v43 = vld [vmem:[#allocation2 + $0x28] sm:$0x3]  ;;  %v4743_v45 = vpack.i.bf16 %v416_v35, %v414_v34 }
  0x33   : > { %8887 = vst [vmem:[#allocation17_spill] sm:$0xff] %v5614_v22  ;;  %286 = vst.msk [vmem:[#allocation2 + $0x81] sm:$0xff] %vm230_vm0, %v5606_v20  ;;  %v5667_v36 = vld [vmem:[#allocation2 + $0x30] sm:$0xff]  ;;  %v4738_v37 = vpack.i.bf16 %v5663_v33, %v5661_v32  ;;  %v418_v40 = vrot.slane %v5663_v33, 1  ;;  %v420_v48 = vrot.slane %v5684_v43, 1  ;;  %v5748_v18 = vld [vmem:[%s5557_s11 + $0xb8] sm:$0xff] }
  0x34   : > { %287 = vst.msk [vmem:[#allocation2 + $0x91] sm:$0xff] %vm230_vm0, %v5611_v21  ;;  %288 = vst.msk [vmem:[#allocation2 + $0x99] sm:$0xff] %vm230_vm0, %v5614_v22  ;;  %v5677_v38 = vld [vmem:[#allocation2 + $0x38] sm:$0xff]  ;;  %v422_v41 = vrot.slane %v5667_v36, 1  ;;  %v5694_v49 = vld [vmem:[#allocation2 + $0x40] sm:$0x3] }
  0x35   : > { %8888 = vst [vmem:[#allocation18_spill] sm:$0xff] %v5623_v23  ;;  %8889 = vst [vmem:[#allocation19_spill] sm:$0xff] %v5626_v24  ;;  %v4748_v42 = vpack.i.bf16 %v5677_v38, %v5667_v36  ;;  %v423_v44 = vrot.slane %v5677_v38, 1  ;;  %4739 = vrot.lane.b32.xlu0 %v4738_v37, %s5422_s14  ;;  %v5688_v46 = vld [vmem:[#allocation2 + $0x48] sm:$0xff]  ;;  %v5691_v47 = vsel %vm411_vm3, %v417_v39, %v418_v40  ;;  %v5696_v50 = vld [vmem:[#allocation2 + $0x58] sm:$0x3] }
  0x36   : > { %8890 = vst [vmem:[#allocation20_spill] sm:$0xff] %v5629_v25  ;;  %289 = vst.msk [vmem:[#allocation2 + $0xa9] sm:$0xff] %vm230_vm0, %v5623_v23  ;;  %v5699_v51 = vld [vmem:[#allocation2 + $0x50] sm:$0xff]  ;;  %v425_v52 = vrot.slane %v5694_v49, 1  ;;  %v427_v53 = vrot.slane %v5688_v46, 1  ;;  %v5704_v54 = vsel %vm411_vm3, %v418_v40, %v420_v48  ;;  %v430_v57 = vrot.slane %v5696_v50, 1 }
  0x37   : > { %290 = vst.msk [vmem:[#allocation2 + $0xb1] sm:$0xff] %vm230_vm0, %v5626_v24  ;;  %8891 = vst [vmem:[#allocation21_spill] sm:$0xff] %v5636_v26  ;;  %4749 = vrot.lane.b32.xlu1 %v4748_v42, %s5422_s14  ;;  %v5707_v55 = vsel %vm411_vm3, %v422_v41, %v423_v44  ;;  %v428_v56 = vrot.slane %v5699_v51, 1  ;;  %v4753_v58 = vpack.i.bf16 %v5704_v54, %v5691_v47  ;;  %v5716_v60 = vld [vmem:[#allocation2 + $0x70] sm:$0x3]  ;;  %v5721_v62 = vld [vmem:[#allocation2 + $0x60] sm:$0xff] }
  0x38   : > { %291 = vst.msk [vmem:[#allocation2 + $0xc1] sm:$0xff] %vm230_vm0, %v5629_v25  ;;  %8892 = vst [vmem:[#allocation22_spill] sm:$0xff] %v5641_v27  ;;  %v5714_v59 = vsel %vm411_vm3, %v423_v44, %v425_v52  ;;  %v4758_v61 = vpack.i.bf16 %v5699_v51, %v5688_v46  ;;  %v5723_v63 = vld [vmem:[#allocation2 + $0x68] sm:$0xff]  ;;  %v432_v1 = vrot.slane %v5721_v62, 1  ;;  %v435_v14 = vrot.slane %v5716_v60, 1  ;;  %v5776_v42 = vld [vmem:[%s5557_s11 + $0xd0] sm:$0xff] }
  0x39   : > { %8893 = vst [vmem:[#allocation23_spill] sm:$0xff] %v5644_v28  ;;  %292 = vst.msk [vmem:[#allocation2 + $0xc9] sm:$0xff] %vm230_vm0, %v5636_v26  ;;  %4744 = vrot.lane.b32.xlu0 %v4743_v45, %s5422_s14  ;;  %v4763_v0 = vpack.i.bf16 %v5714_v59, %v5707_v55  ;;  %v5733_v3 = vsel %vm411_vm3, %v427_v53, %v428_v56  ;;  %v5736_v4 = vsel %vm411_vm3, %v428_v56, %v430_v57  ;;  %v5758_v35 = vld [vmem:[#allocation2 + $0x78] sm:$0xff]  ;;  %v5765_v39 = vld [vmem:[%s5557_s11 + $0xc8] sm:$0xff] }
  0x3a   : > { %293 = vst.msk [vmem:[#allocation2 + $0xd9] sm:$0xff] %vm230_vm0, %v5641_v27  ;;  %294 = vst.msk [vmem:[#allocation2 + $0xe1] sm:$0xff] %vm230_vm0, %v5644_v28  ;;  %v433_v11 = vrot.slane %v5723_v63, 1  ;;  %v5745_v17 = vld [vmem:[#allocation2 + $0x88] sm:$0x3]  ;;  %v4768_v34 = vpack.i.bf16 %v5723_v63, %v5721_v62  ;;  %v5760_v37 = vld [vmem:[#allocation2 + $0x80] sm:$0xff]  ;;  %v4773_v40 = vpack.i.bf16 %v5736_v4, %v5733_v3 }
  0x3b   : > { %8894 = vst [vmem:[#allocation24_spill] sm:$0xff] %v5653_v29  ;;  %8895 = vst [vmem:[#allocation25_spill] sm:$0xff] %v5656_v30  ;;  %4754 = vrot.lane.b32.xlu1 %v4753_v58, %s5422_s14  ;;  %v437_v41 = vrot.slane %v5758_v35, 1  ;;  %v5779_v44 = vld [vmem:[%s5557_s11 + $0xd8] sm:$0xff]  ;;  %v5782_v45 = vld [vmem:[%s5557_s11 + $0xe0] sm:$0xff]  ;;  %v438_v56 = vrot.slane %v5760_v37, 1 }
  0x3c   : > { %8896 = vst [vmem:[#allocation26_spill] sm:$0xff] %v5659_v31  ;;  %295 = vst.msk [vmem:[#allocation2 + $0xf1] sm:$0xff] %vm230_vm0, %v5653_v29  ;;  %v5784_v48 = vld [vmem:[#allocation2 + $0x90] sm:$0xff]  ;;  %v5787_v52 = vsel %vm411_vm3, %v432_v1, %v433_v11  ;;  %v5790_v53 = vsel %vm411_vm3, %v433_v11, %v435_v14  ;;  %v440_v57 = vrot.slane %v5745_v17, 1  ;;  %v5799_v58 = vld [vmem:[%s5557_s11 + $0xe8] sm:$0xff]  ;;  %v4778_v14 = vpack.i.bf16 %v5760_v37, %v5758_v35 }
  0x3d   : > { %296 = vst.msk [vmem:[#allocation2 + $0xf9] sm:$0xff] %vm230_vm0, %v5656_v30  ;;  %297 = vst.msk [vmem:[#allocation2 + $0x109] sm:$0xff] %vm230_vm0, %v5659_v31  ;;  %4759 = vrot.lane.b32.xlu0 %v4758_v61, %s5422_s14  ;;  %v5804_v61 = vld [vmem:[%s5557_s11 + $0xf0] sm:$0xff]  ;;  %v5809_v1 = vld [vmem:[#allocation2 + $0xa0] sm:$0x3] }
  0x3e   : > { %8897 = vst [vmem:[#allocation27_spill] sm:$0xff] %v5691_v47  ;;  %8898 = vst [vmem:[#allocation28_spill] sm:$0xff] %v5704_v54  ;;  %v5242_v11 = vld [vmem:[%s8741_s1 + $0x68] sm:$0xff]  }
  0x3f   : > { %8899 = vst [vmem:[#allocation29_spill] sm:$0xff] %v5707_v55  ;;  %8900 = vst [vmem:[#allocation30_spill] sm:$0xff] %v5714_v59  ;;  %4764 = vrot.lane.b32.xlu1 %v4763_v0, %s5422_s14  ;;  %v5807_v0 = vld [vmem:[%s5557_s11 + $0xf8] sm:$0xff]  ;;  %4131 = vmatprep.subr.bf16.mxu0 %v5242_v11  ;;  %v5852_v11 = vld [vmem:[#allocation2 + $0xc0] sm:$0xff]  ;;  %s188_s11 = sand.u32 1, %s5411_s16  }
  0x40   : > { %8901 = vst [vmem:[#allocation31_spill] sm:$0xff] %v5730_v2  ;;  %8902 = vst [vmem:[#allocation32_spill] sm:$0xff] %v5733_v3  ;;  %v452_v23 = vrot.slane %v5852_v11, 1  ;;  %v5268_v54 = vld [vmem:[%s8741_s1 + $0xc8] sm:$0xff]   ;;  %s4013_s12 = sshll.u32 %s188_s11, 8  ;;  %s8700_s19 = scalar_lea.sflag [#allocation4], %s188_s11 }
  0x41   : > { %8903 = vst [vmem:[#allocation33_spill] sm:$0xff] %v5736_v4  ;;  %298 = vst.msk [vmem:[#allocation2 + $0x111] sm:$0xff] %vm230_vm0, %v5730_v2  ;;  %4769 = vrot.lane.b32.xlu0 %v4768_v34, %s5422_s14  ;;  %v442_v34 = vrot.slane %v5784_v48, 1  ;;  %v5843_v2 = vld [vmem:[#allocation2 + $0xa8] sm:$0xff]  ;;  %v5862_v31 = vld [vmem:[#allocation2 + $0xd8] sm:$0xff]  ;;  %s8433_s13 = scalar_lea.vmem [#allocation3], %s4013_s12 }
  0x42   : > { %8904 = vst [vmem:[#allocation34_spill] sm:$0xff] %v5743_v15  ;;  %8905 = vst [vmem:[#allocation35_spill] sm:$0xff] %v5748_v18  ;;  %v5881_v26 = vld [vmem:[#allocation2 + $0xe8] sm:$0x3]  ;;  %v457_v20 = vrot.slane %v5862_v31, 1  ;;  %s3947_s22 = sshll.u32 %s8433_s13, 4  ;;  %s8691_s22 = int_to_ptr.vmem [resolvable:$true] %s3947_s22 }
  0x43   : > { %299 = vst.msk [vmem:[#allocation2 + $0x121] sm:$0xff] %vm230_vm0, %v5743_v15  ;;  %8906 = vst [vmem:[#allocation36_spill] sm:$0xff] %v5753_v19  ;;  %4774 = vrot.lane.b32.xlu1 %v4773_v40, %s5422_s14  ;;  %v5845_v40 = vld [vmem:[#allocation2 + $0xb0] sm:$0xff]  ;;  %s5359_s29 = scalar_lea.vmem %s8691_s22, 4096 }
  0x44   : > { %300 = vst.msk [vmem:[#allocation2 + $0x129] sm:$0xff] %vm230_vm0, %v5748_v18  ;;  %8907 = vst [vmem:[#allocation37_spill] sm:$0xff] %v5765_v39  ;;  %v5847_v18 = vld [vmem:[#allocation2 + $0xb8] sm:$0x3]  ;;  %v5867_v15 = vld [vmem:[#allocation2 + $0xd0] sm:$0x3]  ;;  %p5360_p11 = scmp.ne.s32.totalorder %s8691_s22, %s5359_s29 }
  0x45   : > { %301 = vst.msk [vmem:[#allocation2 + $0x139] sm:$0xff] %vm230_vm0, %v5753_v19  ;;  %302 = vst.msk [vmem:[#allocation2 + $0x141] sm:$0xff] %vm230_vm0, %v5765_v39  ;;  %v5836_v39 = vsel %vm411_vm3, %v437_v41, %v438_v56  ;;  %4779 = vrot.lane.b32.xlu0 %v4778_v14, %s5422_s14  ;;  %v447_v14 = vrot.slane %v5843_v2, 1  ;;  %v5875_v27 = vld [vmem:[#allocation2 + $0xf0] sm:$0xff]  ;;  %v448_v29 = vrot.slane %v5845_v40, 1  ;;  %v450_v24 = vrot.slane %v5847_v18, 1 }
  0x46   : > { %8908 = vst [vmem:[#allocation38_spill] sm:$0xff] %v5776_v42  ;;  %8909 = vst [vmem:[#allocation39_spill] sm:$0xff] %v5779_v44  ;;  %v5899_v21 = vld [vmem:[#allocation2 + $0x108] sm:$0xff]  ;;  %p5361_p12 = pnand %p5360_p11, %p5489_p5 }
  0x47   : > { %8910 = vst [vmem:[#allocation40_spill] sm:$0xff] %v5782_v45  ;;  %8911 = vst [vmem:[#allocation41_spill] sm:$0xff] %v5787_v52  ;;  %v5908_v12 = vsel %vm411_vm3, %v447_v14, %v448_v29 }
  0x48   : > { %8912 = vst [vmem:[#allocation42_spill] sm:$0xff] %v5790_v53  ;;  %303 = vst.msk [vmem:[#allocation2 + $0x151] sm:$0xff] %vm230_vm0, %v5776_v42  ;;  %v445_v42 = vrot.slane %v5809_v1, 1  ;;  %v5913_v6 = vld [vmem:[#allocation2 + $0x110] sm:$0xff]  ;;  %v5915_v8 = vld [vmem:[#allocation2 + $0x118] sm:$0x3]  ;;  %p5362_p13 = pneg %p5361_p12 }
  0x49   : > { %304 = vst.msk [vmem:[#allocation2 + $0x159] sm:$0xff] %vm230_vm0, %v5779_v44  ;;  %8913 = vst [vmem:[#allocation43_spill] sm:$0xff] %v5799_v58  ;;  %v5839_v44 = vsel %vm411_vm3, %v438_v56, %v440_v57  ;;  %v5854_v56 = vld [vmem:[#allocation2 + $0xc8] sm:$0xff] }
  0x4a   : > { %305 = vst.msk [vmem:[#allocation2 + $0x169] sm:$0xff] %vm230_vm0, %v5782_v45  ;;  %8914 = vst [vmem:[#allocation44_spill] sm:$0xff] %v5804_v61  ;;  %v5243_v45 = vld [vmem:[%s8741_s1 + $0x28] sm:$0xff]   ;;  %v4793_v57 = vpack.i.bf16 %v5839_v44, %v5836_v39  ;;  %v453_v25 = vrot.slane %v5854_v56, 1  ;;  %v5917_v5 = vld [vmem:[#allocation2 + $0x120] sm:$0xff] }
  0x4b   : > { %8915 = vst [vmem:[#allocation45_spill] sm:$0xff] %v5807_v0  ;;  %306 = vst.msk [vmem:[#allocation2 + $0x171] sm:$0xff] %vm230_vm0, %v5799_v58  ;;  %v5244_v58 = vld [vmem:[%s8741_s1 + $0x60] sm:$0xff]   ;;  %4132 = vmatpush3.bf16.msra.mxu0 %v5243_v45 }
  0x4c   : > { %307 = vst.msk [vmem:[#allocation2 + $0x181] sm:$0xff] %vm230_vm0, %v5804_v61  ;;  %308 = vst.msk [vmem:[#allocation2 + $0x189] sm:$0xff] %vm230_vm0, %v5807_v0  ;;  %v5829_v61 = vld [vmem:[#allocation2 + $0x98] sm:$0xff]  ;;  %v4783_v0 = vpack.i.bf16 %v5790_v53, %v5787_v52  ;;  %4133 = vmatprep.subr.bf16.mxu0 %v5244_v58  ;;  %v5245_v45 = vld [vmem:[%s8741_s1 + $0x20] sm:$0xff]   ;;  %v5942_v14 = vsel %vm411_vm3, %v452_v23, %v453_v25 }
  0x4d   : > { %8916 = vst [vmem:[#allocation46_spill] sm:$0xff] %v5836_v39  ;;  %8917 = vst [vmem:[#allocation47_spill] sm:$0xff] %v5839_v44  ;;  %v443_v19 = vrot.slane %v5829_v61, 1  ;;  %v4788_v41 = vpack.i.bf16 %v5829_v61, %v5784_v48  ;;  %v5864_v58 = vld [vmem:[#allocation2 + $0xe0] sm:$0xff]  ;;  %v5947_v44 = vld [vmem:[#allocation2 + $0x138] sm:$0xff] }
  0x4e   : > { %4784 = vrot.lane.b32.xlu1 %v4783_v0, %s5422_s14  ;;  %v5877_v0 = vld [vmem:[#allocation2 + $0xf8] sm:$0xff]  ;;  %v458_v22 = vrot.slane %v5864_v58, 1  ;;  %8920 = vst [vmem:[#allocation50_spill] sm:$0xff] %v5908_v12  ;;  %8922 = vst [vmem:[#allocation52_spill] sm:$0xff] %v5942_v14  ;;  %v5251_v23 = vld [vmem:[%s8741_s1 + $0x8] sm:$0xff]  }
  0x4f   : > { %v5870_v28 = vsel %vm411_vm3, %v442_v34, %v443_v19  ;;  %v5873_v30 = vsel %vm411_vm3, %v443_v19, %v445_v42  ;;  %4134 = vmatpush3.bf16.msra.mxu0 %v5245_v45  ;;  %v5885_v34 = vld [vmem:[#allocation2 + $0x100] sm:$0x3]  ;;  %4789 = vrot.lane.b32.xlu0 %v4788_v41, %s5422_s14  ;;  %v4798_v19 = vpack.i.bf16 %v5845_v40, %v5843_v2  ;;  %v455_v42 = vrot.slane %v5867_v15, 1  ;;  %v5246_v45 = vld [vmem:[%s8741_s1 + $0x58] sm:$0xff]  }
  0x50   : > { %8918 = vst [vmem:[#allocation48_spill] sm:$0xff] %v5870_v28  ;;  %8919 = vst [vmem:[#allocation49_spill] sm:$0xff] %v5873_v30  ;;  %v4803_v16 = vpack.i.bf16 %v5873_v30, %v5870_v28  ;;  %v460_v41 = vrot.slane %v5881_v26, 1  ;;  %4135 = vmatprep.subr.bf16.mxu0 %v5246_v45  ;;  %v465_v10 = vrot.slane %v5885_v34, 1  ;;  %v5249_v45 = vld [vmem:[%s8741_s1 + $0x10] sm:$0xff]  }
  0x51   : > { %v5936_v30 = vld [vmem:[#allocation2 + $0x130] sm:$0x3]  ;;  %v5945_v28 = vsel %vm411_vm3, %v453_v25, %v455_v42  ;;  %v4818_v25 = vpack.i.bf16 %v5864_v58, %v5862_v31  ;;  %v5963_v39 = vld [vmem:[#allocation2 + $0x160] sm:$0x3]  ;;  %v5256_v42 = vld [vmem:[%s8741_s1 + $0xb8] sm:$0xff]  }
  0x52   : > { %4794 = vrot.lane.b32.xlu1 %v4793_v57, %s5422_s14  ;;  %v5911_v57 = vsel %vm411_vm3, %v448_v29, %v450_v24  ;;  %v4808_v24 = vpack.i.bf16 %v5854_v56, %v5852_v11  ;;  %v5926_v29 = vld [vmem:[#allocation2 + $0x128] sm:$0xff]  ;;  %8923 = vst [vmem:[#allocation53_spill] sm:$0xff] %v5945_v28  ;;  %v5977_v53 = vld [vmem:[#allocation2 + $0x178] sm:$0x3]  ;;  %v5983_v52 = vsel %vm411_vm3, %v458_v22, %v460_v41  ;;  %v5989_v4 = vld [vmem:[#allocation2 + $0x170] sm:$0xff] }
  0x53   : > { %8921 = vst [vmem:[#allocation51_spill] sm:$0xff] %v5911_v57  ;;  %4136 = vmatpush3.bf16.msra.mxu0 %v5247_v9  ;;  %4799 = vrot.lane.b32.xlu0 %v4798_v19, %s5422_s14  ;;  %v4813_v9 = vpack.i.bf16 %v5911_v57, %v5908_v12  ;;  %v5250_v19 = vld [vmem:[%s8741_s1 + $0x48] sm:$0xff]   ;;  %8925 = vst [vmem:[#allocation55_spill] sm:$0xff] %v5983_v52  ;;  %v4828_v41 = vpack.i.bf16 %v5877_v0, %v5875_v27  ;;  %v8927_v57 = vrot.slane %v5877_v0, 1 }
  0x54   : > { %4137 = vmatprep.subr.bf16.mxu0 %v5248_v13  ;;  %v5953_v12 = vld [vmem:[#allocation2 + $0x148] sm:$0x3]  ;;  %v5971_v13 = vld [vmem:[#allocation2 + $0x150] sm:$0xff] }
  0x55   : > { %v8930_v59 = vmov %v8927_v57 }
  0x56   : > { %4804 = vrot.lane.b32.xlu1 %v4803_v16, %s5422_s14  ;;  %v5949_v16 = vld [vmem:[#allocation2 + $0x140] sm:$0xff]  ;;  %v6027_v55 = vsel %vm411_vm3, %v8930_v59, %v465_v10  ;;  %v5258_v59 = vld [vmem:[%s8741_s1 + $0xf0] sm:$0xff]  }
  0x57   : > { %4138 = vmatpush3.bf16.msra.mxu0 %v5249_v45  ;;  %4809 = vrot.lane.b32.xlu0 %v4808_v24, %s5422_s14  ;;  %v4823_v45 = vpack.i.bf16 %v5945_v28, %v5942_v14  ;;  %v5973_v24 = vld [vmem:[#allocation2 + $0x158] sm:$0xff]  ;;  %8931 = vst [vmem:[#allocation58_spill] sm:$0xff] %v6027_v55  ;;  %v8932_v28 = vrot.slane %v5913_v6, 1  ;;  %v8933_v14 = vrot.slane %v5899_v21, 1 }
  0x58   : > { %4139 = vmatprep.subr.bf16.mxu0 %v5250_v19  ;;  %v5980_v19 = vsel %vm411_vm3, %v457_v20, %v458_v22  ;;  %v5253_v20 = vld [vmem:[%s8741_s1] sm:$0xff]   ;;  %v5999_v22 = vld [vmem:[%s8741_s1 + $0x118] sm:$0xff]  }
  0x59   : > { %8924 = vst [vmem:[#allocation54_spill] sm:$0xff] %v5980_v19  ;;  %8926 = vst [vmem:[#allocation56_spill] sm:$0xff] %v5999_v22 }
  0x5a   : > { %4814 = vrot.lane.b32.xlu1 %v4813_v9, %s5422_s14  ;;  %v5985_v9 = vld [vmem:[#allocation2 + $0x168] sm:$0xff] }
  0x5b   : > { %4140 = vmatpush3.bf16.msra.mxu0 %v5251_v23  ;;  %4819 = vrot.lane.b32.xlu0 %v4818_v25, %s5422_s14  ;;  %v5255_v23 = vld [vmem:[%s8741_s1 + $0xf8] sm:$0xff]   ;;  %v4833_v25 = vpack.i.bf16 %v5983_v52, %v5980_v19  ;;  %v6059_v52 = vsel %vm411_vm3, %v8933_v14, %v8932_v28  ;;  %v8945_v14 = vrot.slane %v5947_v44, 1 }
  0x5c   : > { %4141 = vmatprep.subr.bf16.mxu0 %v5252_v7  ;;  %v8928_v7 = vrot.slane %v5875_v27, 1  ;;  %4239 = vmatprep.subr.bf16.mxu1 %v5255_v23  ;;  %8934 = vst [vmem:[#allocation59_spill] sm:$0xff] %v6059_v52 }
  0x5d   : > { %4240 = vmatpush3.bf16.msra.mxu1 %v5256_v42 }
  0x5e   : > { %4824 = vrot.lane.b32.xlu1 %v4823_v45, %s5422_s14  ;;  %v6022_v3 = vsel %vm411_vm3, %v8928_v7, %v8927_v57  ;;  %v4838_v57 = vpack.i.bf16 %v5913_v6, %v5899_v21  ;;  %v5260_v7 = vld [vmem:[%s8741_s1 + $0xe8] sm:$0xff]   ;;  %v8936_v45 = vmov %v8932_v28  ;;  %4241 = vmatprep.subr.bf16.mxu1 %v5258_v59  ;;  %v4848_v28 = vpack.i.bf16 %v5926_v29, %v5917_v5  ;;  %v5262_v59 = vld [vmem:[%s8741_s1 + $0xe0] sm:$0xff]  }
  0x5f   : > { %8929 = vst [vmem:[#allocation57_spill] sm:$0xff] %v6022_v3  ;;  %4142 = vmatpush3.bf16.msra.mxu0 %v5253_v20  ;;  %4829 = vrot.lane.b32.xlu0 %v4828_v41, %s5422_s14  ;;  %v5259_v20 = vld [vmem:[%s8741_s1 + $0xb0] sm:$0xff]   ;;  %v4843_v42 = vpack.i.bf16 %v6027_v55, %v6022_v3  ;;  %v8941_v3 = vrot.slane %v5936_v30, 1 }
  0x60   : > { %4615 = vmatprep.subr.bf16.mxu0 %v5999_v22  ;;  %v8958_v22 = vrot.slane %v5985_v9, 1 }
  0x61   : > { %4242 = vmatpush3.bf16.msra.mxu1 %v5259_v20  ;;  %v4878_v20 = vpack.i.bf16 %v5989_v4, %v5985_v9 }
  0x62   : > { %4834 = vrot.lane.b32.xlu1 %v4833_v25, %s5422_s14  ;;  %v8935_v25 = vrot.slane %v5915_v8, 1  ;;  %4243 = vmatprep.subr.bf16.mxu1 %v5260_v7  ;;  %v8939_v7 = vrot.slane %v5917_v5, 1 }
  0x63   : > { %4839 = vrot.lane.b32.xlu0 %v4838_v57, %s5422_s14 }
  0x64   : > { %v6066_v41 = vsel %vm411_vm3, %v8936_v45, %v8935_v25  ;;  %v5261_v25 = vld [vmem:[%s8741_s1 + $0xa8] sm:$0xff]   ;;  %v8938_v45 = vrot.slane %v5926_v29, 1 }
  0x65   : > { %8937 = vst [vmem:[#allocation60_spill] sm:$0xff] %v6066_v41  ;;  %v4853_v57 = vpack.i.bf16 %v6066_v41, %v6059_v52  ;;  %4244 = vmatpush3.bf16.msra.mxu1 %v5261_v25  ;;  %v8944_v52 = vrot.slane %v5949_v16, 1  ;;  %v8951_v41 = vrot.slane %v5971_v13, 1 }
  0x66   : > { %4844 = vrot.lane.b32.xlu1 %v4843_v42, %s5422_s14  ;;  %v6093_v55 = vsel %vm411_vm3, %v8939_v7, %v8938_v45  ;;  %v8942_v23 = vmov %v8938_v45  ;;  %v5263_v45 = vld [vmem:[%s8741_s1 + $0xa0] sm:$0xff]   ;;  %4245 = vmatprep.subr.bf16.mxu1 %v5262_v59  ;;  %v5264_v7 = vld [vmem:[%s8741_s1 + $0xd8] sm:$0xff]  }
  0x67   : > { %8940 = vst [vmem:[#allocation61_spill] sm:$0xff] %v6093_v55  ;;  %v6100_v42 = vsel %vm411_vm3, %v8942_v23, %v8941_v3  ;;  %4849 = vrot.lane.b32.xlu0 %v4848_v28, %s5422_s14  ;;  %v4858_v3 = vpack.i.bf16 %v5949_v16, %v5947_v44  ;;  %v6127_v59 = vsel %vm411_vm3, %v8945_v14, %v8944_v52  ;;  %v8947_v23 = vrot.slane %v5953_v12, 1  ;;  %v6145_v14 = vld [vmem:[#allocation2 + $0x180] sm:$0xff] }
  0x68   : > { %8943 = vst [vmem:[#allocation62_spill] sm:$0xff] %v6100_v42  ;;  %v4863_v25 = vpack.i.bf16 %v6100_v42, %v6093_v55  ;;  %8946 = vst [vmem:[#allocation63_spill] sm:$0xff] %v6127_v59  ;;  %v8948_v10 = vmov %v8944_v52  ;;  %v5265_v42 = vld [vmem:[%s8741_s1 + $0x98] sm:$0xff]   ;;  %v4868_v52 = vpack.i.bf16 %v5973_v24, %v5971_v13  ;;  %v5267_v55 = vld [vmem:[%s8741_s1 + $0x90] sm:$0xff]  }
  0x69   : > { %4246 = vmatpush3.bf16.msra.mxu1 %v5263_v45  ;;  %v5266_v45 = vld [vmem:[%s8741_s1 + $0xd0] sm:$0xff]  }
  0x6a   : > { %4854 = vrot.lane.b32.xlu1 %v4853_v57, %s5422_s14  ;;  %v6134_v57 = vsel %vm411_vm3, %v8948_v10, %v8947_v23  ;;  %v6147_v10 = vld [vmem:[#allocation2 + $0x188] sm:$0xff]  ;;  %4247 = vmatprep.subr.bf16.mxu1 %v5264_v7  ;;  %v8950_v23 = vrot.slane %v5973_v24, 1  ;;  %v8953_v7 = vrot.slane %v5963_v39, 1 }
  0x6b   : > { %8949 = vst [vmem:[#allocation64_spill] sm:$0xff] %v6134_v57  ;;  %4859 = vrot.lane.b32.xlu0 %v4858_v3, %s5422_s14  ;;  %v4873_v3 = vpack.i.bf16 %v6134_v57, %v6127_v59  ;;  %v6180_v59 = vld [vmem:[#allocation2 + $0x190] sm:$0x3]  ;;  %v8957_v57 = vrot.slane %v5989_v4, 1 }
  0x6c   : > { %v6165_v28 = vsel %vm411_vm3, %v8951_v41, %v8950_v23  ;;  %v8954_v19 = vmov %v8950_v23  ;;  %8956 = vst [vmem:[#allocation67_spill] sm:$0xff] %v6180_v59  ;;  %v645_v41 = vrot.slane %v6145_v14, 2  ;;  %v646_v23 = vrot.slane %v6147_v10, 2 }
  0x6d   : > { %8952 = vst [vmem:[#allocation65_spill] sm:$0xff] %v6165_v28  ;;  %4248 = vmatpush3.bf16.msra.mxu1 %v5265_v42  ;;  %v648_v42 = vrot.slane %v6180_v59, 2  ;;  %v6206_v59 = vsel %vm411_vm3, %v8958_v22, %v8957_v57 }
  0x6e   : > { %4864 = vrot.lane.b32.xlu1 %v4863_v25, %s5422_s14  ;;  %v6172_v25 = vsel %vm411_vm3, %v8954_v19, %v8953_v7  ;;  %4249 = vmatprep.subr.bf16.mxu1 %v5266_v45  ;;  %v5269_v45 = vld [vmem:[%s8741_s1 + $0x88] sm:$0xff]   ;;  %8959 = vst [vmem:[#allocation68_spill] sm:$0xff] %v6206_v59  ;;  %v5270_v19 = vld [vmem:[%s8741_s1 + $0xc0] sm:$0xff]   ;;  %v6219_v7 = vsel %vm492_vm4, %v645_v41, %v646_v23 }
  0x6f   : > { %8955 = vst [vmem:[#allocation66_spill] sm:$0xff] %v6172_v25  ;;  %4869 = vrot.lane.b32.xlu0 %v4868_v52, %s5422_s14  ;;  %v4883_v47 = vpack.i.bf16 %v6172_v25, %v6165_v28  ;;  %v8961_v25 = vmov %v8957_v57  ;;  %8963 = vst [vmem:[#allocation70_spill] sm:$0xff] %v6219_v7  ;;  %v6222_v28 = vsel %vm492_vm4, %v646_v23, %v648_v42  ;;  %v8967_v23 = vrot.slane %v5684_v43, 2 }
  0x70   : > { %8964 = vst [vmem:[#allocation71_spill] sm:$0xff] %v6222_v28  ;;  %v4888_v57 = vpack.i.bf16 %v6147_v10, %v6145_v14  ;;  %v8970_v43 = vrot.slane %v5667_v36, 2 }
  0x71   : > { %4250 = vmatpush3.bf16.msra.mxu1 %v5267_v55 }
  0x72   : > { %4874 = vrot.lane.b32.xlu1 %v4873_v3, %s5422_s14  ;;  %v8960_v3 = vrot.slane %v5977_v53, 1  ;;  %4251 = vmatprep.subr.bf16.mxu1 %v5268_v54  ;;  %v566_v54 = vrot.slane %v5963_v39, 2 }
  0x73   : > { %4879 = vrot.lane.b32.xlu0 %v4878_v20, %s5422_s14 }
  0x74   : > { %v6213_v52 = vsel %vm411_vm3, %v8961_v25, %v8960_v3  ;;  %v8965_v25 = vrot.slane %v5663_v33, 2  ;;  %v8966_v3 = vrot.slane %v5661_v32, 2  ;;  %v5271_v32 = vld [vmem:[%s8741_s1 + $0x80] sm:$0xff]  }
  0x75   : > { %8962 = vst [vmem:[#allocation69_spill] sm:$0xff] %v6213_v52  ;;  %v4893_v20 = vpack.i.bf16 %v6213_v52, %v6206_v59  ;;  %4252 = vmatpush3.bf16.msra.mxu1 %v5269_v45  ;;  %v8975_v45 = vrot.slane %v5696_v50, 2  ;;  %v5328_v59 = vld [vmem:[#allocation2 + $0xc8] sm:$0xff] }
  0x76   : > { %v6234_v41 = vsel %vm492_vm4, %v8966_v3, %v8965_v25  ;;  %v8968_v55 = vmov %v8965_v25  ;;  %4884 = vrot.lane.b32.xlu1 %v4883_v47, %s5422_s14  ;;  %v8969_v25 = vrot.slane %v5677_v38, 2  ;;  %v8971_v3 = vrot.slane %v5694_v49, 2  ;;  %4253 = vmatprep.subr.bf16.mxu1 %v5270_v19 }
  0x77   : > { %v6241_v42 = vsel %vm492_vm4, %v8968_v55, %v8967_v23  ;;  %4889 = vrot.lane.b32.xlu0 %v4888_v57, %s5422_s14  ;;  %v8973_v55 = vrot.slane %v5699_v51, 2  ;;  %v8974_v49 = vrot.slane %v5688_v46, 2  ;;  %v8977_v19 = vrot.slane %v5723_v63, 2 }
  0x78   : > { %v6255_v33 = vsel %vm492_vm4, %v8970_v43, %v8969_v25  ;;  %v8972_v47 = vmov %v8969_v25  ;;  %v4898_v39 = vpack.i.bf16 %v6241_v42, %v6234_v41 }
  0x79   : > { %v6262_v23 = vsel %vm492_vm4, %v8972_v47, %v8971_v3  ;;  %v6275_v38 = vsel %vm492_vm4, %v8974_v49, %v8973_v55  ;;  %v8976_v57 = vmov %v8973_v55  ;;  %v8979_v3 = vrot.slane %v5716_v60, 2  ;;  %4254 = vmatpush3.bf16.msra.mxu1 %v5271_v32 }
  0x7a   : > { %4894 = vrot.lane.b32.xlu1 %v4893_v20, %s5422_s14  ;;  %v4903_v36 = vpack.i.bf16 %v6262_v23, %v6255_v33  ;;  %v6282_v25 = vsel %vm492_vm4, %v8976_v57, %v8975_v45  ;;  %v8978_v20 = vrot.slane %v5721_v62, 2  ;;  %v8980_v46 = vmov %v8977_v19 }
  0x7b   : > { %v6296_v47 = vsel %vm492_vm4, %v8980_v46, %v8979_v3  ;;  %4899 = vrot.lane.b32.xlu0 %v4898_v39, %s5422_s14  ;;  %v4908_v50 = vpack.i.bf16 %v6282_v25, %v6275_v38  ;;  %v8981_v62 = vrot.slane %v5760_v37, 2  ;;  %v8982_v60 = vrot.slane %v5758_v35, 2 }
  0x7c   : > { %v6289_v43 = vsel %vm492_vm4, %v8978_v20, %v8977_v19  ;;  %v8983_v55 = vrot.slane %v5745_v17, 2  ;;  %v8985_v49 = vrot.slane %v5829_v61, 2  ;;  %v8987_v57 = vrot.slane %v5809_v1, 2 }
  0x7d   : > { %v4913_v51 = vpack.i.bf16 %v6296_v47, %v6289_v43  ;;  %v6309_v63 = vsel %vm492_vm4, %v8982_v60, %v8981_v62  ;;  %v8984_v32 = vmov %v8981_v62  ;;  %v8990_v20 = vrot.slane %v5843_v2, 2 }
  0x7e   : > { %4904 = vrot.lane.b32.xlu1 %v4903_v36, %s5422_s14  ;;  %v6316_v39 = vsel %vm492_vm4, %v8984_v32, %v8983_v55  ;;  %v8986_v36 = vrot.slane %v5784_v48, 2  ;;  %v8988_v35 = vmov %v8985_v49  ;;  %v8989_v48 = vrot.slane %v5845_v40, 2 }
  0x7f   : > { %v6330_v19 = vsel %vm492_vm4, %v8988_v35, %v8987_v57  ;;  %4909 = vrot.lane.b32.xlu0 %v4908_v50, %s5422_s14  ;;  %v4918_v17 = vpack.i.bf16 %v6316_v39, %v6309_v63  ;;  %v8991_v61 = vrot.slane %v5847_v18, 2  ;;  %v8994_v50 = vrot.slane %v5854_v56, 2 }
  0x80   : > { %v6323_v45 = vsel %vm492_vm4, %v8986_v36, %v8985_v49  ;;  %v6343_v1 = vsel %vm492_vm4, %v8990_v20, %v8989_v48  ;;  %v8992_v3 = vmov %v8989_v48  ;;  %v8997_v60 = vrot.slane %v5867_v15, 2 }
  0x81   : > { %v4923_v37 = vpack.i.bf16 %v6330_v19, %v6323_v45  ;;  %v6350_v46 = vsel %vm492_vm4, %v8992_v3, %v8991_v61  ;;  %v8998_v2 = vmov %v8994_v50  ;;  %v9000_v40 = vrot.slane %v5864_v58, 2 }
  0x82   : > { %4914 = vrot.lane.b32.xlu1 %v4913_v51, %s5422_s14  ;;  %8993 = vst [vmem:[#allocation72_spill] sm:$0xff] %v6350_v46  ;;  %v8995_v51 = vrot.slane %v5852_v11, 2  ;;  %v6364_v55 = vsel %vm492_vm4, %v8998_v2, %v8997_v60  ;;  %v4928_v18 = vpack.i.bf16 %v6350_v46, %v6343_v1  ;;  %v9001_v32 = vrot.slane %v5862_v31, 2 }
  0x83   : > { %8999 = vst [vmem:[#allocation74_spill] sm:$0xff] %v6364_v55  ;;  %4919 = vrot.lane.b32.xlu0 %v4918_v17, %s5422_s14  ;;  %v9002_v49 = vrot.slane %v5881_v26, 2  ;;  %v9003_v15 = vmov %v9000_v40  ;;  %v9004_v57 = vrot.slane %v5877_v0, 2  ;;  %v9005_v35 = vrot.slane %v5875_v27, 2 }
  0x84   : > { %v6357_v62 = vsel %vm492_vm4, %v8995_v51, %v8994_v50  ;;  %v6374_v11 = vsel %vm492_vm4, %v9001_v32, %v9000_v40  ;;  %v9006_v17 = vrot.slane %v5885_v34, 2  ;;  %v9008_v48 = vrot.slane %v5913_v6, 2 }
  0x85   : > { %8996 = vst [vmem:[#allocation73_spill] sm:$0xff] %v6357_v62  ;;  %v6381_v56 = vsel %vm492_vm4, %v9003_v15, %v9002_v49  ;;  %v4933_v36 = vpack.i.bf16 %v6364_v55, %v6357_v62  ;;  %v6391_v31 = vsel %vm492_vm4, %v9005_v35, %v9004_v57  ;;  %v9007_v26 = vmov %v9004_v57 }
  0x86   : > { %4924 = vrot.lane.b32.xlu1 %v4923_v37, %s5422_s14  ;;  %v6398_v58 = vsel %vm492_vm4, %v9007_v26, %v9006_v17  ;;  %v4938_v37 = vpack.i.bf16 %v6381_v56, %v6374_v11  ;;  %v9009_v20 = vrot.slane %v5899_v21, 2  ;;  %v9010_v61 = vrot.slane %v5915_v8, 2  ;;  %v9023_v17 = vld [vmem:[#allocation67_spill] sm:$0xff] }
  0x87   : > { %4929 = vrot.lane.b32.xlu0 %v4928_v18, %s5422_s14  ;;  %v9011_v34 = vmov %v9008_v48  ;;  %v9012_v3 = vrot.slane %v5926_v29, 2  ;;  %v9013_v50 = vrot.slane %v5917_v5, 2  ;;  %v9014_v60 = vrot.slane %v5936_v30, 2 }
  0x88   : > { %v6408_v27 = vsel %vm492_vm4, %v9009_v20, %v9008_v48  ;;  %v6415_v0 = vsel %vm492_vm4, %v9011_v34, %v9010_v61  ;;  %v4943_v6 = vpack.i.bf16 %v6398_v58, %v6391_v31  ;;  %v9016_v30 = vrot.slane %v5949_v16, 2  ;;  %v6472_v48 = vld [vmem:[#allocation2 + $0x198] sm:$0xff]  ;;  %v6474_v20 = vld [vmem:[#allocation2 + $0x1a0] sm:$0xff] }
  0x89   : > { %v6422_v51 = vsel %vm492_vm4, %v9013_v50, %v9012_v3  ;;  %v9015_v21 = vmov %v9012_v3  ;;  %v4948_v8 = vpack.i.bf16 %v6415_v0, %v6408_v27  ;;  %v9017_v29 = vrot.slane %v5947_v44, 2  ;;  %9024 = vst [vmem:[#allocation67_spill] sm:$0xff] %v6472_v48  ;;  %9025 = vst [vmem:[#allocation75_spill] sm:$0xff] %v6474_v20 }
  0x8a   : > { %v6429_v2 = vsel %vm492_vm4, %v9015_v21, %v9014_v60  ;;  %4934 = vrot.lane.b32.xlu1 %v4933_v36, %s5422_s14  ;;  %v9018_v40 = vrot.slane %v5953_v12, 2  ;;  %v9019_v32 = vmov %v9016_v30  ;;  %v608_v15 = vrot.slane %v6145_v14, 1 }
  0x8b   : > { %v4953_v5 = vpack.i.bf16 %v6429_v2, %v6422_v51  ;;  %4939 = vrot.lane.b32.xlu0 %v4938_v37, %s5422_s14  ;;  %v6444_v18 = vsel %vm492_vm4, %v9017_v29, %v9016_v30  ;;  %v609_v36 = vrot.slane %v6147_v10, 1  ;;  %v9020_v57 = vrot.slane %v5973_v24, 2  ;;  %v5310_v29 = vld [vmem:[#allocation2] sm:$0xff] }
  0x8c   : > { %v6451_v49 = vsel %vm492_vm4, %v9019_v32, %v9018_v40  ;;  %v9021_v44 = vrot.slane %v5971_v13, 2  ;;  %v611_v26 = vrot.slane %v9023_v17, 1  ;;  %v568_v14 = vrot.slane %v5985_v9, 2  ;;  %v6476_v13 = vld [vmem:[#allocation2 + $0x1a8] sm:$0x3] }
  0x8d   : > { %v9022_v12 = vmov %v9020_v57  ;;  %v569_v10 = vrot.slane %v5989_v4, 2  ;;  %v571_v37 = vrot.slane %v5977_v53, 2  ;;  %9026 = vst [vmem:[#allocation76_spill] sm:$0xff] %v6476_v13  ;;  %v4958_v24 = vpack.i.bf16 %v6451_v49, %v6444_v18  ;;  %v5311_v32 = vld [vmem:[#allocation2 + $0x8] sm:$0xff] }
  0x8e   : > { %4944 = vrot.lane.b32.xlu1 %v4943_v6, %s5422_s14  ;;  %v6461_v35 = vsel %vm492_vm4, %v9021_v44, %v9020_v57  ;;  %v6466_v16 = vsel %vm492_vm4, %v9022_v12, %v566_v54  ;;  %v6484_v9 = vsel %vm411_vm3, %v608_v15, %v609_v36  ;;  %v6488_v4 = vsel %vm411_vm3, %v609_v36, %v611_v26  ;;  %v5312_v36 = vld [vmem:[#allocation2 + $0x10] sm:$0x3] }
  0x8f   : > { %4949 = vrot.lane.b32.xlu0 %v4948_v8, %s5422_s14  ;;  %v4963_v54 = vpack.i.bf16 %v6466_v16, %v6461_v35  ;;  %9027 = vst [vmem:[#allocation77_spill] sm:$0xff] %v6484_v9  ;;  %9028 = vst [vmem:[#allocation78_spill] sm:$0xff] %v6488_v4  ;;  %v653_v53 = vrot.slane %v6472_v48, 1  ;;  %v654_v61 = vrot.slane %v6474_v20, 1  ;;  %v656_v34 = vrot.slane %v6476_v13, 1 }
  0x90   : > { %v6494_v3 = vsel %vm492_vm4, %v568_v14, %v569_v10  ;;  %v6497_v50 = vsel %vm492_vm4, %v569_v10, %v571_v37  ;;  %v4968_v60 = vpack.i.bf16 %v6488_v4, %v6484_v9  ;;  %v4983_v30 = vpack.i.bf16 %v6222_v28, %v6219_v7 }
  0x91   : > { %v4973_v21 = vpack.i.bf16 %v6497_v50, %v6494_v3  ;;  %v655_v6 = vsel %vm411_vm3, %v653_v53, %v654_v61  ;;  %v657_v8 = vsel %vm411_vm3, %v654_v61, %v656_v34  ;;  %v493_v40 = vrot.slane %v5310_v29, 2 }
  0x92   : > { %4954 = vrot.lane.b32.xlu1 %v4953_v5, %s5422_s14  ;;  %v4978_v5 = vpack.i.bf16 %v657_v8, %v655_v6  ;;  %v494_v15 = vrot.slane %v5311_v32, 2  ;;  %v496_v57 = vrot.slane %v5312_v36, 2 }
  0x93   : > { %4959 = vrot.lane.b32.xlu0 %v4958_v24, %s5422_s14 }
  0x94   : > { %v495_v12 = vsel %vm492_vm4, %v493_v40, %v494_v15  ;;  %v497_v17 = vsel %vm492_vm4, %v494_v15, %v496_v57 }
  0x96   : > { %4964 = vrot.lane.b32.xlu1 %v4963_v54, %s5422_s14 }
  0x97   : > { %4969 = vrot.lane.b32.xlu0 %v4968_v60, %s5422_s14 }
  0x9a   : > { %4974 = vrot.lane.b32.xlu1 %v4973_v21, %s5422_s14 }
  0x9b   : > { %4979 = vrot.lane.b32.xlu0 %v4978_v5, %s5422_s14 }
  0x9e   : > { %4984 = vrot.lane.b32.xlu1 %v4983_v30, %s5422_s14 }
  0xa7   : > { %v4740_v44 = vpop.permute.xlu0 %4739 }
  0xa8   : > { %v4742_v26 = vunpack.i.h.bf16 %v4740_v44  ;;  %v4741_v14 = vunpack.i.l.bf16 %v4740_v44 }
  0xa9   : > { %v4750_v10 = vpop.permute.xlu1 %4749 }
  0xaa   : > { %v4752_v37 = vunpack.i.h.bf16 %v4750_v10  ;;  %v4751_v24 = vunpack.i.l.bf16 %v4750_v10  ;;  %v999_v54 = vsel %vm230_vm0, %v495_v12, %v4741_v14  ;;  %v1000_v53 = vsel %vm230_vm0, %v497_v17, %v4742_v26 }
  0xab   : > { %v4745_v61 = vpop.permute.xlu0 %4744  ;;  %v1068_v34 = vpack.c.bf16 %v1000_v53, %v999_v54 }
  0xac   : > { %v1001_v60 = vsel %vm230_vm0, %v6234_v41, %v4751_v24  ;;  %v1002_v21 = vsel %vm230_vm0, %v6241_v42, %v4752_v37  ;;  %v4747_v6 = vunpack.i.h.bf16 %v4745_v61  ;;  %v4746_v8 = vunpack.i.l.bf16 %v4745_v61  ;;  %v5257_v41 = vld [vmem:[%s8741_s1 + $0x110] sm:$0xff]   ;;  %v9029_v37 = vld [vmem:[#allocation56_spill] sm:$0xff] }
  0xad   : > { %v4755_v5 = vpop.permute.xlu1 %4754  ;;  %1501 = vmatprep.mubr.bf16.mxu0 %v1068_v34  ;;  %v1073_v30 = vpack.c.bf16 %v1002_v21, %v1001_v60  ;;  %v5314_v24 = vld [vmem:[#allocation2 + $0x20] sm:$0xff]  ;;  %v5315_v60 = vld [vmem:[#allocation2 + $0x30] sm:$0xff] }
  0xae   : > { %v967_v40 = vsel %vm230_vm0, %v5310_v29, %v4746_v8  ;;  %v968_v15 = vsel %vm230_vm0, %v5311_v32, %v4747_v6  ;;  %v4757_v36 = vunpack.i.h.bf16 %v4755_v5  ;;  %v4756_v57 = vunpack.i.l.bf16 %v4755_v5  ;;  %v5313_v29 = vld [vmem:[#allocation2 + $0x18] sm:$0xff]  ;;  %v5272_v5 = vld [vmem:[%s8741_s1 + $0x108] sm:$0xff]  }
  0xaf   : > { %v4760_v44 = vpop.permute.xlu0 %4759  ;;  %v1067_v12 = vpack.c.bf16 %v968_v15, %v967_v40  ;;  %v5316_v6 = vld [vmem:[#allocation2 + $0x38] sm:$0xff] }
  0xb0   : > { %v4762_v17 = vunpack.i.h.bf16 %v4760_v44  ;;  %v4761_v26 = vunpack.i.l.bf16 %v4760_v44  ;;  %v969_v32 = vsel %vm230_vm0, %v5313_v29, %v4756_v57  ;;  %v970_v54 = vsel %vm230_vm0, %v5314_v24, %v4757_v36 }
  0xb1   : > { %v4765_v42 = vpop.permute.xlu1 %4764  ;;  %1502 = vmatmul.mubr.bf16.vlgmr.msra.gmra.mxu0 %v1067_v12  ;;  %v1072_v15 = vpack.c.bf16 %v970_v54, %v969_v32 }
  0xb2   : > { %v4767_v14 = vunpack.i.h.bf16 %v4765_v42  ;;  %v4766_v10 = vunpack.i.l.bf16 %v4765_v42  ;;  %4616 = vmatpush3.bf16.msra.mxu0 %v9029_v37  ;;  %1509 = vmatprep.mubr.bf16.mxu0 %v1073_v30  ;;  %v1003_v61 = vsel %vm230_vm0, %v6255_v33, %v4761_v26  ;;  %v1004_v34 = vsel %vm230_vm0, %v6262_v23, %v4762_v17  ;;  %v5273_v17 = vld [vmem:[%s8741_s1 + $0x100] sm:$0xff]  }
  0xb3   : > { %v4770_v53 = vpop.permute.xlu0 %4769  ;;  %4617 = vmatprep.subr.bf16.mxu0 %v5257_v41  ;;  %v1077_v36 = vpack.c.bf16 %v1004_v34, %v1003_v61  ;;  %v5317_v34 = vld [vmem:[#allocation2 + $0x48] sm:$0xff] }
  0xb4   : > { %v971_v21 = vsel %vm230_vm0, %v5315_v60, %v4766_v10  ;;  %v972_v8 = vsel %vm230_vm0, %v5316_v6, %v4767_v14  ;;  %v4772_v57 = vunpack.i.h.bf16 %v4770_v53  ;;  %v4771_v44 = vunpack.i.l.bf16 %v4770_v53 }
  0xb5   : > { %v4775_v30 = vpop.permute.xlu1 %4774  ;;  %v1070_v40 = vpack.c.bf16 %v972_v8, %v971_v21  ;;  %v5318_v21 = vld [vmem:[#allocation2 + $0x50] sm:$0xff] }
  0xb6   : > { %4618 = vmatpush3.bf16.msra.mxu0 %v5257_v41  ;;  %v1005_v14 = vsel %vm230_vm0, %v6275_v38, %v4771_v44  ;;  %v1006_v10 = vsel %vm230_vm0, %v6282_v25, %v4772_v57  ;;  %v4777_v37 = vunpack.i.h.bf16 %v4775_v30  ;;  %v4776_v29 = vunpack.i.l.bf16 %v4775_v30 }
  0xb7   : > { %1662 = vmatprep.mubr.bf16.mxu1 %v1070_v40  ;;  %v4780_v12 = vpop.permute.xlu0 %4779  ;;  %4619 = vmatprep.subr.bf16.mxu0 %v5272_v5  ;;  %v1081_v32 = vpack.c.bf16 %v1006_v10, %v1005_v14 }
  0xb8   : > { %v4782_v24 = vunpack.i.h.bf16 %v4780_v12  ;;  %v4781_v54 = vunpack.i.l.bf16 %v4780_v12  ;;  %v973_v60 = vsel %vm230_vm0, %v5317_v34, %v4776_v29  ;;  %v974_v6 = vsel %vm230_vm0, %v5318_v21, %v4777_v37  ;;  %v5319_v37 = vld [vmem:[#allocation2 + $0x60] sm:$0xff] }
  0xb9   : > { %1510 = vmatmul.mubr.bf16.gmra.mxu0 %v1072_v15 }
  0xba   : > { %1517 = vmatprep.mubr.bf16.mxu0 %v1077_v36  ;;  %4620 = vmatpush3.bf16.msra.mxu0 %v5272_v5  ;;  %v1007_v5 = vsel %vm230_vm0, %v6289_v43, %v4781_v54  ;;  %v1008_v30 = vsel %vm230_vm0, %v6296_v47, %v4782_v24  ;;  %v6553_v36 = vpack.c.bf16 %v974_v6, %v973_v60 }
  0xbb   : > { %4621 = vmatprep.subr.bf16.mxu0 %v5273_v17  ;;  %v1085_v44 = vpack.c.bf16 %v1008_v30, %v1007_v5 }
  0xbe   : > { %4622 = vmatpush3.bf16.msra.mxu0 %v5273_v17 }
  0xc0   : > { %v4785_v26 = vpop.permute.xlu1 %4784 }
  0xc1   : > { %v4790_v42 = vpop.permute.xlu0 %4789  ;;  %1518 = vmatmul.mubr.bf16.gmra.mxu0 %v1070_v40  ;;  %v4787_v57 = vunpack.i.h.bf16 %v4785_v26  ;;  %v4786_v40 = vunpack.i.l.bf16 %v4785_v26 }
  0xc2   : > { %1525 = vmatprep.mubr.bf16.mxu0 %v1081_v32  ;;  %v4792_v12 = vunpack.i.h.bf16 %v4790_v42  ;;  %v4791_v17 = vunpack.i.l.bf16 %v4790_v42  ;;  %v5320_v32 = vld [vmem:[#allocation2 + $0x68] sm:$0xff] }
  0xc3   : > { %v975_v29 = vsel %vm230_vm0, %v5319_v37, %v4786_v40  ;;  %v976_v24 = vsel %vm230_vm0, %v5320_v32, %v4787_v57 }
  0xc4   : > { %v4795_v41 = vpop.permute.xlu1 %4794  ;;  %v1009_v26 = vsel %vm230_vm0, %v6309_v63, %v4791_v17  ;;  %v1010_v42 = vsel %vm230_vm0, %v6316_v39, %v4792_v12  ;;  %v6570_v60 = vpack.c.bf16 %v976_v24, %v975_v29  ;;  %v5321_v17 = vld [vmem:[#allocation2 + $0x78] sm:$0xff]  ;;  %v5322_v12 = vld [vmem:[#allocation2 + $0x80] sm:$0xff] }
  0xc5   : > { %v4800_v53 = vpop.permute.xlu0 %4799  ;;  %v4797_v21 = vunpack.i.h.bf16 %v4795_v41  ;;  %v4796_v6 = vunpack.i.l.bf16 %v4795_v41  ;;  %v1089_v5 = vpack.c.bf16 %v1010_v42, %v1009_v26 }
  0xc6   : > { %v4802_v30 = vunpack.i.h.bf16 %v4800_v53  ;;  %v4801_v40 = vunpack.i.l.bf16 %v4800_v53 }
  0xc7   : > { %v977_v37 = vsel %vm230_vm0, %v5321_v17, %v4796_v6  ;;  %v978_v32 = vsel %vm230_vm0, %v5322_v12, %v4797_v21 }
  0xc8   : > { %v4805_v61 = vpop.permute.xlu1 %4804  ;;  %v1011_v41 = vsel %vm230_vm0, %v6323_v45, %v4801_v40  ;;  %v1012_v53 = vsel %vm230_vm0, %v6330_v19, %v4802_v30  ;;  %v6587_v26 = vpack.c.bf16 %v978_v32, %v977_v37  ;;  %v5323_v40 = vld [vmem:[#allocation2 + $0x90] sm:$0xff]  ;;  %v5324_v30 = vld [vmem:[#allocation2 + $0x98] sm:$0xff] }
  0xc9   : > { %v4810_v8 = vpop.permute.xlu0 %4809  ;;  %1526 = vmatmul.mubr.bf16.gmra.mxu0 %v6553_v36  ;;  %v4807_v42 = vunpack.i.h.bf16 %v4805_v61  ;;  %v1093_v22 = vpack.c.bf16 %v1012_v53, %v1011_v41 }
  0xca   : > { %1533 = vmatprep.mubr.bf16.mxu0 %v1085_v44  ;;  %v4812_v7 = vunpack.i.h.bf16 %v4810_v8  ;;  %v4811_v6 = vunpack.i.l.bf16 %v4810_v8 }
  0xcb   : > { %v980_v28 = vsel %vm230_vm0, %v5324_v30, %v4807_v42 }
  0xcc   : > { %v6551_v15 = vpop.permute.xlu1 %4814  ;;  %v1014_v8 = vsel %vm230_vm0, %v6350_v46, %v4812_v7  ;;  %v5325_v7 = vld [vmem:[#allocation2 + $0xa8] sm:$0xff] }
  0xcd   : > { %v6555_v14 = vpop.permute.xlu0 %4819  ;;  %v4816_v53 = vunpack.i.l.bf16 %v6551_v15 }
  0xce   : > { %v4821_v42 = vunpack.i.l.bf16 %v6555_v14 }
  0xd0   : > { %v6557_v10 = vpop.permute.xlu1 %4824 }
  0xd1   : > { %v6562_v54 = vpop.permute.xlu0 %4829  ;;  %1534 = vmatmul.mubr.bf16.gmra.mxu0 %v6570_v60 }
  0xd2   : > { %1541 = vmatprep.mubr.bf16.mxu0 %v1089_v5  ;;  %v4806_v5 = vunpack.i.l.bf16 %v4805_v61  ;;  %v1013_v61 = vsel %vm230_vm0, %v6343_v1, %v4811_v6  ;;  %v5326_v6 = vld [vmem:[#allocation2 + $0xb0] sm:$0xff] }
  0xd4   : > { %v6568_v34 = vpop.permute.xlu1 %4834  ;;  %v979_v12 = vsel %vm230_vm0, %v5323_v40, %v4806_v5  ;;  %v1097_v5 = vpack.c.bf16 %v1014_v8, %v1013_v61  ;;  %v4822_v40 = vunpack.i.h.bf16 %v6555_v14  ;;  %v4827_v8 = vunpack.i.h.bf16 %v6557_v10 }
  0xd5   : > { %v6572_v44 = vpop.permute.xlu0 %4839  ;;  %v6604_v41 = vpack.c.bf16 %v980_v28, %v979_v12  ;;  %v981_v28 = vsel %vm230_vm0, %v5325_v7, %v4816_v53  ;;  %v4832_v7 = vunpack.i.h.bf16 %v6562_v54 }
  0xd6   : > { %v1016_v14 = vsel %vm230_vm0, %v6364_v55, %v4822_v40  ;;  %v5327_v40 = vld [vmem:[#allocation2 + $0xc0] sm:$0xff]  ;;  %v984_v55 = vsel %vm230_vm0, %v5328_v59, %v4827_v8 }
  0xd7   : > { %v1018_v46 = vsel %vm230_vm0, %v6381_v56, %v4832_v7  ;;  %v4841_v7 = vunpack.i.l.bf16 %v6572_v44 }
  0xd8   : > { %v6574_v57 = vpop.permute.xlu1 %4844 }
  0xd9   : > { %v6579_v29 = vpop.permute.xlu0 %4849  ;;  %1542 = vmatmul.mubr.bf16.gmra.mxu0 %v6587_v26 }
  0xda   : > { %1549 = vmatprep.mubr.bf16.mxu0 %v1093_v22  ;;  %v4817_v22 = vunpack.i.h.bf16 %v6551_v15  ;;  %v1015_v15 = vsel %vm230_vm0, %v6357_v62, %v4821_v42 }
  0xdb   : > { %v1101_v53 = vpack.c.bf16 %v1016_v14, %v1015_v15 }
  0xdc   : > { %v6585_v24 = vpop.permute.xlu1 %4854  ;;  %v982_v12 = vsel %vm230_vm0, %v5326_v6, %v4817_v22  ;;  %v4831_v22 = vunpack.i.l.bf16 %v6562_v54 }
  0xdd   : > { %v6589_v17 = vpop.permute.xlu0 %4859  ;;  %v6627_v13 = vpack.c.bf16 %v982_v12, %v981_v28  ;;  %v9031_v12 = vld [vmem:[#allocation28_spill] sm:$0xff] }
  0xe0   : > { %v6591_v21 = vpop.permute.xlu1 %4864 }
  0xe1   : > { %v6596_v37 = vpop.permute.xlu0 %4869  ;;  %1550 = vmatmul.mubr.bf16.gmra.mxu0 %v6604_v41 }
  0xe2   : > { %1557 = vmatprep.mubr.bf16.mxu0 %v1097_v5  ;;  %v4826_v5 = vunpack.i.l.bf16 %v6557_v10  ;;  %v9030_v10 = vld [vmem:[#allocation27_spill] sm:$0xff] }
  0xe4   : > { %v6602_v32 = vpop.permute.xlu1 %4874  ;;  %v983_v52 = vsel %vm230_vm0, %v5327_v40, %v4826_v5  ;;  %v4837_v5 = vunpack.i.h.bf16 %v6568_v34 }
  0xe5   : > { %v6610_v30 = vpop.permute.xlu0 %4879  ;;  %v6643_v59 = vpack.c.bf16 %v984_v55, %v983_v52 }
  0xe8   : > { %v6612_v4 = vpop.permute.xlu1 %4884 }
  0xe9   : > { %v6617_v9 = vpop.permute.xlu0 %4889  ;;  %1558 = vmatmul.mubr.bf16.gmra.mxu0 %v6627_v13 }
  0xea   : > { %1565 = vmatprep.mubr.bf16.mxu0 %v1101_v53  ;;  %v9033_v53 = vld [vmem:[#allocation30_spill] sm:$0xff] }
  0xec   : > { %v6623_v61 = vpop.permute.xlu1 %4894 }
  0xed   : > { %v4900_v6 = vpop.permute.xlu0 %4899 }
  0xee   : > { %v4902_v20 = vunpack.i.h.bf16 %v4900_v6  ;;  %v4901_v48 = vunpack.i.l.bf16 %v4900_v6  ;;  %v1017_v6 = vsel %vm230_vm0, %v6374_v11, %v4831_v22  ;;  %v4842_v22 = vunpack.i.h.bf16 %v6572_v44 }
  0xef   : > { %v1105_v40 = vpack.c.bf16 %v1018_v46, %v1017_v6  ;;  %v1019_v46 = vsel %vm230_vm0, %v6391_v31, %v4841_v7  ;;  %v4847_v44 = vunpack.i.h.bf16 %v6574_v57  ;;  %v9034_v6 = vld [vmem:[#allocation32_spill] sm:$0xff] }
  0xf0   : > { %v4905_v42 = vpop.permute.xlu1 %4904  ;;  %v1031_v28 = vsel %vm230_vm0, %v9030_v10, %v4901_v48  ;;  %v1032_v15 = vsel %vm230_vm0, %v9031_v12, %v4902_v20  ;;  %v4836_v48 = vunpack.i.l.bf16 %v6568_v34  ;;  %v9032_v20 = vld [vmem:[#allocation29_spill] sm:$0xff]  ;;  %v5329_v34 = vld [vmem:[#allocation2 + $0xd8] sm:$0xff] }
  0xf1   : > { %v4907_v14 = vunpack.i.h.bf16 %v4905_v42  ;;  %v4906_v54 = vunpack.i.l.bf16 %v4905_v42  ;;  %v1069_v62 = vpack.c.bf16 %v1032_v15, %v1031_v28  ;;  %v4910_v10 = vpop.permute.xlu0 %4909  ;;  %1566 = vmatmul.mubr.bf16.gmra.mxu0 %v6643_v59  ;;  %v5330_v28 = vld [vmem:[#allocation2 + $0xe0] sm:$0xff]  ;;  %v1020_v15 = vsel %vm230_vm0, %v6398_v58, %v4842_v22 }
  0xf2   : > { %v4911_v55 = vunpack.i.l.bf16 %v4910_v10  ;;  %1573 = vmatprep.mubr.bf16.mxu0 %v1105_v40  ;;  %v986_v12 = vsel %vm230_vm0, %v5330_v28, %v4837_v5  ;;  %v4856_v28 = vunpack.i.l.bf16 %v6585_v24 }
  0xf3   : > { %1663 = vmatmul.mubr.bf16.vlgmr.msra.gmra.mxu1 %v1069_v62  ;;  %v1033_v8 = vsel %vm230_vm0, %v9032_v20, %v4906_v54  ;;  %v1034_v42 = vsel %vm230_vm0, %v9033_v53, %v4907_v14  ;;  %v4912_v62 = vunpack.i.h.bf16 %v4910_v10  ;;  %v4846_v54 = vunpack.i.l.bf16 %v6574_v57  ;;  %v9035_v20 = vld [vmem:[#allocation33_spill] sm:$0xff]  ;;  %v5331_v57 = vld [vmem:[#allocation2 + $0xf0] sm:$0xff] }
  0xf4   : > { %1670 = vmatprep.mubr.bf16.mxu1 %v6553_v36  ;;  %v1074_v52 = vpack.c.bf16 %v1034_v42, %v1033_v8  ;;  %v985_v36 = vsel %vm230_vm0, %v5329_v34, %v4836_v48  ;;  %v1035_v48 = vsel %vm230_vm0, %v9034_v6, %v4911_v55  ;;  %v1109_v8 = vpack.c.bf16 %v1020_v15, %v1019_v46  ;;  %v4915_v40 = vpop.permute.xlu1 %4914  ;;  %v9037_v15 = vld [vmem:[#allocation42_spill] sm:$0xff] }
  0xf5   : > { %v6661_v14 = vpack.c.bf16 %v986_v12, %v985_v36  ;;  %v1036_v5 = vsel %vm230_vm0, %v9035_v20, %v4912_v62  ;;  %v4852_v53 = vunpack.i.h.bf16 %v6579_v29  ;;  %v4851_v42 = vunpack.i.l.bf16 %v6579_v29  ;;  %v9036_v12 = vld [vmem:[#allocation41_spill] sm:$0xff]  ;;  %v4920_v20 = vpop.permute.xlu0 %4919 }
  0xf6   : > { %v1078_v22 = vpack.c.bf16 %v1036_v5, %v1035_v48  ;;  %v4917_v7 = vunpack.i.h.bf16 %v4915_v40  ;;  %v4916_v10 = vunpack.i.l.bf16 %v4915_v40  ;;  %v4857_v29 = vunpack.i.h.bf16 %v6585_v24  ;;  %v5333_v24 = vld [vmem:[#allocation2 + $0x108] sm:$0xff] }
  0xf7   : > { %v1021_v62 = vsel %vm230_vm0, %v6408_v27, %v4851_v42  ;;  %v1022_v34 = vsel %vm230_vm0, %v6415_v0, %v4852_v53  ;;  %v4862_v6 = vunpack.i.h.bf16 %v6589_v17  ;;  %v4861_v48 = vunpack.i.l.bf16 %v6589_v17  ;;  %v5334_v42 = vld [vmem:[#allocation2 + $0x110] sm:$0xff] }
  0xf8   : > { %v1037_v46 = vsel %vm230_vm0, %v9036_v12, %v4916_v10  ;;  %v4921_v53 = vunpack.i.l.bf16 %v4920_v20  ;;  %v990_v40 = vsel %vm230_vm0, %v5334_v42, %v4857_v29  ;;  %v4867_v17 = vunpack.i.h.bf16 %v6591_v21  ;;  %v4925_v12 = vpop.permute.xlu1 %4924 }
  0xf9   : > { %1574 = vmatmul.mubr.bf16.gmra.mxu0 %v6661_v14  ;;  %v4872_v29 = vunpack.i.h.bf16 %v6596_v37 }
  0xfa   : > { %1581 = vmatprep.mubr.bf16.mxu0 %v1109_v8  ;;  %v4922_v8 = vunpack.i.h.bf16 %v4920_v20 }
  0xfb   : > { %1671 = vmatmul.mubr.bf16.gmra.mxu1 %v1074_v52  ;;  %v5332_v52 = vld [vmem:[#allocation2 + $0xf8] sm:$0xff]  ;;  %v1026_v20 = vsel %vm230_vm0, %v6451_v49, %v4872_v29 }
  0xfc   : > { %1678 = vmatprep.mubr.bf16.mxu1 %v6570_v60  ;;  %v987_v60 = vsel %vm230_vm0, %v5331_v57, %v4846_v54  ;;  %v988_v55 = vsel %vm230_vm0, %v5332_v52, %v4847_v44  ;;  %v1038_v44 = vsel %vm230_vm0, %v9037_v15, %v4917_v7  ;;  %v1113_v54 = vpack.c.bf16 %v1022_v34, %v1021_v62 }
  0xfd   : > { %v6679_v36 = vpack.c.bf16 %v988_v55, %v987_v60  ;;  %v1082_v5 = vpack.c.bf16 %v1038_v44, %v1037_v46  ;;  %v1024_v7 = vsel %vm230_vm0, %v6429_v2, %v4862_v6  ;;  %v4866_v57 = vunpack.i.l.bf16 %v6591_v21  ;;  %v9038_v60 = vld [vmem:[#allocation46_spill] sm:$0xff]  ;;  %v9039_v55 = vld [vmem:[#allocation47_spill] sm:$0xff]  ;;  %v5335_v21 = vld [vmem:[#allocation2 + $0x120] sm:$0xff] }
  0xfe   : > { %v1039_v52 = vsel %vm230_vm0, %v9038_v60, %v4921_v53  ;;  %v1040_v62 = vsel %vm230_vm0, %v9039_v55, %v4922_v8  ;;  %v4927_v15 = vunpack.i.h.bf16 %v4925_v12  ;;  %v4926_v44 = vunpack.i.l.bf16 %v4925_v12  ;;  %v9040_v53 = vld [vmem:[#allocation48_spill] sm:$0xff] }
  0xff   : > { %v1086_v46 = vpack.c.bf16 %v1040_v62, %v1039_v52  ;;  %v4876_v8 = vunpack.i.l.bf16 %v6602_v32  ;;  %v5338_v55 = vld [vmem:[#allocation2 + $0x140] sm:$0xff]  ;;  %v4886_v12 = vunpack.i.l.bf16 %v6612_v4 }
 0x101   : > { %1582 = vmatmul.mubr.bf16.gmra.mxu0 %v6679_v36 }
 0x102   : > { %1589 = vmatprep.mubr.bf16.mxu0 %v1113_v54  ;;  %v5336_v54 = vld [vmem:[#allocation2 + $0x128] sm:$0xff] }
 0x103   : > { %1679 = vmatmul.mubr.bf16.gmra.mxu1 %v1078_v22  ;;  %v1023_v22 = vsel %vm230_vm0, %v6422_v51, %v4861_v48  ;;  %v992_v6 = vsel %vm230_vm0, %v5336_v54, %v4867_v17  ;;  %v4930_v17 = vpop.permute.xlu0 %4929  ;;  %v4892_v54 = vunpack.i.h.bf16 %v6617_v9 }
 0x104   : > { %1686 = vmatprep.mubr.bf16.mxu1 %v6587_v26  ;;  %v989_v26 = vsel %vm230_vm0, %v5333_v24, %v4856_v28  ;;  %v1117_v34 = vpack.c.bf16 %v1024_v7, %v1023_v22  ;;  %v4871_v28 = vunpack.i.l.bf16 %v6596_v37  ;;  %v4877_v37 = vunpack.i.h.bf16 %v6602_v32  ;;  %v5337_v32 = vld [vmem:[#allocation2 + $0x138] sm:$0xff] }
 0x105   : > { %v6697_v10 = vpack.c.bf16 %v990_v40, %v989_v26  ;;  %v1041_v24 = vsel %vm230_vm0, %v9040_v53, %v4926_v44  ;;  %v9041_v26 = vld [vmem:[#allocation49_spill] sm:$0xff]  ;;  %v4882_v22 = vunpack.i.h.bf16 %v6610_v30  ;;  %v4881_v7 = vunpack.i.l.bf16 %v6610_v30  ;;  %v9043_v44 = vld [vmem:[#allocation51_spill] sm:$0xff] }
 0x106   : > { %v1025_v48 = vsel %vm230_vm0, %v6444_v18, %v4871_v28  ;;  %v1042_v42 = vsel %vm230_vm0, %v9041_v26, %v4927_v15  ;;  %v4932_v60 = vunpack.i.h.bf16 %v4930_v17  ;;  %v4931_v52 = vunpack.i.l.bf16 %v4930_v17  ;;  %v5340_v53 = vld [vmem:[#allocation2 + $0x158] sm:$0xff] }
 0x107   : > { %v1121_v40 = vpack.c.bf16 %v1026_v20, %v1025_v48  ;;  %v994_v62 = vsel %vm230_vm0, %v5338_v55, %v4877_v37  ;;  %v1028_v29 = vsel %vm230_vm0, %v6466_v16, %v4882_v22  ;;  %v4887_v30 = vunpack.i.h.bf16 %v6612_v4  ;;  %v4935_v48 = vpop.permute.xlu1 %4934  ;;  %v5339_v4 = vld [vmem:[#allocation2 + $0x150] sm:$0xff] }
 0x108   : > { %v4937_v37 = vunpack.i.h.bf16 %v4935_v48  ;;  %v4896_v22 = vunpack.i.l.bf16 %v6623_v61 }
 0x109   : > { %1590 = vmatmul.mubr.bf16.gmra.mxu0 %v6697_v10 }
 0x10a   : > { %1597 = vmatprep.mubr.bf16.mxu0 %v1117_v34  ;;  %v1027_v34 = vsel %vm230_vm0, %v6461_v35, %v4881_v7  ;;  %v9044_v7 = vld [vmem:[#allocation52_spill] sm:$0xff] }
 0x10b   : > { %1687 = vmatmul.mubr.bf16.gmra.mxu1 %v1082_v5 }
 0x10c   : > { %1694 = vmatprep.mubr.bf16.mxu1 %v6604_v41  ;;  %v991_v41 = vsel %vm230_vm0, %v5335_v21, %v4866_v57  ;;  %v1090_v57 = vpack.c.bf16 %v1042_v42, %v1041_v24  ;;  %v1044_v21 = vsel %vm230_vm0, %v9043_v44, %v4932_v60  ;;  %v996_v24 = vsel %vm230_vm0, %v5340_v53, %v4887_v30 }
 0x10d   : > { %v6715_v5 = vpack.c.bf16 %v992_v6, %v991_v41  ;;  %v1125_v41 = vpack.c.bf16 %v1028_v29, %v1027_v34  ;;  %v4891_v6 = vunpack.i.l.bf16 %v6617_v9  ;;  %v1030_v42 = vsel %vm230_vm0, %v6497_v50, %v4892_v54  ;;  %v5341_v34 = vld [vmem:[#allocation2 + $0x168] sm:$0xff] }
 0x10e   : > { %v4897_v9 = vunpack.i.h.bf16 %v6623_v61  ;;  %v997_v29 = vsel %vm230_vm0, %v5341_v34, %v4896_v22  ;;  %v5342_v61 = vld [vmem:[#allocation2 + $0x170] sm:$0xff] }
 0x10f   : > { %v1029_v26 = vsel %vm230_vm0, %v6494_v3, %v4891_v6 }
 0x111   : > { %1598 = vmatmul.mubr.bf16.gmra.mxu0 %v6715_v5 }
 0x112   : > { %1605 = vmatprep.mubr.bf16.mxu0 %v1121_v40 }
 0x113   : > { %1695 = vmatmul.mubr.bf16.gmra.mxu1 %v1086_v46  ;;  %v9042_v46 = vld [vmem:[#allocation50_spill] sm:$0xff] }
 0x114   : > { %1702 = vmatprep.mubr.bf16.mxu1 %v6627_v13  ;;  %v993_v13 = vsel %vm230_vm0, %v5337_v32, %v4876_v8  ;;  %v1043_v15 = vsel %vm230_vm0, %v9042_v46, %v4931_v52  ;;  %v4936_v8 = vunpack.i.l.bf16 %v4935_v48  ;;  %v1129_v52 = vpack.c.bf16 %v1030_v42, %v1029_v26  ;;  %v4940_v32 = vpop.permute.xlu0 %4939  ;;  %v9051_v26 = vld [vmem:[#allocation60_spill] sm:$0xff] }
 0x115   : > { %v6733_v28 = vpack.c.bf16 %v994_v62, %v993_v13  ;;  %v1094_v20 = vpack.c.bf16 %v1044_v21, %v1043_v15  ;;  %v4942_v55 = vunpack.i.h.bf16 %v4940_v32  ;;  %v4941_v62 = vunpack.i.l.bf16 %v4940_v32  ;;  %v9047_v15 = vld [vmem:[#allocation55_spill] sm:$0xff] }
 0x116   : > { %v1045_v17 = vsel %vm230_vm0, %v9044_v7, %v4936_v8  ;;  %v1071_v21 = vpack.c.bf16 %v6262_v23, %v6255_v33  ;;  %v9049_v8 = vld [vmem:[#allocation58_spill] sm:$0xff]  ;;  %v1080_v23 = vpack.c.bf16 %v6296_v47, %v6289_v43  ;;  %v1088_v47 = vpack.c.bf16 %v6330_v19, %v6323_v45  ;;  %v9055_v19 = vld [vmem:[#allocation73_spill] sm:$0xff] }
 0x117   : > { %v1048_v44 = vsel %vm230_vm0, %v9047_v15, %v4942_v55 }
 0x119   : > { %1606 = vmatmul.mubr.bf16.gmra.mxu0 %v6733_v28 }
 0x11a   : > { %1613 = vmatprep.mubr.bf16.mxu0 %v1125_v41  ;;  %v4945_v41 = vpop.permute.xlu1 %4944 }
 0x11b   : > { %1703 = vmatmul.mubr.bf16.gmra.mxu1 %v1090_v57  ;;  %v9045_v57 = vld [vmem:[#allocation53_spill] sm:$0xff]  ;;  %v4947_v6 = vunpack.i.h.bf16 %v4945_v41  ;;  %v4946_v48 = vunpack.i.l.bf16 %v4945_v41 }
 0x11c   : > { %1710 = vmatprep.mubr.bf16.mxu1 %v6643_v59  ;;  %v995_v59 = vsel %vm230_vm0, %v5339_v4, %v4886_v12  ;;  %v1046_v60 = vsel %vm230_vm0, %v9045_v57, %v4937_v37  ;;  %v9046_v12 = vld [vmem:[#allocation54_spill] sm:$0xff]  ;;  %v4950_v4 = vpop.permute.xlu0 %4949  ;;  %v9059_v41 = vld [vmem:[#allocation65_spill] sm:$0xff] }
 0x11d   : > { %v6751_v40 = vpack.c.bf16 %v996_v24, %v995_v59  ;;  %v1098_v13 = vpack.c.bf16 %v1046_v60, %v1045_v17  ;;  %v1047_v46 = vsel %vm230_vm0, %v9046_v12, %v4941_v62  ;;  %v1050_v33 = vsel %vm230_vm0, %v9049_v8, %v4947_v6  ;;  %v9054_v57 = vld [vmem:[#allocation62_spill] sm:$0xff] }
 0x11e   : > { %v1102_v54 = vpack.c.bf16 %v1048_v44, %v1047_v46  ;;  %v4952_v53 = vunpack.i.h.bf16 %v4950_v4  ;;  %v4951_v24 = vunpack.i.l.bf16 %v4950_v4  ;;  %v4955_v42 = vpop.permute.xlu1 %4954  ;;  %v9056_v60 = vld [vmem:[#allocation74_spill] sm:$0xff]  ;;  %v1112_v6 = vpack.c.bf16 %v6429_v2, %v6422_v51  ;;  %v9061_v2 = vld [vmem:[#allocation68_spill] sm:$0xff] }
 0x11f   : > { %v4957_v22 = vunpack.i.h.bf16 %v4955_v42  ;;  %v4956_v7 = vunpack.i.l.bf16 %v4955_v42  ;;  %v1116_v51 = vpack.c.bf16 %v6451_v49, %v6444_v18 }
 0x120   : > { %v1052_v43 = vsel %vm230_vm0, %v9051_v26, %v4952_v53  ;;  %v4960_v32 = vpop.permute.xlu0 %4959  ;;  %v9063_v26 = vld [vmem:[#allocation67_spill] sm:$0xff] }
 0x121   : > { %1614 = vmatmul.mubr.bf16.gmra.mxu0 %v6751_v40  ;;  %v1054_v45 = vsel %vm230_vm0, %v9054_v57, %v4957_v22  ;;  %v4962_v55 = vunpack.i.h.bf16 %v4960_v32  ;;  %v4961_v62 = vunpack.i.l.bf16 %v4960_v32  ;;  %v658_v57 = vrot.slane %v9063_v26, 2 }
 0x122   : > { %1621 = vmatprep.mubr.bf16.mxu0 %v1129_v52  ;;  %v1096_v52 = vpack.c.bf16 %v9056_v60, %v9055_v19  ;;  %v4965_v12 = vpop.permute.xlu1 %4964  ;;  %v9068_v60 = vld [vmem:[#allocation71_spill] sm:$0xff] }
 0x123   : > { %1711 = vmatmul.mubr.bf16.gmra.mxu1 %v1094_v20  ;;  %v9048_v20 = vld [vmem:[#allocation57_spill] sm:$0xff]  ;;  %v4967_v44 = vunpack.i.h.bf16 %v4965_v12 }
 0x124   : > { %1718 = vmatprep.mubr.bf16.mxu1 %v6661_v14  ;;  %v998_v14 = vsel %vm230_vm0, %v5342_v61, %v4897_v9  ;;  %v1049_v37 = vsel %vm230_vm0, %v9048_v20, %v4946_v48  ;;  %v4970_v46 = vpop.permute.xlu0 %4969 }
 0x125   : > { %v6762_v30 = vpack.c.bf16 %v998_v14, %v997_v29  ;;  %v1106_v59 = vpack.c.bf16 %v1050_v33, %v1049_v37  ;;  %v9058_v29 = vld [vmem:[#allocation64_spill] sm:$0xff]  ;;  %v1104_v14 = vpack.c.bf16 %v6398_v58, %v6391_v31  ;;  %v9060_v58 = vld [vmem:[#allocation66_spill] sm:$0xff]  ;;  %v5344_v37 = vld [vmem:[#allocation2 + $0x188] sm:$0xff] }
 0x126   : > { %v1056_v61 = vsel %vm230_vm0, %v9058_v29, %v4962_v55  ;;  %v4975_v48 = vpop.permute.xlu1 %4974 }
 0x128   : > { %v4980_v33 = vpop.permute.xlu0 %4979 }
 0x129   : > { %1622 = vmatmul.mubr.bf16.gmra.mxu0 %v6762_v30  ;;  %v4982_v4 = vunpack.i.h.bf16 %v4980_v33 }
 0x12a   : > { %4623 = vmatprep.mubr.msk.bf16.mxu0 %vm230_vm0, %v1071_v21  ;;  %v4966_v21 = vunpack.i.l.bf16 %v4965_v12 }
 0x12b   : > { %1719 = vmatmul.mubr.bf16.gmra.mxu1 %v1098_v13 }
 0x12c   : > { %1726 = vmatprep.mubr.bf16.mxu1 %v6679_v36  ;;  %v1076_v36 = vpack.c.bf16 %v6282_v25, %v6275_v38  ;;  %v1084_v38 = vpack.c.bf16 %v6316_v39, %v6309_v63  ;;  %v9050_v25 = vld [vmem:[#allocation59_spill] sm:$0xff]  ;;  %v9052_v63 = vld [vmem:[#allocation72_spill] sm:$0xff]  ;;  %v1057_v31 = vsel %vm230_vm0, %v9059_v41, %v4966_v21  ;;  %v2158_v41 = vld [vmem:[#allocation2 + $0x10] sm:$0x3] }
 0x12d   : > { %v1092_v39 = vpack.c.bf16 %v9052_v63, %v6343_v1  ;;  %v1100_v1 = vpack.c.bf16 %v6381_v56, %v6374_v11  ;;  %v4972_v11 = vunpack.i.h.bf16 %v4970_v46  ;;  %v4971_v56 = vunpack.i.l.bf16 %v4970_v46 }
 0x12f   : > { %v1064_v8 = vsel %vm230_vm0, %v5344_v37, %v4972_v11 }
 0x131   : > { %4624 = vmatmul.mubr.msk.bf16.vlgmr.msra.gmra.mxu0 %vm230_vm0, %v1076_v36  ;;  %v5343_v36 = vld [vmem:[#allocation2 + $0x180] sm:$0xff] }
 0x132   : > { %4627 = vmatprep.mubr.msk.bf16.mxu0 %vm230_vm0, %v1080_v23  ;;  %v1063_v20 = vsel %vm230_vm0, %v5343_v36, %v4971_v56  ;;  %v2156_v56 = vld [vmem:[#allocation2] sm:$0xff] }
 0x133   : > { %1727 = vmatmul.mubr.bf16.gmra.mxu1 %v1102_v54  ;;  %v1058_v54 = vsel %vm230_vm0, %v9060_v58, %v4967_v44  ;;  %v1127_v23 = vpack.c.bf16 %v1064_v8, %v1063_v20 }
 0x134   : > { %1734 = vmatprep.mubr.bf16.mxu1 %v6697_v10  ;;  %v1051_v10 = vsel %vm230_vm0, %v9050_v25, %v4951_v24  ;;  %v9062_v24 = vld [vmem:[#allocation69_spill] sm:$0xff]  ;;  %v1120_v25 = vpack.c.bf16 %v6466_v16, %v6461_v35  ;;  %v1124_v35 = vpack.c.bf16 %v6497_v50, %v6494_v3 }
 0x135   : > { %v1110_v9 = vpack.c.bf16 %v1052_v43, %v1051_v10  ;;  %v4985_v10 = vpop.permute.xlu1 %4984  ;;  %v9066_v16 = vld [vmem:[#allocation77_spill] sm:$0xff] }
 0x136   : > { %v4987_v49 = vunpack.i.h.bf16 %v4985_v10 }
 0x139   : > { %4628 = vmatmul.mubr.msk.bf16.gmra.mxu0 %vm230_vm0, %v1084_v38 }
 0x13a   : > { %4631 = vmatprep.mubr.msk.bf16.mxu0 %vm230_vm0, %v1088_v47  ;;  %v9064_v47 = vld [vmem:[#allocation75_spill] sm:$0xff] }
 0x13b   : > { %1735 = vmatmul.mubr.bf16.gmra.mxu1 %v1106_v59  ;;  %v4981_v59 = vunpack.i.l.bf16 %v4980_v33  ;;  %v1066_v42 = vsel %vm230_vm0, %v9064_v47, %v4982_v4 }
 0x13c   : > { %1742 = vmatprep.mubr.bf16.mxu1 %v6715_v5  ;;  %v9053_v5 = vld [vmem:[#allocation61_spill] sm:$0xff] }
 0x13d   : > { %v1053_v17 = vsel %vm230_vm0, %v9053_v5, %v4956_v7  ;;  %v1065_v43 = vsel %vm230_vm0, %v9063_v26, %v4981_v59  ;;  %v9065_v7 = vld [vmem:[#allocation76_spill] sm:$0xff]  ;;  %v9067_v5 = vld [vmem:[#allocation78_spill] sm:$0xff] }
 0x13e   : > { %v1114_v13 = vpack.c.bf16 %v1054_v45, %v1053_v17  ;;  %v1131_v22 = vpack.c.bf16 %v1066_v42, %v1065_v43  ;;  %v661_v63 = vrot.slane %v9065_v7, 2  ;;  %v1062_v17 = vsel %vm230_vm0, %v9067_v5, %v4987_v49  ;;  %v5276_v26 = vld [vmem:[%s8742_s2 + $0x70] sm:$0xff]  }
 0x13f   : > { %v659_v45 = vrot.slane %v9064_v47, 2  ;;  %v5277_v43 = vld [vmem:[%s8742_s2 + $0x30] sm:$0xff]  }
 0x141   : > { %4632 = vmatmul.mubr.msk.bf16.gmra.mxu0 %vm230_vm0, %v1092_v39  ;;  %v660_v3 = vsel %vm492_vm4, %v658_v57, %v659_v45  ;;  %v662_v50 = vsel %vm492_vm4, %v659_v45, %v661_v63 }
 0x142   : > { %4635 = vmatprep.mubr.msk.bf16.mxu0 %vm230_vm0, %v1096_v52  ;;  %v9069_v52 = vld [vmem:[#allocation70_spill] sm:$0xff] }
 0x143   : > { %1743 = vmatmul.mubr.bf16.gmra.mxu1 %v1110_v9  ;;  %v4986_v9 = vunpack.i.l.bf16 %v4985_v10  ;;  %v9070_v32 = vpack.c.bf16 %v9068_v60, %v9069_v52 }
 0x144   : > { %1750 = vmatprep.mubr.bf16.mxu1 %v6733_v28  ;;  %v9057_v28 = vld [vmem:[#allocation63_spill] sm:$0xff] }
 0x145   : > { %v1055_v34 = vsel %vm230_vm0, %v9057_v28, %v4961_v62  ;;  %v1061_v39 = vsel %vm230_vm0, %v9066_v16, %v4986_v9 }
 0x146   : > { %v1118_v15 = vpack.c.bf16 %v1056_v61, %v1055_v34  ;;  %v1130_v19 = vpack.c.bf16 %v1062_v17, %v1061_v39 }
 0x149   : > { %4636 = vmatmul.mubr.msk.bf16.gmra.mxu0 %vm230_vm0, %v1100_v1 }
 0x14a   : > { %4639 = vmatprep.mubr.msk.bf16.mxu0 %vm230_vm0, %v1104_v14 }
 0x14b   : > { %1751 = vmatmul.mubr.bf16.gmra.mxu1 %v1114_v13  ;;  %v1132_v13 = vpack.c.bf16 %v662_v50, %v660_v3  ;;  %v5279_v3 = vld [vmem:[%s8742_s2 + $0x28] sm:$0xff]  }
 0x14c   : > { %1758 = vmatprep.mubr.bf16.mxu1 %v6751_v40  ;;  %v1108_v40 = vpack.c.bf16 %v6415_v0, %v6408_v27  ;;  %v1122_v27 = vpack.c.bf16 %v1058_v54, %v1057_v31  ;;  %v4977_v0 = vunpack.i.h.bf16 %v4975_v48  ;;  %v2258_v31 = vrot.slane %v2156_v56, 1 }
 0x14d   : > { %v2261_v54 = vrot.slane %v2158_v41, 1 }
 0x14e   : > { %v1060_v38 = vsel %vm230_vm0, %v9062_v24, %v4977_v0  ;;  %v5274_v0 = vld [vmem:[%s8742_s2 + $0x78] sm:$0xff]  }
 0x14f   : > { %4371 = vmatprep.subr.bf16.mxu1 %v5274_v0 }
 0x151   : > { %4640 = vmatmul.mubr.msk.bf16.gmra.mxu0 %vm230_vm0, %v1108_v40  ;;  %v2157_v40 = vld [vmem:[#allocation2 + $0x8] sm:$0xff] }
 0x152   : > { %4643 = vmatprep.mubr.msk.bf16.mxu0 %vm230_vm0, %v1112_v6  ;;  %v2259_v58 = vrot.slane %v2157_v40, 1 }
 0x153   : > { %1759 = vmatmul.mubr.bf16.gmra.mxu1 %v1118_v15 }
 0x154   : > { %1766 = vmatprep.mubr.bf16.mxu1 %v6762_v30  ;;  %v4976_v30 = vunpack.i.l.bf16 %v4975_v48  ;;  %v2260_v48 = vsel %vm411_vm3, %v2258_v31, %v2259_v58  ;;  %v2262_v36 = vsel %vm411_vm3, %v2259_v58, %v2261_v54 }
 0x155   : > { %v4993_v37 = vpack.i.bf16 %v2262_v36, %v2260_v48 }
 0x156   : > { %v1059_v53 = vsel %vm230_vm0, %v9061_v2, %v4976_v30  ;;  %v5275_v30 = vld [vmem:[%s8742_s2 + $0x38] sm:$0xff]  }
 0x157   : > { %v1126_v18 = vpack.c.bf16 %v1060_v38, %v1059_v53  ;;  %4994 = vrot.lane.b32.xlu1 %v4993_v37, %s5422_s14  ;;  %4372 = vmatpush3.bf16.msra.mxu1 %v5275_v30  ;;  %v5280_v37 = vld [vmem:[%s8742_s2 + $0x60] sm:$0xff]  }
 0x158   : > { %4373 = vmatprep.subr.bf16.mxu1 %v5276_v26 }
 0x159   : > { %4644 = vmatmul.mubr.msk.bf16.gmra.mxu0 %vm230_vm0, %v1116_v51 }
 0x15a   : > { %4647 = vmatprep.mubr.msk.bf16.mxu0 %vm230_vm0, %v1120_v25 }
 0x15b   : > { %1767 = vmatmul.mubr.bf16.gmra.mxu1 %v1122_v27 }
 0x15c   : > { %1774 = vmatprep.mubr.bf16.mxu1 %v1127_v23  ;;  %4374 = vmatpush3.bf16.msra.mxu1 %v5277_v43 }
 0x161   : > { %4648 = vmatmul.mubr.msk.bf16.gmra.mxu0 %vm230_vm0, %v1124_v35 }
 0x162   : > { %4651 = vmatprep.mubr.msk.bf16.mxu0 %vm230_vm0, %v9070_v32  ;;  %v5278_v32 = vld [vmem:[%s8742_s2 + $0x68] sm:$0xff]  }
 0x163   : > { %1775 = vmatmul.mubr.bf16.gmra.mxu1 %v1126_v18  ;;  %4375 = vmatprep.subr.bf16.mxu1 %v5278_v32 }
 0x164   : > { %1782 = vmatprep.mubr.bf16.mxu1 %v1131_v22  ;;  %4376 = vmatpush3.bf16.msra.mxu1 %v5279_v3 }
 0x165   : > { %4377 = vmatprep.subr.bf16.mxu1 %v5280_v37 }
 0x169   : > { %4652 = vmatmul.mubr.msk.bf16.gmra.mxu0 %vm230_vm0, %v1132_v13 }
 0x16b   : > { %1783 = vmatmul.mubr.bf16.gmra.mxu1 %v1130_v19 }
 0x171   : > { %v4143_v55 = vpop.f32.mrf.mxu0 }
 0x173   : > { %v4144_v62 = vpop.f32.mrf.mxu0 }
 0x174   : > { %v6861_v1 = vadd.f32 %v4144_v62, %v4143_v55 }
 0x175   : > { %v6863_v28 = vpop.f32.mrf.mxu0 }
 0x177   : > { %v6865_v34 = vpop.f32.mrf.mxu0 }
 0x179   : > { %v4149_v29 = vpop.f32.mrf.mxu0 }
 0x17b   : > { %v4150_v61 = vpop.f32.mrf.mxu0 }
 0x17c   : > { %v6867_v14 = vadd.f32 %v4150_v61, %v4149_v29 }
 0x17d   : > { %v6869_v12 = vpop.f32.mrf.mxu0 }
 0x17f   : > { %v6871_v46 = vpop.f32.mrf.mxu0 }
 0x181   : > { %v4155_v15 = vpop.f32.mrf.mxu0 }
 0x183   : > { %v4156_v44 = vpop.f32.mrf.mxu0 }
 0x184   : > { %v6873_v21 = vadd.f32 %v4156_v44, %v4155_v15 }
 0x185   : > { %v6875_v11 = vpop.f32.mrf.mxu0 }
 0x186   : > { %9071 = vst [vmem:[#allocation56_spill] sm:$0xff] %v6873_v21 }
 0x187   : > { %v6877_v6 = vpop.f32.mrf.mxu0 }
 0x189   : > { %v4161_v20 = vpop.f32.mrf.mxu0 }
 0x18b   : > { %v4162_v8 = vpop.f32.mrf.mxu0 }
 0x18c   : > { %v6882_v33 = vadd.f32 %v4162_v8, %v4161_v20 }
 0x18d   : > { %v6884_v27 = vpop.f32.mrf.mxu0 }
 0x18e   : > { %9072 = vst [vmem:[#allocation27_spill] sm:$0xff] %v6882_v33 }
 0x18f   : > { %v6892_v23 = vpop.f32.mrf.mxu0 }
 0x191   : > { %v4167_v4 = vpop.f32.mrf.mxu0 }
 0x193   : > { %v4168_v59 = vpop.f32.mrf.mxu0 }
 0x194   : > { %v6894_v51 = vadd.f32 %v4168_v59, %v4167_v4 }
 0x195   : > { %v6896_v2 = vpop.f32.mrf.mxu0 }
 0x196   : > { %9073 = vst [vmem:[#allocation28_spill] sm:$0xff] %v6894_v51 }
 0x197   : > { %v6898_v53 = vpop.f32.mrf.mxu0 }
 0x199   : > { %v4173_v24 = vpop.f32.mrf.mxu0 }
 0x19b   : > { %v4174_v38 = vpop.f32.mrf.mxu0 }
 0x19c   : > { %v6900_v25 = vadd.f32 %v4174_v38, %v4173_v24  ;;  %v5281_v24 = vld [vmem:[%s8742_s2 + $0x20] sm:$0xff]  }
 0x19d   : > { %v6902_v10 = vpop.f32.mrf.mxu0  ;;  %4378 = vmatpush3.bf16.msra.mxu1 %v5281_v24 }
 0x19e   : > { %9074 = vst [vmem:[#allocation29_spill] sm:$0xff] %v6900_v25 }
 0x19f   : > { %v6910_v47 = vpop.f32.mrf.mxu0 }
 0x1a1   : > { %v4179_v42 = vpop.f32.mrf.mxu0 }
 0x1a3   : > { %v4180_v18 = vpop.f32.mrf.mxu0 }
 0x1a4   : > { %v6912_v49 = vadd.f32 %v4180_v18, %v4179_v42 }
 0x1a5   : > { %v6914_v9 = vpop.f32.mrf.mxu0 }
 0x1a6   : > { %9075 = vst [vmem:[#allocation30_spill] sm:$0xff] %v6912_v49  ;;  %v1952_v49 = vlaneseq }
 0x1a7   : > { %v6916_v22 = vpop.f32.mrf.mxu0 }
 0x1a9   : > { %v4185_v7 = vpop.f32.mrf.mxu0 }
 0x1ab   : > { %v4186_v63 = vpop.f32.mrf.mxu0 }
 0x1ac   : > { %v6918_v35 = vadd.f32 %v4186_v63, %v4185_v7 }
 0x1ad   : > { %v6920_v16 = vpop.f32.mrf.mxu0 }
 0x1ae   : > { %9076 = vst [vmem:[#allocation32_spill] sm:$0xff] %v6918_v35 }
 0x1af   : > { %v6924_v5 = vpop.f32.mrf.mxu0 }
 0x1b1   : > { %v4191_v57 = vpop.f32.mrf.mxu0 }
 0x1b3   : > { %v6922_v39 = vpop.f32.mrf.mxu1  ;;  %v4192_v19 = vpop.f32.mrf.mxu0 }
 0x1b4   : > { %v6932_v52 = vadd.f32 %v4192_v19, %v4191_v57 }
 0x1b5   : > { %v6926_v17 = vpop.f32.mrf.mxu1  ;;  %v6940_v50 = vpop.f32.mrf.mxu0 }
 0x1b6   : > { %9077 = vst [vmem:[#allocation33_spill] sm:$0xff] %v6932_v52 }
 0x1b7   : > { %v6928_v45 = vpop.f32.mrf.mxu1  ;;  %v6944_v55 = vpop.f32.mrf.mxu0 }
 0x1b9   : > { %v6930_v60 = vpop.f32.mrf.mxu1  ;;  %v4197_v29 = vpop.f32.mrf.mxu0 }
 0x1bb   : > { %v6942_v13 = vpop.f32.mrf.mxu1  ;;  %v4198_v15 = vpop.f32.mrf.mxu0 }
 0x1bc   : > { %v6952_v56 = vadd.f32 %v4198_v15, %v4197_v29 }
 0x1bd   : > { %v6946_v62 = vpop.f32.mrf.mxu1  ;;  %v6954_v40 = vpop.f32.mrf.mxu0 }
 0x1be   : > { %9078 = vst [vmem:[#allocation41_spill] sm:$0xff] %v6952_v56 }
 0x1bf   : > { %v6948_v61 = vpop.f32.mrf.mxu1  ;;  %v6958_v31 = vpop.f32.mrf.mxu0 }
 0x1c1   : > { %v6950_v44 = vpop.f32.mrf.mxu1  ;;  %v4203_v54 = vpop.f32.mrf.mxu0 }
 0x1c3   : > { %v6956_v41 = vpop.f32.mrf.mxu1  ;;  %v4204_v36 = vpop.f32.mrf.mxu0 }
 0x1c4   : > { %v6969_v8 = vadd.f32 %v4204_v36, %v4203_v54  ;;  %v5282_v54 = vld [vmem:[%s8742_s2 + $0x58] sm:$0xff]  }
 0x1c5   : > { %v6960_v58 = vpop.f32.mrf.mxu1  ;;  %v6971_v0 = vpop.f32.mrf.mxu0  ;;  %4379 = vmatprep.subr.bf16.mxu1 %v5282_v54 }
 0x1c6   : > { %9079 = vst [vmem:[#allocation42_spill] sm:$0xff] %v6969_v8  ;;  %9080 = vst [vmem:[#allocation46_spill] sm:$0xff] %v6971_v0 }
 0x1c7   : > { %v6962_v48 = vpop.f32.mrf.mxu1  ;;  %v6975_v4 = vpop.f32.mrf.mxu0 }
 0x1c8   : > { %9081 = vst [vmem:[#allocation47_spill] sm:$0xff] %v6975_v4 }
 0x1c9   : > { %v6964_v20 = vpop.f32.mrf.mxu1  ;;  %v4209_v38 = vpop.f32.mrf.mxu0 }
 0x1cb   : > { %v6973_v30 = vpop.f32.mrf.mxu1  ;;  %v4210_v43 = vpop.f32.mrf.mxu0 }
 0x1cc   : > { %v6986_v18 = vadd.f32 %v4210_v43, %v4209_v38 }
 0x1cd   : > { %v6977_v59 = vpop.f32.mrf.mxu1  ;;  %v6988_v7 = vpop.f32.mrf.mxu0 }
 0x1ce   : > { %9082 = vst [vmem:[#allocation48_spill] sm:$0xff] %v6986_v18  ;;  %9083 = vst [vmem:[#allocation49_spill] sm:$0xff] %v6988_v7  ;;  %v5283_v18 = vld [vmem:[%s8742_s2 + $0x18] sm:$0xff]  }
 0x1cf   : > { %v6982_v26 = vpop.f32.mrf.mxu1  ;;  %v6992_v57 = vpop.f32.mrf.mxu0  ;;  %4380 = vmatpush3.bf16.msra.mxu1 %v5283_v18 }
 0x1d0   : > { %9084 = vst [vmem:[#allocation50_spill] sm:$0xff] %v6992_v57 }
 0x1d1   : > { %v6984_v42 = vpop.f32.mrf.mxu1  ;;  %v4215_v32 = vpop.f32.mrf.mxu0 }
 0x1d3   : > { %v6990_v63 = vpop.f32.mrf.mxu1  ;;  %v4216_v29 = vpop.f32.mrf.mxu0 }
 0x1d4   : > { %v7003_v36 = vadd.f32 %v4216_v29, %v4215_v32 }
 0x1d5   : > { %v6994_v19 = vpop.f32.mrf.mxu1  ;;  %v4218_v37 = vpop.f32.mrf.mxu0 }
 0x1d6   : > { %9085 = vst [vmem:[#allocation51_spill] sm:$0xff] %v7003_v36 }
 0x1d7   : > { %v6996_v3 = vpop.f32.mrf.mxu1  ;;  %v4219_v38 = vpop.f32.mrf.mxu0 }
 0x1d8   : > { %v7012_v8 = vadd.f32 %v4219_v38, %v4218_v37 }
 0x1d9   : > { %v6998_v15 = vpop.f32.mrf.mxu1  ;;  %v4221_v56 = vpop.f32.mrf.mxu0 }
 0x1da   : > { %9086 = vst [vmem:[#allocation52_spill] sm:$0xff] %v7012_v8  ;;  %v7028_v8 = vshrl.u32 %v1952_v49, 7  ;;  %v229_v49 = vld [vmem:[%s8743_s3] sm:$0x1f] }
 0x1db   : > { %v7005_v24 = vpop.f32.mrf.mxu1  ;;  %v4222_v35 = vpop.f32.mrf.mxu0 }
 0x1dc   : > { %v7018_v29 = vadd.f32 %v4222_v35, %v4221_v56  ;;  %9092 = vst [vmem:[#allocation59_spill] sm:$0xff] %v7028_v8  ;;  %v5284_v35 = vld [vmem:[%s8742_s2 + $0x50] sm:$0xff]  }
 0x1dd   : > { %v7007_v43 = vpop.f32.mrf.mxu1  ;;  %v4224_v36 = vpop.f32.mrf.mxu0  ;;  %4381 = vmatprep.subr.bf16.mxu1 %v5284_v35 }
 0x1de   : > { %9087 = vst [vmem:[#allocation53_spill] sm:$0xff] %v7018_v29 }
 0x1df   : > { %v7014_v52 = vpop.f32.mrf.mxu1  ;;  %v4225_v51 = vpop.f32.mrf.mxu0 }
 0x1e0   : > { %v7024_v57 = vadd.f32 %v4225_v51, %v4224_v36  ;;  %v1954_v51 = vsub.s32 0, %v7028_v8 }
 0x1e1   : > { %v7016_v32 = vpop.f32.mrf.mxu1  ;;  %v4227_v37 = vpop.f32.mrf.mxu0 }
 0x1e2   : > { %9090 = vst [vmem:[#allocation57_spill] sm:$0xff] %v7024_v57 }
 0x1e3   : > { %v7020_v54 = vpop.f32.mrf.mxu1  ;;  %v4228_v18 = vpop.f32.mrf.mxu0 }
 0x1e4   : > { %9088 = vst [vmem:[#allocation54_spill] sm:$0xff] %v7020_v54  ;;  %v7033_v56 = vadd.f32 %v4228_v18, %v4227_v37  ;;  %v5285_v37 = vld [vmem:[%s8742_s2 + $0x10] sm:$0xff]   ;;  %v4260_v54 = vadd.f32 %v6930_v60, %v6928_v45  ;;  %v4281_v60 = vadd.f32 %v6994_v19, %v6990_v63 }
 0x1e5   : > { %v7022_v25 = vpop.f32.mrf.mxu1  ;;  %v4230_v29 = vpop.f32.mrf.mxu0  ;;  %4382 = vmatpush3.bf16.msra.mxu1 %v5285_v37 }
 0x1e6   : > { %9089 = vst [vmem:[#allocation55_spill] sm:$0xff] %v7022_v25  ;;  %9093 = vst [vmem:[#allocation60_spill] sm:$0xff] %v7033_v56  ;;  %v2058_v25 = vsub.s32 4, %v7028_v8 }
 0x1e7   : > { %v7026_v38 = vpop.f32.mrf.mxu1  ;;  %v4231_v36 = vpop.f32.mrf.mxu0 }
 0x1e8   : > { %9091 = vst [vmem:[#allocation58_spill] sm:$0xff] %v7026_v38  ;;  %v1990_v38 = vsub.s32 1, %v7028_v8  ;;  %v7048_v18 = vadd.f32 %v4231_v36, %v4230_v29  ;;  %v7060_v21 = vrot.slane %v229_v49, %v2058_v25  ;;  %v4148_v29 = vadd.f32 %v6865_v34, %v6863_v28 }
 0x1e9   : > { %v4295_v7 = vpop.f32.mrf.mxu1  ;;  %v4233_v35 = vpop.f32.mrf.mxu0  ;;  %v4154_v36 = vadd.f32 %v6871_v46, %v6869_v12  ;;  %v4172_v25 = vadd.f32 %v6898_v53, %v6896_v2  ;;  %v4266_v28 = vadd.f32 %v6950_v44, %v6948_v61  ;;  %v4178_v12 = vadd.f32 %v6910_v47, %v6902_v10 }
 0x1ea   : > { %v7058_v0 = vrot.slane %v229_v49, %v1990_v38  ;;  %v4184_v46 = vadd.f32 %v6916_v22, %v6914_v9  ;;  %v1668_v47 = vadd.f32 %v4260_v54, %v4148_v29  ;;  %v4275_v9 = vadd.f32 %v6977_v59, %v6973_v30  ;;  %v9104_v54 = vld [vmem:[#allocation50_spill] sm:$0xff] }
 0x1eb   : > { %v7035_v33 = vpop.f32.mrf.mxu1  ;;  %v4234_v4 = vpop.f32.mrf.mxu0  ;;  %v4278_v22 = vadd.f32 %v6984_v42, %v6982_v26  ;;  %v7110_v61 = vadd.f32 %v6958_v31, %v6954_v40  ;;  %v4290_v44 = vadd.f32 %v7016_v32, %v7014_v52  ;;  %v5286_v52 = vld [vmem:[%s8742_s2 + $0x48] sm:$0xff]  }
 0x1ec   : > { %9094 = vst [vmem:[#allocation72_spill] sm:$0xff] %v7035_v33  ;;  %v7052_v33 = vrot.slane %v229_v49, %v1954_v51  ;;  %v4263_v51 = vadd.f32 %v6946_v62, %v6942_v13  ;;  %v7068_v37 = vadd.f32 %v4234_v4, %v4233_v35  ;;  %v1676_v62 = vadd.f32 %v4266_v28, %v4154_v36  ;;  %v9099_v4 = vld [vmem:[#allocation54_spill] sm:$0xff]  ;;  %v9103_v32 = vld [vmem:[#allocation49_spill] sm:$0xff]  ;;  %v9106_v36 = vld [vmem:[#allocation28_spill] sm:$0xff] }
 0x1ed   : > { %v7038_v57 = vpop.f32.mrf.mxu1  ;;  %v4236_v34 = vpop.f32.mrf.mxu0  ;;  %v9100_v59 = vld [vmem:[#allocation55_spill] sm:$0xff]  ;;  %v7131_v38 = vadd.f32 %v9104_v54, %v9103_v32  ;;  %v9105_v35 = vld [vmem:[#allocation29_spill] sm:$0xff]  ;;  %4383 = vmatprep.subr.bf16.mxu1 %v5286_v52 }
 0x1ee   : > { %9095 = vst [vmem:[#allocation61_spill] sm:$0xff] %v7038_v57  ;;  %v4257_v57 = vadd.f32 %v6926_v17, %v6922_v39  ;;  %v4160_v39 = vadd.f32 %v6877_v6, %v6875_v11  ;;  %v4166_v17 = vadd.f32 %v6892_v23, %v6884_v27  ;;  %v7084_v11 = vadd.f32 %v6924_v5, %v6920_v16  ;;  %v9111_v32 = vld [vmem:[#allocation33_spill] sm:$0xff] }
 0x1ef   : > { %v7050_v56 = vpop.f32.mrf.mxu1  ;;  %v4269_v6 = vadd.f32 %v6960_v58, %v6956_v41  ;;  %v7090_v27 = vadd.f32 %v6944_v55, %v6940_v50  ;;  %v4272_v23 = vadd.f32 %v6964_v20, %v6962_v48  ;;  %v4237_v2 = vpop.f32.mrf.mxu0  ;;  %v1673_v5 = vadd.f32 %v4263_v51, %v6867_v14  ;;  %v9096_v41 = vld [vmem:[#allocation56_spill] sm:$0xff]  ;;  %v9097_v48 = vld [vmem:[#allocation46_spill] sm:$0xff]  ;;  %v9098_v20 = vld [vmem:[#allocation47_spill] sm:$0xff] }
 0x1f0   : > { %v1665_v10 = vadd.f32 %v4257_v57, %v6861_v1  ;;  %v7099_v16 = vadd.f32 %v4237_v2, %v4236_v34  ;;  %v4284_v50 = vadd.f32 %v6998_v15, %v6996_v3  ;;  %v4287_v1 = vadd.f32 %v7007_v43, %v7005_v24  ;;  %v9101_v42 = vld [vmem:[#allocation58_spill] sm:$0xff]  ;;  %v9102_v15 = vld [vmem:[#allocation27_spill] sm:$0xff] }
 0x1f1   : > { %v4301_v8 = vpop.f32.mrf.mxu1  ;;  %v4625_v55 = vpop.f32.mrf.mxu0  ;;  %v1681_v58 = vadd.f32 %v4269_v6, %v9096_v41  ;;  %v7117_v30 = vadd.f32 %v9098_v20, %v9097_v48  ;;  %v4293_v26 = vadd.f32 %v9100_v59, %v9099_v4  ;;  %v4296_v63 = vadd.f32 %v4295_v7, %v9101_v42 }
 0x1f2   : > { %v1834_v14 = vadd.f32 %v4625_v55, %v1673_v5  ;;  %v7122_v3 = vadd.f32 %v4272_v23, %v4160_v39  ;;  %v1689_v24 = vadd.f32 %v4275_v9, %v9102_v15  ;;  %v1692_v43 = vadd.f32 %v4278_v22, %v4166_v17 }
 0x1f3   : > { %v4303_v45 = vpop.f32.mrf.mxu1  ;;  %v1825_v19 = vpop.f32.mrf.mxu0  ;;  %v7134_v29 = vadd.f32 %v4287_v1, %v9105_v35  ;;  %v7137_v51 = vadd.f32 %v4281_v60, %v9106_v36  ;;  %v7139_v39 = vadd.f32 %v4284_v50, %v4172_v25  ;;  %v7143_v6 = vadd.f32 %v4290_v44, %v4178_v12  ;;  %v9107_v23 = vld [vmem:[#allocation72_spill] sm:$0xff]  ;;  %v9109_v1 = vld [vmem:[#allocation30_spill] sm:$0xff]  ;;  %v5287_v50 = vld [vmem:[%s8742_s2 + $0x8] sm:$0xff]  }
 0x1f4   : > { %v1958_v40 = vmul.f32 %v7052_v33, %v1834_v14  ;;  %v1826_v31 = vadd.f32 %v1825_v19, %v1665_v10  ;;  %v4302_v9 = vadd.f32 %v4301_v8, %v7050_v56  ;;  %v7149_v60 = vadd.f32 %v4293_v26, %v9109_v1  ;;  %4384 = vmatpush3.bf16.msra.mxu1 %v5287_v50  ;;  %v5291_v1 = vld [vmem:[%s8742_s2 + $0xb8] sm:$0xff]  }
 0x1f5   : > { %v4304_v53 = vpop.f32.mrf.mxu1  ;;  %v4626_v7 = vpop.f32.mrf.mxu0  ;;  %v9108_v2 = vld [vmem:[#allocation61_spill] sm:$0xff]  ;;  %v7151_v25 = vadd.f32 %v4296_v63, %v4184_v46 }
 0x1f6   : > { %v1994_v28 = vadd.f32 %v7058_v0, %v1958_v40  ;;  %v1956_v34 = vmul.f32 %v7052_v33, %v1826_v31  ;;  %v1837_v17 = vadd.f32 %v4626_v7, %v1676_v62  ;;  %v4299_v10 = vadd.f32 %v9108_v2, %v9107_v23  ;;  %v9112_v7 = vld [vmem:[#allocation41_spill] sm:$0xff]  ;;  %v5290_v2 = vld [vmem:[%s8742_s2 + $0xf8] sm:$0xff]  }
 0x1f7   : > { %v4306_v13 = vpop.f32.mrf.mxu1  ;;  %v1828_v5 = vpop.f32.mrf.mxu0  ;;  %v4305_v44 = vadd.f32 %v4304_v53, %v4303_v45  ;;  %v9110_v45 = vld [vmem:[#allocation32_spill] sm:$0xff]  ;;  %4483 = vmatprep.subr.bf16.mxu0 %v5290_v2 }
 0x1f8   : > { %vm2026_vm5 = vcmp.gt.f32.partialorder %v1994_v28, 0.0  ;;  %v2062_v12 = vmul.f32 %v7060_v21, %v1994_v28  ;;  %v1992_v55 = vadd.f32 %v7058_v0, %v1956_v34  ;;  %v1959_v62 = vmul.f32 %v7052_v33, %v1837_v17  ;;  %4484 = vmatpush3.bf16.msra.mxu0 %v5291_v1 }
 0x1f9   : > { %v4307_v57 = vpop.f32.mrf.mxu1  ;;  %v1829_v14 = vadd.f32 %v1828_v5, %v1668_v47  ;;  %v4629_v48 = vpop.f32.mrf.mxu0  ;;  %v7164_v53 = vadd.f32 %v4299_v10, %v9110_v45  ;;  %v7167_v47 = vadd.f32 %v4302_v9, %v7084_v11  ;;  %v7174_v54 = vadd.f32 %v4305_v44, %v9111_v32 }
 0x1fa   : > { %v4308_v8 = vadd.f32 %v4307_v57, %v4306_v13  ;;  %v2094_v46 = vsel %vm2026_vm5, %v1994_v28, %v2062_v12  ;;  %vm2024_vm6 = vcmp.gt.f32.partialorder %v1992_v55, 0.0  ;;  %v2060_v20 = vmul.f32 %v7060_v21, %v1992_v55 }
 0x1fb   : > { %v4309_v49 = vpop.f32.mrf.mxu1  ;;  %v1995_v4 = vadd.f32 %v7058_v0, %v1959_v62  ;;  %2126 = vst.msk [vmem:[#allocation2 + $0x31] sm:$0xff] %vm230_vm0, %v2094_v46  ;;  %v1957_v59 = vmul.f32 %v7052_v33, %v1829_v14  ;;  %v1850_v26 = vadd.f32 %v4629_v48, %v1689_v24  ;;  %v1841_v63 = vpop.f32.mrf.mxu0  ;;  %v9113_v14 = vld [vmem:[#allocation42_spill] sm:$0xff] }
 0x1fc   : > { %v2092_v13 = vsel %vm2024_vm6, %v1992_v55, %v2060_v20  ;;  %v1842_v31 = vadd.f32 %v1841_v63, %v1681_v58  ;;  %v7180_v36 = vadd.f32 %v4308_v8, %v7090_v27  ;;  %v5289_v27 = vld [vmem:[%s8742_s2] sm:$0xff]  }
 0x1fd   : > { %v4310_v22 = vpop.f32.mrf.mxu1  ;;  %vm2027_vm7 = vcmp.gt.f32.partialorder %v1995_v4, 0.0  ;;  %v2063_v57 = vmul.f32 %v7060_v21, %v1995_v4  ;;  %2124 = vst.msk [vmem:[#allocation2 + $0x19] sm:$0xff] %vm230_vm0, %v2092_v13  ;;  %v1993_v52 = vadd.f32 %v7058_v0, %v1957_v59  ;;  %v1962_v40 = vmul.f32 %v7052_v33, %v1850_v26  ;;  %v4630_v24 = vpop.f32.mrf.mxu0 }
 0x1fe   : > { %v4311_v56 = vadd.f32 %v4310_v22, %v4309_v49  ;;  %v1853_v11 = vadd.f32 %v4630_v24, %v1692_v43  ;;  %v1960_v34 = vmul.f32 %v7052_v33, %v1842_v31  ;;  %v5288_v43 = vld [vmem:[%s8742_s2 + $0x40] sm:$0xff]  }
 0x1ff   : > { %v4312_v41 = vpop.f32.mrf.mxu1  ;;  %v2095_v49 = vsel %vm2027_vm7, %v1995_v4, %v2063_v57  ;;  %vm2025_vm8 = vcmp.gt.f32.partialorder %v1993_v52, 0.0  ;;  %v2061_v28 = vmul.f32 %v7060_v21, %v1993_v52  ;;  %v1998_v58 = vadd.f32 %v7058_v0, %v1962_v40  ;;  %v1844_v23 = vpop.f32.mrf.mxu0  ;;  %4385 = vmatprep.subr.bf16.mxu1 %v5288_v43  ;;  %v5292_v43 = vld [vmem:[%s8742_s2 + $0x118] sm:$0xff]  }
 0x200   : > { %v7177_v35 = vadd.f32 %v4311_v56, %v9112_v7  ;;  %2127 = vst.msk [vmem:[#allocation2 + $0x39] sm:$0xff] %vm230_vm0, %v2095_v49  ;;  %v1963_v10 = vmul.f32 %v7052_v33, %v1853_v11  ;;  %v1845_v22 = vadd.f32 %v1844_v23, %v7122_v3  ;;  %v1996_v55 = vadd.f32 %v7058_v0, %v1960_v34 }
 0x201   : > { %v4313_v42 = vpop.f32.mrf.mxu1  ;;  %v2093_v50 = vsel %vm2025_vm8, %v1993_v52, %v2061_v28  ;;  %vm2030_vm9 = vcmp.gt.f32.partialorder %v1998_v58, 0.0  ;;  %v2066_v12 = vmul.f32 %v7060_v21, %v1998_v58  ;;  %v4633_v44 = vpop.f32.mrf.mxu0  ;;  %4386 = vmatpush3.bf16.msra.mxu1 %v5289_v27 }
 0x202   : > { %v4314_v19 = vadd.f32 %v4313_v42, %v4312_v41  ;;  %2125 = vst.msk [vmem:[#allocation2 + $0x21] sm:$0xff] %vm230_vm0, %v2093_v50  ;;  %v1999_v3 = vadd.f32 %v7058_v0, %v1963_v10  ;;  %v1866_v8 = vadd.f32 %v4633_v44, %v7134_v29  ;;  %v7209_v56 = vld [vmem:[#allocation2 + $0x30] sm:$0xff]  ;;  %vm2028_vm10 = vcmp.gt.f32.partialorder %v1996_v55, 0.0  ;;  %4655 = vmatprep.subr.bf16.mxu1 %v5292_v43 }
 0x203   : > { %v4315_v15 = vpop.f32.mrf.mxu1  ;;  %v2098_v48 = vsel %vm2030_vm9, %v1998_v58, %v2066_v12  ;;  %v2064_v46 = vmul.f32 %v7060_v21, %v1996_v55  ;;  %v1857_v4 = vpop.f32.mrf.mxu0  ;;  %v2268_v59 = vrot.slane %v7209_v56, 1 }
 0x204   : > { %v7198_v5 = vadd.f32 %v4314_v19, %v7110_v61  ;;  %v1961_v61 = vmul.f32 %v7052_v33, %v1845_v22  ;;  %2130 = vst.msk [vmem:[#allocation2 + $0x61] sm:$0xff] %vm230_vm0, %v2098_v48  ;;  %vm2031_vm11 = vcmp.gt.f32.partialorder %v1999_v3, 0.0  ;;  %v2067_v29 = vmul.f32 %v7060_v21, %v1999_v3  ;;  %v7220_v63 = vld [vmem:[#allocation2 + $0x18] sm:$0xff] }
 0x205   : > { %v4316_v17 = vpop.f32.mrf.mxu1  ;;  %v1966_v42 = vmul.f32 %v7052_v33, %v1866_v8  ;;  %v2096_v45 = vsel %vm2028_vm10, %v1996_v55, %v2064_v46  ;;  %v1858_v57 = vadd.f32 %v1857_v4, %v7137_v51  ;;  %v4634_v52 = vpop.f32.mrf.mxu0  ;;  %v2263_v40 = vrot.slane %v7220_v63, 1 }
 0x206   : > { %v4317_v9 = vadd.f32 %v4316_v17, %v4315_v15  ;;  %v1997_v26 = vadd.f32 %v7058_v0, %v1961_v61  ;;  %2128 = vst.msk [vmem:[#allocation2 + $0x49] sm:$0xff] %vm230_vm0, %v2096_v45  ;;  %v2099_v31 = vsel %vm2031_vm11, %v1999_v3, %v2067_v29  ;;  %v1869_v51 = vadd.f32 %v4634_v52, %v7143_v6  ;;  %v5294_v29 = vld [vmem:[%s8742_s2 + $0xb0] sm:$0xff]  }
 0x207   : > { %v4318_v62 = vpop.f32.mrf.mxu1  ;;  %v2002_v24 = vadd.f32 %v7058_v0, %v1966_v42  ;;  %v7229_v32 = vld [vmem:[#allocation2 + $0x38] sm:$0xff]  ;;  %2131 = vst.msk [vmem:[#allocation2 + $0x69] sm:$0xff] %vm230_vm0, %v2099_v31  ;;  %v1964_v49 = vmul.f32 %v7052_v33, %v1858_v57  ;;  %v1860_v7 = vpop.f32.mrf.mxu0  ;;  %v7272_v4 = vld [vmem:[#allocation2 + $0x40] sm:$0x3] }
 0x208   : > { %v7212_v41 = vadd.f32 %v4317_v9, %v9113_v14  ;;  %vm2029_vm12 = vcmp.gt.f32.partialorder %v1997_v26, 0.0  ;;  %v2065_v15 = vmul.f32 %v7060_v21, %v1997_v26  ;;  %v4998_v28 = vpack.i.bf16 %v7229_v32, %v7209_v56 }
 0x209   : > { %v4319_v20 = vpop.f32.mrf.mxu1  ;;  %v2269_v58 = vrot.slane %v7229_v32, 1  ;;  %vm2034_vm13 = vcmp.gt.f32.partialorder %v2002_v24, 0.0  ;;  %v2070_v17 = vmul.f32 %v7060_v21, %v2002_v24  ;;  %v2000_v6 = vadd.f32 %v7058_v0, %v1964_v49  ;;  %v4637_v9 = vpop.f32.mrf.mxu0  ;;  %v7247_v22 = vld [vmem:[#allocation2 + $0x20] sm:$0xff]  ;;  %v7262_v14 = vld [vmem:[#allocation2 + $0x28] sm:$0x3] }
 0x20a   : > { %v7222_v13 = vadd.f32 %v4319_v20, %v4318_v62  ;;  %v2097_v34 = vsel %vm2029_vm12, %v1997_v26, %v2065_v15  ;;  %v1967_v27 = vmul.f32 %v7052_v33, %v1869_v51  ;;  %v1861_v2 = vadd.f32 %v1860_v7, %v7139_v39 }
 0x20b   : > { %v4321_v19 = vpop.f32.mrf.mxu1  ;;  %2129 = vst.msk [vmem:[#allocation2 + $0x51] sm:$0xff] %vm230_vm0, %v2097_v34  ;;  %v7252_v1 = vsel %vm411_vm3, %v2268_v59, %v2269_v58  ;;  %v2102_v50 = vsel %vm2034_vm13, %v2002_v24, %v2070_v17  ;;  %v1882_v12 = vadd.f32 %v4637_v9, %v7164_v53  ;;  %v4988_v55 = vpack.i.bf16 %v7247_v22, %v7220_v63  ;;  %v1873_v8 = vpop.f32.mrf.mxu0  ;;  %v5293_v59 = vld [vmem:[%s8742_s2 + $0xf0] sm:$0xff]   ;;  %v5295_v9 = vld [vmem:[%s8742_s2 + $0xe8] sm:$0xff]  }
 0x20c   : > { %v2264_v62 = vrot.slane %v7247_v22, 1  ;;  %2134 = vst.msk [vmem:[#allocation2 + $0x91] sm:$0xff] %vm230_vm0, %v2102_v50  ;;  %vm2032_vm14 = vcmp.gt.f32.partialorder %v2000_v6, 0.0  ;;  %v2068_v39 = vmul.f32 %v7060_v21, %v2000_v6  ;;  %v2003_v44 = vadd.f32 %v7058_v0, %v1967_v27  ;;  %4485 = vmatprep.subr.bf16.mxu0 %v5293_v59  ;;  %v5296_v50 = vld [vmem:[%s8742_s2 + $0xa8] sm:$0xff]  }
 0x20d   : > { %v4322_v11 = vpop.f32.mrf.mxu1  ;;  %v1965_v3 = vmul.f32 %v7052_v33, %v1861_v2  ;;  %v1970_v53 = vmul.f32 %v7052_v33, %v1882_v12  ;;  %v1874_v46 = vadd.f32 %v1873_v8, %v7149_v60  ;;  %4989 = vrot.lane.b32.xlu0 %v4988_v55, %s5422_s14  ;;  %v4638_v57 = vpop.f32.mrf.mxu0  ;;  %v2266_v31 = vrot.slane %v7262_v14, 1  ;;  %4486 = vmatpush3.bf16.msra.mxu0 %v5294_v29  ;;  %v7319_v8 = vld [vmem:[#allocation2 + $0x48] sm:$0xff] }
 0x20e   : > { %v7238_v23 = vadd.f32 %v4322_v11, %v4321_v19  ;;  %v7270_v20 = vsel %vm411_vm3, %v2263_v40, %v2264_v62  ;;  %v2100_v26 = vsel %vm2032_vm14, %v2000_v6, %v2068_v39  ;;  %vm2035_vm15 = vcmp.gt.f32.partialorder %v2003_v44, 0.0  ;;  %4487 = vmatprep.subr.bf16.mxu0 %v5295_v9  ;;  %v7358_v9 = vld [vmem:[#allocation2 + $0x68] sm:$0xff] }
 0x20f   : > { %v4324_v10 = vpop.f32.mrf.mxu1  ;;  %v2071_v42 = vmul.f32 %v7060_v21, %v2003_v44  ;;  %v2001_v60 = vadd.f32 %v7058_v0, %v1965_v3  ;;  %2132 = vst.msk [vmem:[#allocation2 + $0x79] sm:$0xff] %vm230_vm0, %v2100_v26  ;;  %v2006_v19 = vadd.f32 %v7058_v0, %v1970_v53  ;;  %v1968_v52 = vmul.f32 %v7052_v33, %v1874_v46  ;;  %v1876_v51 = vpop.f32.mrf.mxu0 }
 0x210   : > { %v1885_v40 = vadd.f32 %v4638_v57, %v7167_v47  ;;  %v2271_v11 = vrot.slane %v7272_v4, 1  ;;  %v7295_v43 = vsel %vm411_vm3, %v2264_v62, %v2266_v31  ;;  %v1877_v27 = vadd.f32 %v1876_v51, %v7151_v25 }
 0x211   : > { %v4325_v61 = vpop.f32.mrf.mxu1  ;;  %v2103_v15 = vsel %vm2035_vm15, %v2003_v44, %v2071_v42  ;;  %vm2033_vm1 = vcmp.gt.f32.partialorder %v2001_v60, 0.0  ;;  %v2069_v24 = vmul.f32 %v7060_v21, %v2001_v60  ;;  %vm2038_vm2 = vcmp.gt.f32.partialorder %v2006_v19, 0.0  ;;  %4999 = vrot.lane.b32.xlu0 %v4998_v28, %s5422_s14  ;;  %4488 = vmatpush3.bf16.msra.mxu0 %v5296_v50 }
 0x212   : > { %v7265_v48 = vadd.f32 %v4325_v61, %v4324_v10  ;;  %2135 = vst.msk [vmem:[#allocation2 + $0x99] sm:$0xff] %vm230_vm0, %v2103_v15  ;;  %v2074_v7 = vmul.f32 %v7060_v21, %v2006_v19  ;;  %v2004_v34 = vadd.f32 %v7058_v0, %v1968_v52  ;;  %v1971_v47 = vmul.f32 %v7052_v33, %v1885_v40  ;;  %v4641_v10 = vpop.f32.mrf.mxu0  ;;  %v7321_v53 = vld [vmem:[#allocation2 + $0x50] sm:$0xff]  ;;  %v7333_v57 = vld [vmem:[#allocation2 + $0x58] sm:$0x3]  ;;  %v5297_v15 = vld [vmem:[%s8742_s2 + $0xe0] sm:$0xff]  }
 0x213   : > { %v4327_v45 = vpop.f32.mrf.mxu1  ;;  %v2101_v17 = vsel %vm2033_vm1, %v2001_v60, %v2069_v24  ;;  %v5003_v25 = vpack.i.bf16 %v7295_v43, %v7270_v20  ;;  %v1969_v62 = vmul.f32 %v7052_v33, %v1877_v27  ;;  %v1898_v39 = vadd.f32 %v4641_v10, %v7177_v35  ;;  %4489 = vmatprep.subr.bf16.mxu0 %v5297_v15 }
 0x214   : > { %2133 = vst.msk [vmem:[#allocation2 + $0x81] sm:$0xff] %vm230_vm0, %v2101_v17  ;;  %v2106_v28 = vsel %vm2038_vm2, %v2006_v19, %v2074_v7  ;;  %vm2036_vm5 = vcmp.gt.f32.partialorder %v2004_v34, 0.0  ;;  %v2072_v12 = vmul.f32 %v7060_v21, %v2004_v34  ;;  %v2007_v55 = vadd.f32 %v7058_v0, %v1971_v47  ;;  %v1889_v61 = vpop.f32.mrf.mxu0 }
 0x215   : > { %v4328_v49 = vpop.f32.mrf.mxu1  ;;  %2138 = vst.msk [vmem:[#allocation2 + $0xc1] sm:$0xff] %vm230_vm0, %v2106_v28  ;;  %v7317_v44 = vsel %vm411_vm3, %v2269_v58, %v2271_v11  ;;  %5004 = vrot.lane.b32.xlu1 %v5003_v25, %s5422_s14  ;;  %v2005_v35 = vadd.f32 %v7058_v0, %v1969_v62  ;;  %v1974_v58 = vmul.f32 %v7052_v33, %v1898_v39  ;;  %v2273_v31 = vrot.slane %v7319_v8, 1  ;;  %v7369_v39 = vld [vmem:[#allocation2 + $0x60] sm:$0xff] }
 0x216   : > { %v7297_v6 = vadd.f32 %v4328_v49, %v4327_v45  ;;  %v2104_v46 = vsel %vm2036_vm5, %v2004_v34, %v2072_v12  ;;  %vm2039_vm6 = vcmp.gt.f32.partialorder %v2007_v55, 0.0  ;;  %v2075_v59 = vmul.f32 %v7060_v21, %v2007_v55  ;;  %v4642_v45 = vpop.f32.mrf.mxu0 }
 0x217   : > { %v4330_v2 = vpop.f32.mrf.mxu1  ;;  %v5013_v29 = vpack.i.bf16 %v7317_v44, %v7252_v1  ;;  %2136 = vst.msk [vmem:[#allocation2 + $0xa9] sm:$0xff] %vm230_vm0, %v2104_v46  ;;  %v1890_v42 = vadd.f32 %v1889_v61, %v7174_v54  ;;  %v5008_v52 = vpack.i.bf16 %v7321_v53, %v7319_v8  ;;  %v1901_v40 = vadd.f32 %v4642_v45, %v7198_v5  ;;  %v5298_v54 = vld [vmem:[%s8742_s2 + $0xa0] sm:$0xff]  }
 0x218   : > { %v2107_v19 = vsel %vm2039_vm6, %v2007_v55, %v2075_v59  ;;  %vm2037_vm7 = vcmp.gt.f32.partialorder %v2005_v35, 0.0  ;;  %v2073_v24 = vmul.f32 %v7060_v21, %v2005_v35  ;;  %v2010_v49 = vadd.f32 %v7058_v0, %v1974_v58  ;;  %v1892_v11 = vpop.f32.mrf.mxu0  ;;  %4490 = vmatpush3.bf16.msra.mxu0 %v5298_v54  ;;  %v7374_v59 = vld [vmem:[#allocation2 + $0x70] sm:$0x3]  ;;  %v5299_v58 = vld [vmem:[%s8742_s2 + $0xd8] sm:$0xff]  }
 0x219   : > { %v4331_v3 = vpop.f32.mrf.mxu1  ;;  %2139 = vst.msk [vmem:[#allocation2 + $0xc9] sm:$0xff] %vm230_vm0, %v2107_v19  ;;  %v1972_v51 = vmul.f32 %v7052_v33, %v1890_v42  ;;  %5009 = vrot.lane.b32.xlu0 %v5008_v52, %s5422_s14  ;;  %v1975_v7 = vmul.f32 %v7052_v33, %v1901_v40  ;;  %v2274_v34 = vrot.slane %v7321_v53, 1  ;;  %v2276_v47 = vrot.slane %v7333_v57, 1  ;;  %5014 = vrot.lane.b32.xlu1 %v5013_v29, %s5422_s14  ;;  %v9115_v40 = vld [vmem:[#allocation48_spill] sm:$0xff] }
 0x21a   : > { %v7330_v26 = vadd.f32 %v4331_v3, %v4330_v2  ;;  %v2105_v27 = vsel %vm2037_vm7, %v2005_v35, %v2073_v24  ;;  %vm2042_vm8 = vcmp.gt.f32.partialorder %v2010_v49, 0.0  ;;  %v2078_v2 = vmul.f32 %v7060_v21, %v2010_v49  ;;  %v4645_v28 = vpop.f32.mrf.mxu0  ;;  %4491 = vmatprep.subr.bf16.mxu0 %v5299_v58 }
 0x21b   : > { %v4333_v60 = vpop.f32.mrf.mxu1  ;;  %v2008_v10 = vadd.f32 %v7058_v0, %v1972_v51  ;;  %2137 = vst.msk [vmem:[#allocation2 + $0xb1] sm:$0xff] %vm230_vm0, %v2105_v27  ;;  %v2011_v12 = vadd.f32 %v7058_v0, %v1975_v7  ;;  %v7363_v55 = vsel %vm411_vm3, %v2273_v31, %v2274_v34  ;;  %v7366_v25 = vsel %vm411_vm3, %v2274_v34, %v2276_v47  ;;  %v7387_v19 = vld [vmem:[#allocation2 + $0x80] sm:$0xff]  ;;  %v7400_v34 = vld [vmem:[#allocation2 + $0x78] sm:$0xff] }
 0x21c   : > { %9114 = vst [vmem:[#allocation62_spill] sm:$0xff] %v7366_v25  ;;  %v1893_v62 = vadd.f32 %v1892_v11, %v7180_v36  ;;  %v2110_v3 = vsel %vm2042_vm8, %v2010_v49, %v2078_v2  ;;  %v5023_v46 = vpack.i.bf16 %v7366_v25, %v7363_v55  ;;  %v1905_v35 = vpop.f32.mrf.mxu0  ;;  %v5300_v36 = vld [vmem:[%s8742_s2 + $0x98] sm:$0xff]   ;;  %v5018_v45 = vpack.i.bf16 %v7358_v9, %v7369_v39 }
 0x21d   : > { %v4334_v5 = vpop.f32.mrf.mxu1  ;;  %vm2040_vm9 = vcmp.gt.f32.partialorder %v2008_v10, 0.0  ;;  %v2076_v61 = vmul.f32 %v7060_v21, %v2008_v10  ;;  %2142 = vst.msk [vmem:[#allocation2 + $0xf1] sm:$0xff] %vm230_vm0, %v2110_v3  ;;  %vm2043_vm10 = vcmp.gt.f32.partialorder %v2011_v12, 0.0  ;;  %v2079_v42 = vmul.f32 %v7060_v21, %v2011_v12  ;;  %4492 = vmatpush3.bf16.msra.mxu0 %v5300_v36 }
 0x21e   : > { %v7353_v17 = vadd.f32 %v4334_v5, %v4333_v60  ;;  %v1973_v60 = vmul.f32 %v7052_v33, %v1893_v62  ;;  %5024 = vrot.lane.b32.xlu1 %v5023_v46, %s5422_s14  ;;  %v1753_v31 = vadd.f32 %v7238_v23, %v9115_v40  ;;  %v2278_v15 = vrot.slane %v7369_v39, 1  ;;  %v4646_v49 = vpop.f32.mrf.mxu0  ;;  %5019 = vrot.lane.b32.xlu0 %v5018_v45, %s5422_s14 }
 0x21f   : > { %v4336_v50 = vpop.f32.mrf.mxu1  ;;  %v2108_v52 = vsel %vm2040_vm9, %v2008_v10, %v2076_v61  ;;  %v2279_v54 = vrot.slane %v7358_v9, 1  ;;  %v2111_v51 = vsel %vm2043_vm10, %v2011_v12, %v2079_v42  ;;  %v2281_v11 = vrot.slane %v7374_v59, 1  ;;  %v7409_v10 = vld [vmem:[#allocation2 + $0x88] sm:$0x3]  ;;  %v5301_v42 = vld [vmem:[%s8742_s2 + $0xd0] sm:$0xff]  }
 0x220   : > { %2140 = vst.msk [vmem:[#allocation2 + $0xd9] sm:$0xff] %vm230_vm0, %v2108_v52  ;;  %v2009_v5 = vadd.f32 %v7058_v0, %v1973_v60  ;;  %2143 = vst.msk [vmem:[#allocation2 + $0xf9] sm:$0xff] %vm230_vm0, %v2111_v51  ;;  %v1914_v23 = vadd.f32 %v4645_v28, %v1753_v31  ;;  %v1906_v27 = vadd.f32 %v1905_v35, %v7212_v41  ;;  %v1908_v62 = vpop.f32.mrf.mxu0  ;;  %v7422_v35 = vld [vmem:[#allocation2 + $0x98] sm:$0xff]  ;;  %v2286_v45 = vrot.slane %v7409_v10, 1  ;;  %v5302_v52 = vld [vmem:[%s8742_s2 + $0x90] sm:$0xff]  }
 0x221   : > { %v4337_v29 = vpop.f32.mrf.mxu1  ;;  %v7404_v47 = vsel %vm411_vm3, %v2278_v15, %v2279_v54  ;;  %v5028_v2 = vpack.i.bf16 %v7387_v19, %v7400_v34  ;;  %v7413_v3 = vsel %vm411_vm3, %v2279_v54, %v2281_v11  ;;  %v1756_v28 = vadd.f32 %v7265_v48, %v7131_v38  ;;  %4493 = vmatprep.subr.bf16.mxu0 %v5301_v42 }
 0x222   : > { %v7398_v7 = vadd.f32 %v4337_v29, %v4336_v50  ;;  %9116 = vst [vmem:[#allocation73_spill] sm:$0xff] %v7404_v47  ;;  %vm2041_vm11 = vcmp.gt.f32.partialorder %v2009_v5, 0.0  ;;  %v2077_v50 = vmul.f32 %v7060_v21, %v2009_v5  ;;  %9117 = vst [vmem:[#allocation74_spill] sm:$0xff] %v7413_v3  ;;  %v1978_v61 = vmul.f32 %v7052_v33, %v1914_v23  ;;  %v4649_v36 = vpop.f32.mrf.mxu0 }
 0x223   : > { %v4339_v24 = vpop.f32.mrf.mxu1  ;;  %v5033_v41 = vpack.i.bf16 %v7413_v3, %v7404_v47  ;;  %v1976_v46 = vmul.f32 %v7052_v33, %v1906_v27  ;;  %v2283_v29 = vrot.slane %v7400_v34, 1  ;;  %5029 = vrot.lane.b32.xlu0 %v5028_v2, %s5422_s14  ;;  %v1917_v38 = vadd.f32 %v4646_v49, %v1756_v28  ;;  %v7441_v49 = vld [vmem:[#allocation2 + $0x90] sm:$0xff]  ;;  %4494 = vmatpush3.bf16.msra.mxu0 %v5302_v52  ;;  %v5304_v28 = vld [vmem:[%s8742_s2 + $0x88] sm:$0xff]  }
 0x224   : > { %v2109_v60 = vsel %vm2041_vm11, %v2009_v5, %v2077_v50  ;;  %v2284_v48 = vrot.slane %v7387_v19, 1  ;;  %v2014_v40 = vadd.f32 %v7058_v0, %v1978_v61  ;;  %v1748_v54 = vadd.f32 %v7222_v13, %v7117_v30  ;;  %v1921_v5 = vpop.f32.mrf.mxu0  ;;  %v5303_v50 = vld [vmem:[%s8742_s2 + $0xc8] sm:$0xff]   ;;  %v7470_v3 = vld [vmem:[#allocation2 + $0xb0] sm:$0xff] }
 0x225   : > { %v4340_v12 = vpop.f32.mrf.mxu1  ;;  %2141 = vst.msk [vmem:[#allocation2 + $0xe1] sm:$0xff] %vm230_vm0, %v2109_v60  ;;  %5034 = vrot.lane.b32.xlu1 %v5033_v41, %s5422_s14  ;;  %v2012_v31 = vadd.f32 %v7058_v0, %v1976_v46  ;;  %v1979_v11 = vmul.f32 %v7052_v33, %v1917_v38  ;;  %v5038_v2 = vpack.i.bf16 %v7422_v35, %v7441_v49  ;;  %v7466_v60 = vld [vmem:[#allocation2 + $0xa0] sm:$0x3]  ;;  %v2289_v52 = vrot.slane %v7422_v35, 1 }
 0x226   : > { %v7437_v15 = vadd.f32 %v4340_v12, %v4339_v24  ;;  %v7445_v23 = vsel %vm411_vm3, %v2283_v29, %v2284_v48  ;;  %v7448_v27 = vsel %vm411_vm3, %v2284_v48, %v2286_v45  ;;  %vm2046_vm12 = vcmp.gt.f32.partialorder %v2014_v40, 0.0  ;;  %v4650_v12 = vpop.f32.mrf.mxu0  ;;  %v9120_v29 = vld [vmem:[#allocation53_spill] sm:$0xff]  ;;  %4495 = vmatprep.subr.bf16.mxu0 %v5303_v50 }
 0x227   : > { %v4342_v58 = vpop.f32.mrf.mxu1  ;;  %9118 = vst [vmem:[#allocation63_spill] sm:$0xff] %v7445_v23  ;;  %9119 = vst [vmem:[#allocation64_spill] sm:$0xff] %v7448_v27  ;;  %v2082_v24 = vmul.f32 %v7060_v21, %v2014_v40  ;;  %vm2044_vm13 = vcmp.gt.f32.partialorder %v2012_v31, 0.0  ;;  %v2080_v30 = vmul.f32 %v7060_v21, %v2012_v31  ;;  %v2015_v61 = vadd.f32 %v7058_v0, %v1979_v11 }
 0x228   : > { %v5043_v41 = vpack.i.bf16 %v7448_v27, %v7445_v23  ;;  %v1909_v46 = vadd.f32 %v1908_v62, %v1748_v54  ;;  %5039 = vrot.lane.b32.xlu0 %v5038_v2, %s5422_s14  ;;  %v1769_v42 = vadd.f32 %v7353_v17, %v9120_v29  ;;  %v2288_v45 = vrot.slane %v7441_v49, 1  ;;  %v7472_v47 = vpop.f32.mrf.mxu0  ;;  %4496 = vmatpush3.bf16.msra.mxu0 %v5304_v28 }
 0x229   : > { %v4343_v51 = vpop.f32.mrf.mxu1  ;;  %v2114_v38 = vsel %vm2046_vm12, %v2014_v40, %v2082_v24  ;;  %v2112_v48 = vsel %vm2044_vm13, %v2012_v31, %v2080_v30  ;;  %vm2047_vm14 = vcmp.gt.f32.partialorder %v2015_v61, 0.0  ;;  %v2083_v17 = vmul.f32 %v7060_v21, %v2015_v61  ;;  %v7479_v31 = vld [vmem:[#allocation2 + $0xa8] sm:$0xff]  ;;  %v9122_v30 = vld [vmem:[#allocation51_spill] sm:$0xff] }
 0x22a   : > { %2146 = vst.msk [vmem:[#allocation2 + $0x121] sm:$0xff] %vm230_vm0, %v2114_v38  ;;  %2144 = vst.msk [vmem:[#allocation2 + $0x109] sm:$0xff] %vm230_vm0, %v2112_v48  ;;  %5044 = vrot.lane.b32.xlu1 %v5043_v41, %s5422_s14  ;;  %v1977_v62 = vmul.f32 %v7052_v33, %v1909_v46  ;;  %v1930_v40 = vadd.f32 %v4649_v36, %v1769_v42  ;;  %v7482_v54 = vsel %vm411_vm3, %v2288_v45, %v2289_v52  ;;  %v7493_v46 = vld [vmem:[#allocation2 + $0xb8] sm:$0x3]  ;;  %v4653_v42 = vpop.f32.mrf.mxu0  ;;  %v9124_v48 = vld [vmem:[#allocation57_spill] sm:$0xff] }
 0x22b   : > { %v4345_v13 = vpop.f32.mrf.mxu1  ;;  %9121 = vst [vmem:[#allocation65_spill] sm:$0xff] %v7482_v54  ;;  %v2291_v2 = vrot.slane %v7466_v60, 1  ;;  %v7485_v24 = vadd.f32 %v4343_v51, %v4342_v58  ;;  %v1761_v50 = vadd.f32 %v7297_v6, %v9122_v30  ;;  %v2115_v29 = vsel %vm2047_vm14, %v2015_v61, %v2083_v17 }
 0x22c   : > { %v2013_v38 = vadd.f32 %v7058_v0, %v1977_v62  ;;  %v1982_v41 = vmul.f32 %v7052_v33, %v1930_v40  ;;  %v5048_v36 = vpack.i.bf16 %v7470_v3, %v7479_v31  ;;  %2147 = vst.msk [vmem:[#allocation2 + $0x129] sm:$0xff] %vm230_vm0, %v2115_v29  ;;  %v1772_v6 = vadd.f32 %v7398_v7, %v9124_v48 }
 0x22d   : > { %v4346_v11 = vpop.f32.mrf.mxu1  ;;  %v7497_v58 = vsel %vm411_vm3, %v2289_v52, %v2291_v2  ;;  %v1922_v51 = vadd.f32 %v1921_v5, %v1761_v50  ;;  %v2293_v28 = vrot.slane %v7479_v31, 1  ;;  %v2294_v5 = vrot.slane %v7470_v3, 1  ;;  %v7510_v2 = vld [vmem:[#allocation2 + $0xc8] sm:$0xff] }
 0x22e   : > { %9123 = vst [vmem:[#allocation66_spill] sm:$0xff] %v7497_v58  ;;  %vm2045_vm15 = vcmp.gt.f32.partialorder %v2013_v38, 0.0  ;;  %v2081_v45 = vmul.f32 %v7060_v21, %v2013_v38  ;;  %v2018_v17 = vadd.f32 %v7058_v0, %v1982_v41  ;;  %v5053_v62 = vpack.i.bf16 %v7497_v58, %v7482_v54  ;;  %5049 = vrot.lane.b32.xlu0 %v5048_v36, %s5422_s14  ;;  %v1937_v41 = vpop.f32.mrf.mxu0 }
 0x22f   : > { %v4348_v61 = vpop.f32.mrf.mxu1  ;;  %v1980_v52 = vmul.f32 %v7052_v33, %v1922_v51  ;;  %v1933_v40 = vadd.f32 %v4650_v12, %v1772_v6  ;;  %v2296_v7 = vrot.slane %v7493_v46, 1  ;;  %9125 = vst [vmem:[#allocation68_spill] sm:$0xff] %v7510_v2  ;;  %v4347_v29 = vadd.f32 %v4346_v11, %v4345_v13  ;;  %v5305_v13 = vld [vmem:[%s8742_s2 + $0xc0] sm:$0xff]  }
 0x230   : > { %v2113_v30 = vsel %vm2045_vm15, %v2013_v38, %v2081_v45  ;;  %vm2050_vm1 = vcmp.gt.f32.partialorder %v2018_v17, 0.0  ;;  %v2086_v50 = vmul.f32 %v7060_v21, %v2018_v17  ;;  %5054 = vrot.lane.b32.xlu1 %v5053_v62, %s5422_s14  ;;  %v7518_v51 = vsel %vm411_vm3, %v2293_v28, %v2294_v5  ;;  %v7523_v38 = vld [vmem:[#allocation2 + $0xc0] sm:$0xff]  ;;  %4497 = vmatprep.subr.bf16.mxu0 %v5305_v13 }
 0x231   : > { %2145 = vst.msk [vmem:[#allocation2 + $0x111] sm:$0xff] %vm230_vm0, %v2113_v30  ;;  %v2016_v36 = vadd.f32 %v7058_v0, %v1980_v52  ;;  %v1983_v12 = vmul.f32 %v7052_v33, %v1933_v40  ;;  %9126 = vst [vmem:[#allocation69_spill] sm:$0xff] %v7518_v51  ;;  %v7521_v48 = vsel %vm411_vm3, %v2294_v5, %v2296_v7  ;;  %v4349_v6 = vpop.f32.mrf.mxu1  ;;  %v9129_v62 = vld [vmem:[#allocation52_spill] sm:$0xff] }
 0x232   : > { %9127 = vst [vmem:[#allocation67_spill] sm:$0xff] %v7521_v48  ;;  %9128 = vst [vmem:[#allocation75_spill] sm:$0xff] %v7523_v38  ;;  %v2118_v11 = vsel %vm2050_vm1, %v2018_v17, %v2086_v50  ;;  %v5063_v45 = vpack.i.bf16 %v7521_v48, %v7518_v51  ;;  %v1764_v52 = vadd.f32 %v7330_v26, %v9129_v62  ;;  %v5306_v40 = vld [vmem:[%s8742_s2 + $0x80] sm:$0xff]   ;;  %v4654_v48 = vpop.f32.mrf.mxu0 }
 0x233   : > { %v5058_v28 = vpack.i.bf16 %v7510_v2, %v7523_v38  ;;  %2150 = vst.msk [vmem:[#allocation2 + $0x151] sm:$0xff] %vm230_vm0, %v2118_v11  ;;  %vm2048_vm2 = vcmp.gt.f32.partialorder %v2016_v36, 0.0  ;;  %v2084_v5 = vmul.f32 %v7060_v21, %v2016_v36  ;;  %v2019_v17 = vadd.f32 %v7058_v0, %v1983_v12  ;;  %v9130_v50 = vld [vmem:[#allocation60_spill] sm:$0xff]  ;;  %4498 = vmatpush3.bf16.msra.mxu0 %v5306_v40 }
 0x234   : > { %v1785_v7 = vadd.f32 %v4347_v29, %v7068_v37  ;;  %5064 = vrot.lane.b32.xlu1 %v5063_v45, %s5422_s14  ;;  %v1925_v26 = vadd.f32 %v7472_v47, %v1764_v52  ;;  %v4350_v30 = vadd.f32 %v4349_v6, %v4348_v61  ;;  %v1777_v62 = vadd.f32 %v7437_v15, %v9130_v50  ;;  %v7547_v51 = vld [vmem:[#allocation2 + $0xe0] sm:$0xff]  ;;  %v7554_v6 = vld [vmem:[#allocation2 + $0xd8] sm:$0xff]  ;;  %v1940_v45 = vpop.f32.mrf.mxu0 }
 0x235   : > { %5059 = vrot.lane.b32.xlu0 %v5058_v28, %s5422_s14  ;;  %v2343_v11 = vrot.slane %v7220_v63, 2  ;;  %9131 = vst [vmem:[#allocation76_spill] sm:$0xff] %v7547_v51  ;;  %v2116_v54 = vsel %vm2048_vm2, %v2016_v36, %v2084_v5  ;;  %vm2051_vm5 = vcmp.gt.f32.partialorder %v2019_v17, 0.0  ;;  %v2087_v37 = vmul.f32 %v7060_v21, %v2019_v17  ;;  %9132 = vst [vmem:[#allocation77_spill] sm:$0xff] %v7554_v6 }
 0x236   : > { %v1946_v29 = vadd.f32 %v4653_v42, %v1785_v7  ;;  %2148 = vst.msk [vmem:[#allocation2 + $0x139] sm:$0xff] %vm230_vm0, %v2116_v54  ;;  %v1981_v47 = vmul.f32 %v7052_v33, %v1925_v26  ;;  %v1938_v12 = vadd.f32 %v1937_v41, %v1777_v62  ;;  %v2344_v61 = vrot.slane %v7247_v22, 2  ;;  %v7577_v7 = vld [vmem:[#allocation2 + $0xd0] sm:$0x3] }
 0x237   : > { %v2346_v15 = vrot.slane %v7262_v14, 2  ;;  %v2119_v63 = vsel %vm2051_vm5, %v2019_v17, %v2087_v37  ;;  %v5073_v36 = vpack.i.bf16 %v7547_v51, %v7554_v6  ;;  %v1788_v42 = vadd.f32 %v4350_v30, %v7099_v16 }
 0x238   : > { %v1986_v13 = vmul.f32 %v7052_v33, %v1946_v29  ;;  %2151 = vst.msk [vmem:[#allocation2 + $0x159] sm:$0xff] %vm230_vm0, %v2119_v63  ;;  %v2017_v54 = vadd.f32 %v7058_v0, %v1981_v47  ;;  %v1984_v41 = vmul.f32 %v7052_v33, %v1938_v12  ;;  %v7564_v22 = vsel %vm492_vm4, %v2343_v11, %v2344_v61 }
 0x239   : > { %v7567_v14 = vsel %vm492_vm4, %v2344_v61, %v2346_v15  ;;  %5074 = vrot.lane.b32.xlu1 %v5073_v36, %s5422_s14  ;;  %v1949_v16 = vadd.f32 %v4654_v48, %v1788_v42  ;;  %v1780_v40 = vadd.f32 %v7485_v24, %v7048_v18  ;;  %v2298_v26 = vrot.slane %v7523_v38, 1  ;;  %v7601_v42 = vld [vmem:[#allocation2 + $0xe8] sm:$0x3] }
 0x23a   : > { %v2022_v52 = vadd.f32 %v7058_v0, %v1986_v13  ;;  %v5068_v28 = vpack.i.bf16 %v7567_v14, %v7564_v22  ;;  %vm2049_vm6 = vcmp.gt.f32.partialorder %v2017_v54, 0.0  ;;  %v2085_v5 = vmul.f32 %v7060_v21, %v2017_v54 }
 0x23b   : > { %v2020_v17 = vadd.f32 %v7058_v0, %v1984_v41  ;;  %v1987_v50 = vmul.f32 %v7052_v33, %v1949_v16  ;;  %v1941_v48 = vadd.f32 %v1940_v45, %v1780_v40  ;;  %v2299_v24 = vrot.slane %v7510_v2, 1 }
 0x23c   : > { %vm2054_vm7 = vcmp.gt.f32.partialorder %v2022_v52, 0.0  ;;  %v2090_v30 = vmul.f32 %v7060_v21, %v2022_v52  ;;  %5069 = vrot.lane.b32.xlu0 %v5068_v28, %s5422_s14  ;;  %v2117_v62 = vsel %vm2049_vm6, %v2017_v54, %v2085_v5  ;;  %v2301_v47 = vrot.slane %v7577_v7, 1 }
 0x23d   : > { %vm2052_vm8 = vcmp.gt.f32.partialorder %v2020_v17, 0.0  ;;  %v2088_v18 = vmul.f32 %v7060_v21, %v2020_v17  ;;  %2149 = vst.msk [vmem:[#allocation2 + $0x141] sm:$0xff] %vm230_vm0, %v2117_v62  ;;  %v2023_v37 = vadd.f32 %v7058_v0, %v1987_v50  ;;  %v1985_v29 = vmul.f32 %v7052_v33, %v1941_v48  ;;  %v7627_v50 = vld [vmem:[#allocation2 + $0x100] sm:$0x3] }
 0x23e   : > { %v2122_v11 = vsel %vm2054_vm7, %v2022_v52, %v2090_v30  ;;  %v7591_v61 = vsel %vm411_vm3, %v2298_v26, %v2299_v24  ;;  %v2348_v15 = vrot.slane %v7209_v56, 2  ;;  %v2349_v63 = vrot.slane %v7229_v32, 2  ;;  %v7610_v52 = vld [vmem:[#allocation2 + $0xf8] sm:$0xff] }
 0x23f   : > { %2154 = vst.msk [vmem:[#allocation2 + $0x181] sm:$0xff] %vm230_vm0, %v2122_v11  ;;  %v2120_v12 = vsel %vm2052_vm8, %v2020_v17, %v2088_v18  ;;  %9133 = vst [vmem:[#allocation78_spill] sm:$0xff] %v7591_v61  ;;  %vm2055_vm9 = vcmp.gt.f32.partialorder %v2023_v37, 0.0  ;;  %v2091_v13 = vmul.f32 %v7060_v21, %v2023_v37  ;;  %v2021_v36 = vadd.f32 %v7058_v0, %v1985_v29  ;;  %v7623_v17 = vld [vmem:[#allocation2 + $0xf0] sm:$0xff] }
 0x240   : > { %2152 = vst.msk [vmem:[#allocation2 + $0x169] sm:$0xff] %vm230_vm0, %v2120_v12  ;;  %v7599_v33 = vsel %vm411_vm3, %v2299_v24, %v2301_v47  ;;  %v7606_v41 = vsel %vm492_vm4, %v2348_v15, %v2349_v63  ;;  %v2351_v56 = vrot.slane %v7272_v4, 2  ;;  %9135 = vst [vmem:[#allocation70_spill] sm:$0xff] %v7610_v52  ;;  %v2303_v0 = vrot.slane %v7554_v6, 1  ;;  %v7653_v47 = vld [vmem:[#allocation2 + $0x110] sm:$0xff] }
 0x241   : > { %9134 = vst [vmem:[#allocation71_spill] sm:$0xff] %v7599_v33  ;;  %v5078_v54 = vpack.i.bf16 %v7599_v33, %v7591_v61  ;;  %v2123_v32 = vsel %vm2055_vm9, %v2023_v37, %v2091_v13  ;;  %vm2053_vm10 = vcmp.gt.f32.partialorder %v2021_v36, 0.0  ;;  %v2089_v45 = vmul.f32 %v7060_v21, %v2021_v36 }
 0x242   : > { %2155 = vst.msk [vmem:[#allocation2 + $0x189] sm:$0xff] %vm230_vm0, %v2123_v32  ;;  %v7616_v28 = vsel %vm492_vm4, %v2349_v63, %v2351_v56  ;;  %v2304_v16 = vrot.slane %v7547_v51, 1  ;;  %v2306_v40 = vrot.slane %v7601_v42, 1  ;;  %v2353_v4 = vrot.slane %v7319_v8, 2 }
 0x243   : > { %5079 = vrot.lane.b32.xlu0 %v5078_v54, %s5422_s14  ;;  %v2121_v5 = vsel %vm2053_vm10, %v2021_v36, %v2089_v45  ;;  %v5083_v21 = vpack.i.bf16 %v7616_v28, %v7606_v41  ;;  %v2354_v26 = vrot.slane %v7321_v53, 2  ;;  %v2356_v30 = vrot.slane %v7333_v57, 2  ;;  %v7664_v36 = vld [vmem:[#allocation2 + $0x118] sm:$0x3]  ;;  %v7667_v54 = vld [vmem:[#allocation2 + $0x108] sm:$0xff] }
 0x244   : > { %2153 = vst.msk [vmem:[#allocation2 + $0x171] sm:$0xff] %vm230_vm0, %v2121_v5  ;;  %v5088_v48 = vpack.i.bf16 %v7610_v52, %v7623_v17  ;;  %v7633_v62 = vsel %vm411_vm3, %v2303_v0, %v2304_v16  ;;  %v7636_v8 = vsel %vm411_vm3, %v2304_v16, %v2306_v40  ;;  %v2309_v57 = vrot.slane %v7610_v52, 1  ;;  %v7681_v16 = vld [vmem:[#allocation2 + $0x128] sm:$0xff]  ;;  %v7687_v5 = vld [vmem:[#allocation2 + $0x130] sm:$0x3] }
 0x245   : > { %9136 = vst [vmem:[#allocation56_spill] sm:$0xff] %v7633_v62  ;;  %9137 = vst [vmem:[#allocation46_spill] sm:$0xff] %v7636_v8  ;;  %5084 = vrot.lane.b32.xlu1 %v5083_v21, %s5422_s14  ;;  %v7640_v18 = vsel %vm492_vm4, %v2353_v4, %v2354_v26  ;;  %v7643_v53 = vsel %vm492_vm4, %v2354_v26, %v2356_v30  ;;  %v2311_v24 = vrot.slane %v7627_v50, 1  ;;  %v2308_v37 = vrot.slane %v7623_v17, 1  ;;  %v7690_v21 = vld [vmem:[#allocation2 + $0x120] sm:$0xff] }
 0x246   : > { %v5093_v11 = vpack.i.bf16 %v7636_v8, %v7633_v62  ;;  %v5098_v29 = vpack.i.bf16 %v7643_v53, %v7640_v18  ;;  %v2359_v12 = vrot.slane %v7358_v9, 2  ;;  %v2361_v15 = vrot.slane %v7374_v59, 2  ;;  %9140 = vst [vmem:[#allocation55_spill] sm:$0xff] %v7690_v21  ;;  %v7818_v58 = vld [vmem:[#allocation2 + $0x180] sm:$0xff] }
 0x247   : > { %5089 = vrot.lane.b32.xlu0 %v5088_v48, %s5422_s14  ;;  %v7659_v63 = vsel %vm411_vm3, %v2308_v37, %v2309_v57  ;;  %v7662_v13 = vsel %vm411_vm3, %v2309_v57, %v2311_v24  ;;  %v2358_v56 = vrot.slane %v7369_v39, 2  ;;  %v5103_v9 = vpack.i.bf16 %v7653_v47, %v7667_v54  ;;  %9155 = vst [vmem:[#allocation53_spill] sm:$0xff] %v7818_v58 }
 0x248   : > { %9138 = vst [vmem:[#allocation47_spill] sm:$0xff] %v7659_v63  ;;  %9139 = vst [vmem:[#allocation54_spill] sm:$0xff] %v7662_v13  ;;  %v2314_v59 = vrot.slane %v7653_v47, 1  ;;  %v5108_v32 = vpack.i.bf16 %v7662_v13, %v7659_v63  ;;  %v7679_v0 = vsel %vm492_vm4, %v2359_v12, %v2361_v15  ;;  %v2316_v40 = vrot.slane %v7664_v36, 1 }
 0x249   : > { %5094 = vrot.lane.b32.xlu1 %v5093_v11, %s5422_s14  ;;  %v7676_v45 = vsel %vm492_vm4, %v2358_v56, %v2359_v12  ;;  %v2364_v39 = vrot.slane %v7387_v19, 2  ;;  %v2366_v4 = vrot.slane %v7409_v10, 2  ;;  %v2313_v26 = vrot.slane %v7667_v54, 1  ;;  %v7802_v61 = vld [vmem:[#allocation2 + $0x188] sm:$0xff] }
 0x24a   : > { %v5113_v30 = vpack.i.bf16 %v7679_v0, %v7676_v45  ;;  %v5118_v48 = vpack.i.bf16 %v7681_v16, %v7690_v21  ;;  %v2363_v57 = vrot.slane %v7400_v34, 2  ;;  %v7702_v10 = vsel %vm411_vm3, %v2314_v59, %v2316_v40  ;;  %9154 = vst [vmem:[#allocation48_spill] sm:$0xff] %v7802_v61 }
 0x24b   : > { %5099 = vrot.lane.b32.xlu0 %v5098_v29, %s5422_s14  ;;  %v7699_v19 = vsel %vm411_vm3, %v2313_v26, %v2314_v59  ;;  %9142 = vst [vmem:[#allocation27_spill] sm:$0xff] %v7702_v10  ;;  %v2319_v24 = vrot.slane %v7681_v16, 1  ;;  %v2321_v11 = vrot.slane %v7687_v5, 1  ;;  %v7711_v29 = vsel %vm492_vm4, %v2364_v39, %v2366_v4  ;;  %v7720_v59 = vld [vmem:[#allocation2 + $0x140] sm:$0xff]  ;;  %v7729_v4 = vld [vmem:[#allocation2 + $0x148] sm:$0x3] }
 0x24c   : > { %9141 = vst [vmem:[#allocation58_spill] sm:$0xff] %v7699_v19  ;;  %v7708_v37 = vsel %vm492_vm4, %v2363_v57, %v2364_v39  ;;  %v2318_v12 = vrot.slane %v7690_v21, 1  ;;  %v5123_v15 = vpack.i.bf16 %v7702_v10, %v7699_v19  ;;  %v2369_v56 = vrot.slane %v7422_v35, 2  ;;  %9143 = vst [vmem:[#allocation49_spill] sm:$0xff] %v7720_v59  ;;  %v7733_v26 = vld [vmem:[#allocation2 + $0x138] sm:$0xff]  ;;  %v7757_v10 = vld [vmem:[#allocation2 + $0x150] sm:$0xff] }
 0x24d   : > { %5104 = vrot.lane.b32.xlu1 %v5103_v9, %s5422_s14  ;;  %v5128_v9 = vpack.i.bf16 %v7711_v29, %v7708_v37  ;;  %v7726_v40 = vsel %vm411_vm3, %v2319_v24, %v2321_v11  ;;  %v2371_v39 = vrot.slane %v7466_v60, 2  ;;  %9146 = vst [vmem:[#allocation28_spill] sm:$0xff] %v7733_v26  ;;  %v2326_v60 = vrot.slane %v7729_v4, 1  ;;  %v7795_v8 = vld [vmem:[#allocation2 + $0x178] sm:$0x3] }
 0x24e   : > { %9145 = vst [vmem:[#allocation29_spill] sm:$0xff] %v7726_v40  ;;  %v2376_v19 = vrot.slane %v7493_v46, 2  ;;  %v2384_v23 = vrot.slane %v7547_v51, 2  ;;  %v2386_v27 = vrot.slane %v7601_v42, 2  ;;  %v2490_v42 = vrot.slane %v7818_v58, 2 }
 0x24f   : > { %5109 = vrot.lane.b32.xlu0 %v5108_v32, %s5422_s14  ;;  %v7723_v32 = vsel %vm411_vm3, %v2318_v12, %v2319_v24  ;;  %v2324_v24 = vrot.slane %v7720_v59, 1  ;;  %v7746_v12 = vsel %vm492_vm4, %v2369_v56, %v2371_v39  ;;  %v2394_v25 = vrot.slane %v7653_v47, 2 }
 0x250   : > { %9144 = vst [vmem:[#allocation50_spill] sm:$0xff] %v7723_v32  ;;  %v5138_v57 = vpack.i.bf16 %v7726_v40, %v7723_v32  ;;  %v2323_v32 = vrot.slane %v7733_v26, 1  ;;  %v7754_v40 = vld [vmem:[#allocation2 + $0x160] sm:$0x3] }
 0x251   : > { %5114 = vrot.lane.b32.xlu1 %v5113_v30, %s5422_s14  ;;  %v2368_v30 = vrot.slane %v7441_v49, 2  ;;  %v2331_v62 = vrot.slane %v7754_v40, 1 }
 0x252   : > { %v7765_v46 = vsel %vm411_vm3, %v2323_v32, %v2324_v24  ;;  %v2328_v32 = vrot.slane %v7757_v10, 1 }
 0x253   : > { %5119 = vrot.lane.b32.xlu0 %v5118_v48, %s5422_s14  ;;  %v5133_v48 = vpack.i.bf16 %v7720_v59, %v7733_v26  ;;  %v7743_v11 = vsel %vm492_vm4, %v2368_v30, %v2369_v56  ;;  %v2373_v30 = vrot.slane %v7479_v31, 2  ;;  %9148 = vst [vmem:[#allocation61_spill] sm:$0xff] %v7765_v46 }
 0x254   : > { %v5143_v56 = vpack.i.bf16 %v7746_v12, %v7743_v11 }
 0x255   : > { %5124 = vrot.lane.b32.xlu1 %v5123_v15, %s5422_s14  ;;  %v7748_v15 = vld [vmem:[#allocation2 + $0x158] sm:$0xff] }
 0x256   : > { %9147 = vst [vmem:[#allocation72_spill] sm:$0xff] %v7748_v15  ;;  %v5148_v39 = vpack.i.bf16 %v7748_v15, %v7757_v10  ;;  %v2329_v13 = vrot.slane %v7748_v15, 1 }
 0x257   : > { %5129 = vrot.lane.b32.xlu0 %v5128_v9, %s5422_s14  ;;  %v2374_v9 = vrot.slane %v7470_v3, 2 }
 0x259   : > { %5134 = vrot.lane.b32.xlu1 %v5133_v48, %s5422_s14  ;;  %v7768_v48 = vsel %vm411_vm3, %v2324_v24, %v2326_v60  ;;  %v7771_v63 = vsel %vm492_vm4, %v2373_v30, %v2374_v9  ;;  %v7785_v30 = vld [vmem:[#allocation2 + $0x170] sm:$0xff] }
 0x25a   : > { %9149 = vst [vmem:[#allocation30_spill] sm:$0xff] %v7768_v48  ;;  %v5153_v24 = vpack.i.bf16 %v7768_v48, %v7765_v46  ;;  %9150 = vst [vmem:[#allocation32_spill] sm:$0xff] %v7785_v30  ;;  %v7799_v46 = vld [vmem:[#allocation2 + $0x168] sm:$0xff]  ;;  %v2378_v48 = vrot.slane %v7523_v38, 2 }
 0x25b   : > { %5139 = vrot.lane.b32.xlu0 %v5138_v57, %s5422_s14  ;;  %v7774_v57 = vsel %vm492_vm4, %v2374_v9, %v2376_v19  ;;  %v7788_v19 = vsel %vm411_vm3, %v2328_v32, %v2329_v13  ;;  %v7791_v9 = vsel %vm411_vm3, %v2329_v13, %v2331_v62  ;;  %9153 = vst [vmem:[#allocation42_spill] sm:$0xff] %v7799_v46  ;;  %v7804_v32 = vld [vmem:[#allocation2 + $0x190] sm:$0x3]  ;;  %v2334_v13 = vrot.slane %v7785_v30, 1 }
 0x25c   : > { %v5158_v60 = vpack.i.bf16 %v7774_v57, %v7771_v63  ;;  %9151 = vst [vmem:[#allocation33_spill] sm:$0xff] %v7788_v19  ;;  %9152 = vst [vmem:[#allocation41_spill] sm:$0xff] %v7791_v9  ;;  %v5163_v62 = vpack.i.bf16 %v7785_v30, %v7799_v46 }
 0x25d   : > { %5144 = vrot.lane.b32.xlu1 %v5143_v56, %s5422_s14  ;;  %v2379_v56 = vrot.slane %v7510_v2, 2  ;;  %v2493_v2 = vrot.slane %v7804_v32, 2 }
 0x25f   : > { %5149 = vrot.lane.b32.xlu0 %v5148_v39, %s5422_s14  ;;  %v2381_v39 = vrot.slane %v7577_v7, 2  ;;  %v5168_v7 = vpack.i.bf16 %v7791_v9, %v7788_v19  ;;  %v2491_v19 = vrot.slane %v7802_v61, 2  ;;  %v2333_v9 = vrot.slane %v7799_v46, 1 }
 0x261   : > { %5154 = vrot.lane.b32.xlu1 %v5153_v24, %s5422_s14  ;;  %v2336_v24 = vrot.slane %v7795_v8, 1  ;;  %v7816_v33 = vsel %vm492_vm4, %v2379_v56, %v2381_v39  ;;  %v2391_v39 = vrot.slane %v7627_v50, 2  ;;  %v2388_v50 = vrot.slane %v7623_v17, 2 }
 0x263   : > { %5159 = vrot.lane.b32.xlu0 %v5158_v60, %s5422_s14  ;;  %v7813_v60 = vsel %vm492_vm4, %v2378_v48, %v2379_v56  ;;  %v2383_v48 = vrot.slane %v7554_v6, 2  ;;  %v2389_v56 = vrot.slane %v7610_v52, 2  ;;  %v7837_v38 = vsel %vm411_vm3, %v2334_v13, %v2336_v24 }
 0x264   : > { %v5173_v51 = vpack.i.bf16 %v7816_v33, %v7813_v60  ;;  %9157 = vst [vmem:[#allocation57_spill] sm:$0xff] %v7837_v38  ;;  %v7845_v52 = vsel %vm492_vm4, %v2384_v23, %v2386_v27  ;;  %v7855_v24 = vsel %vm492_vm4, %v2491_v19, %v2493_v2  ;;  %v2404_v2 = vrot.slane %v7720_v59, 2  ;;  %v7907_v59 = vld [vmem:[#allocation2 + $0x1a8] sm:$0x3] }
 0x265   : > { %5164 = vrot.lane.b32.xlu1 %v5163_v62, %s5422_s14  ;;  %v7834_v62 = vsel %vm411_vm3, %v2333_v9, %v2334_v13  ;;  %v7842_v6 = vsel %vm492_vm4, %v2383_v48, %v2384_v23  ;;  %v2396_v9 = vrot.slane %v7664_v36, 2  ;;  %v7852_v13 = vsel %vm492_vm4, %v2490_v42, %v2491_v19  ;;  %9159 = vst [vmem:[#allocation60_spill] sm:$0xff] %v7855_v24 }
 0x266   : > { %9156 = vst [vmem:[#allocation51_spill] sm:$0xff] %v7834_v62  ;;  %9158 = vst [vmem:[#allocation52_spill] sm:$0xff] %v7852_v13  ;;  %v5183_v23 = vpack.i.bf16 %v7837_v38, %v7834_v62  ;;  %v7861_v27 = vsel %vm492_vm4, %v2388_v50, %v2389_v56  ;;  %v2393_v48 = vrot.slane %v7667_v54, 2  ;;  %v2399_v36 = vrot.slane %v7681_v16, 2 }
 0x267   : > { %5169 = vrot.lane.b32.xlu0 %v5168_v7, %s5422_s14  ;;  %v5178_v7 = vpack.i.bf16 %v7802_v61, %v7818_v58  ;;  %v2401_v42 = vrot.slane %v7687_v5, 2  ;;  %v2406_v19 = vrot.slane %v7729_v4, 2  ;;  %v2398_v5 = vrot.slane %v7690_v21, 2  ;;  %9163 = vst [vmem:[#allocation82_spill] sm:$0xff] %v7907_v59 }
 0x268   : > { %v2403_v62 = vrot.slane %v7733_v26, 2  ;;  %v2411_v50 = vrot.slane %v7754_v40, 2  ;;  %v7903_v26 = vld [vmem:[#allocation2 + $0x198] sm:$0xff]  ;;  %v2414_v21 = vrot.slane %v7785_v30, 2 }
 0x269   : > { %5174 = vrot.lane.b32.xlu1 %v5173_v51, %s5422_s14  ;;  %v7864_v51 = vsel %vm492_vm4, %v2389_v56, %v2391_v39  ;;  %v7877_v56 = vsel %vm492_vm4, %v2393_v48, %v2394_v25  ;;  %v7880_v39 = vsel %vm492_vm4, %v2394_v25, %v2396_v9  ;;  %v7888_v38 = vsel %vm492_vm4, %v2398_v5, %v2399_v36  ;;  %v7905_v5 = vld [vmem:[#allocation2 + $0x1a0] sm:$0xff] }
 0x26a   : > { %v5193_v4 = vpack.i.bf16 %v7864_v51, %v7861_v27  ;;  %v7894_v48 = vsel %vm492_vm4, %v2403_v62, %v2404_v2  ;;  %v7897_v25 = vsel %vm492_vm4, %v2404_v2, %v2406_v19  ;;  %v5198_v9 = vpack.i.bf16 %v7880_v39, %v7877_v56  ;;  %9161 = vst [vmem:[#allocation80_spill] sm:$0xff] %v7903_v26 }
 0x26b   : > { %5179 = vrot.lane.b32.xlu0 %v5178_v7, %s5422_s14  ;;  %v5188_v7 = vpack.i.bf16 %v7845_v52, %v7842_v6  ;;  %9160 = vst [vmem:[#allocation79_spill] sm:$0xff] %v7897_v25  ;;  %9162 = vst [vmem:[#allocation81_spill] sm:$0xff] %v7905_v5  ;;  %v2454_v62 = vrot.slane %v7802_v61, 1  ;;  %v5208_v40 = vpack.i.bf16 %v7897_v25, %v7894_v48  ;;  %v2408_v2 = vrot.slane %v7757_v10, 2 }
 0x26c   : > { %v2453_v19 = vrot.slane %v7818_v58, 1  ;;  %v2501_v61 = vrot.slane %v7907_v59, 1  ;;  %v2416_v25 = vrot.slane %v7795_v8, 2 }
 0x26d   : > { %5184 = vrot.lane.b32.xlu1 %v5183_v23, %s5422_s14  ;;  %v7891_v23 = vsel %vm492_vm4, %v2399_v36, %v2401_v42  ;;  %v2456_v36 = vrot.slane %v7804_v32, 1 }
 0x26e   : > { %v5203_v42 = vpack.i.bf16 %v7891_v23, %v7888_v38  ;;  %v7932_v58 = vsel %vm411_vm3, %v2453_v19, %v2454_v62 }
 0x26f   : > { %5189 = vrot.lane.b32.xlu0 %v5188_v7, %s5422_s14  ;;  %v2409_v7 = vrot.slane %v7748_v15, 2  ;;  %v2498_v15 = vrot.slane %v7903_v26, 1  ;;  %9164 = vst [vmem:[#allocation83_spill] sm:$0xff] %v7932_v58  ;;  %v7935_v26 = vsel %vm411_vm3, %v2454_v62, %v2456_v36  ;;  %v7949_v62 = vsel %vm492_vm4, %v2414_v21, %v2416_v25 }
 0x270   : > { %9165 = vst [vmem:[#allocation84_spill] sm:$0xff] %v7935_v26  ;;  %v5218_v8 = vpack.i.bf16 %v7935_v26, %v7932_v58  ;;  %9166 = vst [vmem:[#allocation85_spill] sm:$0xff] %v7949_v62  ;;  %v5346_v58 = vld [vmem:[#allocation2] sm:$0xff] }
 0x271   : > { %5194 = vrot.lane.b32.xlu1 %v5193_v4, %s5422_s14  ;;  %v2499_v4 = vrot.slane %v7905_v5, 1  ;;  %v7923_v32 = vsel %vm492_vm4, %v2408_v2, %v2409_v7  ;;  %v2413_v2 = vrot.slane %v7799_v46, 2  ;;  %v2338_v26 = vrot.slane %v5346_v58, 2 }
 0x273   : > { %5199 = vrot.lane.b32.xlu0 %v5198_v9, %s5422_s14  ;;  %v7926_v9 = vsel %vm492_vm4, %v2409_v7, %v2411_v50  ;;  %v2500_v7 = vsel %vm411_vm3, %v2498_v15, %v2499_v4  ;;  %v2502_v59 = vsel %vm411_vm3, %v2499_v4, %v2501_v61  ;;  %v4995_v61 = vpop.permute.xlu1 %4994 }
 0x274   : > { %v5213_v50 = vpack.i.bf16 %v7926_v9, %v7923_v32  ;;  %v5228_v36 = vpack.i.bf16 %v2502_v59, %v2500_v7  ;;  %v4997_v4 = vunpack.i.h.bf16 %v4995_v61  ;;  %v4996_v5 = vunpack.i.l.bf16 %v4995_v61 }
 0x275   : > { %5204 = vrot.lane.b32.xlu1 %v5203_v42, %s5422_s14  ;;  %v7946_v42 = vsel %vm492_vm4, %v2413_v2, %v2414_v21  ;;  %v5347_v2 = vld [vmem:[#allocation2 + $0x8] sm:$0xff]  ;;  %v5233_v21 = vpack.i.bf16 %v7855_v24, %v7852_v13 }
 0x276   : > { %v5223_v15 = vpack.i.bf16 %v7949_v62, %v7946_v42  ;;  %v2339_v46 = vrot.slane %v5347_v2, 2  ;;  %v2813_v59 = vsel %vm230_vm0, %v5347_v2, %v4997_v4  ;;  %v2812_v25 = vsel %vm230_vm0, %v5346_v58, %v4996_v5  ;;  %v5307_v58 = vld [vmem:[%s8742_s2 + $0x110] sm:$0xff]   ;;  %v5348_v5 = vld [vmem:[%s8742_s2 + $0x118] sm:$0xff]  }
 0x277   : > { %5209 = vrot.lane.b32.xlu0 %v5208_v40, %s5422_s14  ;;  %v5345_v40 = vld [vmem:[#allocation2 + $0x10] sm:$0x3]  ;;  %v2912_v30 = vpack.c.bf16 %v2813_v59, %v2812_v25 }
 0x278   : > { %v2341_v19 = vrot.slane %v5345_v40, 2  ;;  %v2340_v7 = vsel %vm492_vm4, %v2338_v26, %v2339_v46 }
 0x279   : > { %5214 = vrot.lane.b32.xlu1 %v5213_v50, %s5422_s14 }
 0x27b   : > { %5219 = vrot.lane.b32.xlu0 %v5218_v8, %s5422_s14  ;;  %v2342_v8 = vsel %vm492_vm4, %v2339_v46, %v2341_v19 }
 0x27d   : > { %5224 = vrot.lane.b32.xlu1 %v5223_v15, %s5422_s14 }
 0x27f   : > { %5229 = vrot.lane.b32.xlu0 %v5228_v36, %s5422_s14  ;;  %v4990_v50 = vpop.permute.xlu0 %4989 }
 0x280   : > { %v4992_v40 = vunpack.i.h.bf16 %v4990_v50  ;;  %v4991_v61 = vunpack.i.l.bf16 %v4990_v50 }
 0x281   : > { %5234 = vrot.lane.b32.xlu1 %v5233_v21, %s5422_s14  ;;  %s5423_s14 = smov [#allocation3]  }
 0x282   : > { %v2844_v15 = vsel %vm230_vm0, %v2340_v7, %v4991_v61  ;;  %v2845_v36 = vsel %vm230_vm0, %v2342_v8, %v4992_v40  ;;  %v5309_v40 = vld [vmem:[%s8742_s2 + $0x100] sm:$0xff]   ;;  %s5363_s30 = sshll.u32 %s5423_s14, 4  ;;  %s5364_s30 = int_to_ptr.vmem [resolvable:$false] %s5363_s30 }
 0x283   : > { %v5000_v62 = vpop.permute.xlu0 %4999  ;;  %v2913_v13 = vpack.c.bf16 %v2845_v36, %v2844_v15  ;;  %s5365_s5 = scalar_lea.vmem %s5364_s30, 8192  ;;  %p5366_p0 = scmp.lt.s32.totalorder %s8691_s22, %s5364_s30 }
 0x284   : > { %v5002_v24 = vunpack.i.h.bf16 %v5000_v62  ;;  %v5001_v4 = vunpack.i.l.bf16 %v5000_v62  ;;  %v5308_v62 = vld [vmem:[%s8742_s2 + $0x108] sm:$0xff]   ;;  %p5367_p1 = scmp.lt.s32.totalorder %s5365_s5, %s5359_s29 }
 0x285   : > { %3346 = vmatprep.mubr.bf16.mxu1 %v2913_v13 }
 0x286   : > { %3347 = vmatmul.mubr.bf16.vlgmr.msra.gmra.mxu1 %v2912_v30  ;;  %v2846_v26 = vsel %vm230_vm0, %v7564_v22, %v5001_v4  ;;  %v2847_v46 = vsel %vm230_vm0, %v7567_v14, %v5002_v24  ;;  %v5349_v22 = vld [vmem:[#allocation2 + $0x18] sm:$0xff]  ;;  %v5350_v14 = vld [vmem:[#allocation2 + $0x20] sm:$0xff]  ;;  %p5368_p2 = por %p5367_p1, %p5366_p0 }
 0x287   : > { %4656 = vmatpush3.bf16.msra.mxu1 %v5348_v5  ;;  %v2918_v19 = vpack.c.bf16 %v2847_v46, %v2846_v26  ;;  %v5005_v2 = vpop.permute.xlu1 %5004  ;;  %v5351_v26 = vld [vmem:[#allocation2 + $0x30] sm:$0xff]  ;;  %v5352_v46 = vld [vmem:[#allocation2 + $0x38] sm:$0xff] }
 0x288   : > { %4657 = vmatprep.subr.bf16.mxu1 %v5307_v58  ;;  %v5007_v13 = vunpack.i.h.bf16 %v5005_v2  ;;  %v5006_v30 = vunpack.i.l.bf16 %v5005_v2  ;;  %p5369_p3 = pnand %p5368_p2, %p5362_p13 }
 0x289   : > { %3354 = vmatprep.mubr.bf16.mxu1 %v2918_v19 }
 0x28a   : > { %v2814_v59 = vsel %vm230_vm0, %v5349_v22, %v5006_v30  ;;  %v2815_v24 = vsel %vm230_vm0, %v5350_v14, %v5007_v13 }
 0x28b   : > { %v5010_v21 = vpop.permute.xlu0 %5009  ;;  %4658 = vmatpush3.bf16.msra.mxu1 %v5307_v58  ;;  %v5015_v25 = vpop.permute.xlu1 %5014  ;;  %v2917_v8 = vpack.c.bf16 %v2815_v24, %v2814_v59 }
 0x28c   : > { %v5012_v50 = vunpack.i.h.bf16 %v5010_v21  ;;  %v5011_v7 = vunpack.i.l.bf16 %v5010_v21  ;;  %4659 = vmatprep.subr.bf16.mxu1 %v5308_v62  ;;  %v5017_v61 = vunpack.i.h.bf16 %v5015_v25  ;;  %v5016_v15 = vunpack.i.l.bf16 %v5015_v25 }
 0x28e   : > { %3355 = vmatmul.mubr.bf16.gmra.mxu1 %v2917_v8  ;;  %v2848_v36 = vsel %vm230_vm0, %v7606_v41, %v5011_v7  ;;  %v2849_v4 = vsel %vm230_vm0, %v7616_v28, %v5012_v50  ;;  %v2816_v58 = vsel %vm230_vm0, %v5351_v26, %v5016_v15  ;;  %v2817_v5 = vsel %vm230_vm0, %v5352_v46, %v5017_v61  ;;  %v5353_v15 = vld [vmem:[#allocation2 + $0x48] sm:$0xff] }
 0x28f   : > { %v2922_v19 = vpack.c.bf16 %v2849_v4, %v2848_v36  ;;  %4660 = vmatpush3.bf16.msra.mxu1 %v5308_v62  ;;  %v2915_v2 = vpack.c.bf16 %v2817_v5, %v2816_v58  ;;  %v5354_v4 = vld [vmem:[#allocation2 + $0x50] sm:$0xff] }
 0x290   : > { %4661 = vmatprep.subr.bf16.mxu1 %v5309_v40  ;;  %v5020_v13 = vpop.permute.xlu0 %5019  ;;  %v5025_v30 = vpop.permute.xlu1 %5024 }
 0x291   : > { %3362 = vmatprep.mubr.bf16.mxu1 %v2922_v19  ;;  %v5022_v21 = vunpack.i.h.bf16 %v5020_v13  ;;  %v5021_v22 = vunpack.i.l.bf16 %v5020_v13  ;;  %3507 = vmatprep.mubr.bf16.mxu0 %v2915_v2  ;;  %v5027_v24 = vunpack.i.h.bf16 %v5025_v30  ;;  %v5026_v25 = vunpack.i.l.bf16 %v5025_v30 }
 0x293   : > { %4662 = vmatpush3.bf16.msra.mxu1 %v5309_v40  ;;  %v2850_v59 = vsel %vm230_vm0, %v7640_v18, %v5021_v22  ;;  %v2851_v14 = vsel %vm230_vm0, %v7643_v53, %v5022_v21  ;;  %v2818_v36 = vsel %vm230_vm0, %v5353_v15, %v5026_v25  ;;  %v2819_v40 = vsel %vm230_vm0, %v5354_v4, %v5027_v24  ;;  %v5356_v25 = vld [vmem:[#allocation2 + $0x68] sm:$0xff] }
 0x294   : > { %v2926_v7 = vpack.c.bf16 %v2851_v14, %v2850_v59  ;;  %v2920_v5 = vpack.c.bf16 %v2819_v40, %v2818_v36  ;;  %v5355_v14 = vld [vmem:[#allocation2 + $0x60] sm:$0xff] }
 0x295   : > { %v5030_v50 = vpop.permute.xlu0 %5029 }
 0x296   : > { %v5032_v62 = vunpack.i.h.bf16 %v5030_v50  ;;  %v5031_v8 = vunpack.i.l.bf16 %v5030_v50  ;;  %3363 = vmatmul.mubr.bf16.gmra.mxu1 %v2915_v2 }
 0x297   : > { %3370 = vmatprep.mubr.bf16.mxu1 %v2926_v7  ;;  %v5035_v61 = vpop.permute.xlu1 %5034 }
 0x298   : > { %v2852_v58 = vsel %vm230_vm0, %v7676_v45, %v5031_v8  ;;  %v2853_v46 = vsel %vm230_vm0, %v7679_v0, %v5032_v62  ;;  %v5037_v19 = vunpack.i.h.bf16 %v5035_v61  ;;  %v5036_v13 = vunpack.i.l.bf16 %v5035_v61 }
 0x299   : > { %v2930_v30 = vpack.c.bf16 %v2853_v46, %v2852_v58 }
 0x29a   : > { %v5040_v26 = vpop.permute.xlu0 %5039  ;;  %v2820_v24 = vsel %vm230_vm0, %v5355_v14, %v5036_v13  ;;  %v2821_v50 = vsel %vm230_vm0, %v5356_v25, %v5037_v19  ;;  %v5357_v19 = vld [vmem:[#allocation2 + $0x80] sm:$0xff] }
 0x29b   : > { %v5042_v21 = vunpack.i.h.bf16 %v5040_v26  ;;  %v5041_v22 = vunpack.i.l.bf16 %v5040_v26  ;;  %v8006_v61 = vpack.c.bf16 %v2821_v50, %v2820_v24 }
 0x29c   : > { %v5045_v2 = vpop.permute.xlu1 %5044 }
 0x29d   : > { %v2854_v7 = vsel %vm230_vm0, %v7708_v37, %v5041_v22  ;;  %v2855_v62 = vsel %vm230_vm0, %v7711_v29, %v5042_v21  ;;  %v5047_v15 = vunpack.i.h.bf16 %v5045_v2  ;;  %v5046_v36 = vunpack.i.l.bf16 %v5045_v2 }
 0x29e   : > { %3371 = vmatmul.mubr.bf16.gmra.mxu1 %v2920_v5  ;;  %v2934_v4 = vpack.c.bf16 %v2855_v62, %v2854_v7 }
 0x29f   : > { %3378 = vmatprep.mubr.bf16.mxu1 %v2930_v30  ;;  %v2822_v46 = vsel %vm230_vm0, %v7400_v34, %v5046_v36  ;;  %v2823_v13 = vsel %vm230_vm0, %v5357_v19, %v5047_v15 }
 0x2a0   : > { %v5050_v59 = vpop.permute.xlu0 %5049 }
 0x2a1   : > { %v5052_v40 = vunpack.i.h.bf16 %v5050_v59  ;;  %v5051_v26 = vunpack.i.l.bf16 %v5050_v59  ;;  %v8016_v59 = vpack.c.bf16 %v2823_v13, %v2822_v46 }
 0x2a2   : > { %v5055_v8 = vpop.permute.xlu1 %5054 }
 0x2a3   : > { %v2856_v21 = vsel %vm230_vm0, %v7743_v11, %v5051_v26  ;;  %v2857_v2 = vsel %vm230_vm0, %v7746_v12, %v5052_v40  ;;  %v5057_v22 = vunpack.i.h.bf16 %v5055_v8  ;;  %v5056_v24 = vunpack.i.l.bf16 %v5055_v8 }
 0x2a4   : > { %v2938_v7 = vpack.c.bf16 %v2857_v2, %v2856_v21 }
 0x2a5   : > { %v2824_v26 = vsel %vm230_vm0, %v7441_v49, %v5056_v24  ;;  %v2825_v8 = vsel %vm230_vm0, %v7422_v35, %v5057_v22 }
 0x2a6   : > { %3379 = vmatmul.mubr.bf16.gmra.mxu1 %v8006_v61  ;;  %v5065_v30 = vpop.permute.xlu1 %5064  ;;  %v8031_v19 = vpack.c.bf16 %v2825_v8, %v2824_v26 }
 0x2a7   : > { %v5060_v58 = vpop.permute.xlu0 %5059  ;;  %3386 = vmatprep.mubr.bf16.mxu1 %v2934_v4  ;;  %v5066_v13 = vunpack.i.l.bf16 %v5065_v30 }
 0x2a8   : > { %v5062_v62 = vunpack.i.h.bf16 %v5060_v58  ;;  %v5061_v34 = vunpack.i.l.bf16 %v5060_v58 }
 0x2aa   : > { %v2858_v58 = vsel %vm230_vm0, %v7771_v63, %v5061_v34  ;;  %v2859_v46 = vsel %vm230_vm0, %v7774_v57, %v5062_v62 }
 0x2ab   : > { %v5075_v40 = vpop.permute.xlu1 %5074  ;;  %v2942_v21 = vpack.c.bf16 %v2859_v46, %v2858_v58 }
 0x2ac   : > { %v5077_v2 = vunpack.i.h.bf16 %v5075_v40 }
 0x2ae   : > { %v5070_v14 = vpop.permute.xlu0 %5069  ;;  %3387 = vmatmul.mubr.bf16.gmra.mxu1 %v8016_v59 }
 0x2af   : > { %v5072_v25 = vunpack.i.h.bf16 %v5070_v14  ;;  %v5071_v50 = vunpack.i.l.bf16 %v5070_v14  ;;  %3394 = vmatprep.mubr.bf16.mxu1 %v2938_v7  ;;  %v5076_v14 = vunpack.i.l.bf16 %v5075_v40 }
 0x2b1   : > { %v2877_v15 = vsel %vm230_vm0, %v7295_v43, %v5072_v25  ;;  %v2876_v36 = vsel %vm230_vm0, %v7270_v20, %v5071_v50  ;;  %v5067_v20 = vunpack.i.h.bf16 %v5065_v30  ;;  %v2826_v50 = vsel %vm230_vm0, %v7479_v31, %v5066_v13  ;;  %v9167_v13 = vld [vmem:[#allocation62_spill] sm:$0xff] }
 0x2b2   : > { %v2914_v4 = vpack.c.bf16 %v2877_v15, %v2876_v36  ;;  %v2860_v34 = vsel %vm230_vm0, %v7813_v60, %v5076_v14  ;;  %v2861_v15 = vsel %vm230_vm0, %v7816_v33, %v5077_v2  ;;  %v9168_v2 = vld [vmem:[#allocation75_spill] sm:$0xff] }
 0x2b3   : > { %v2827_v30 = vsel %vm230_vm0, %v7470_v3, %v5067_v20  ;;  %v2946_v31 = vpack.c.bf16 %v2861_v15, %v2860_v34 }
 0x2b4   : > { %3508 = vmatmul.mubr.bf16.vlgmr.msra.gmra.mxu0 %v2914_v4  ;;  %v8046_v40 = vpack.c.bf16 %v2827_v30, %v2826_v50 }
 0x2b5   : > { %v5080_v43 = vpop.permute.xlu0 %5079  ;;  %3515 = vmatprep.mubr.bf16.mxu0 %v2920_v5 }
 0x2b6   : > { %3395 = vmatmul.mubr.bf16.gmra.mxu1 %v8031_v19  ;;  %v5081_v26 = vunpack.i.l.bf16 %v5080_v43 }
 0x2b7   : > { %v5085_v49 = vpop.permute.xlu1 %5084  ;;  %3402 = vmatprep.mubr.bf16.mxu1 %v2942_v21 }
 0x2b8   : > { %v5087_v35 = vunpack.i.h.bf16 %v5085_v49  ;;  %v5086_v22 = vunpack.i.l.bf16 %v5085_v49  ;;  %v2828_v14 = vsel %vm230_vm0, %v9168_v2, %v5081_v26 }
 0x2b9   : > { %v5090_v24 = vpop.permute.xlu0 %5089 }
 0x2ba   : > { %v2878_v25 = vsel %vm230_vm0, %v7252_v1, %v5086_v22  ;;  %v2879_v5 = vsel %vm230_vm0, %v7317_v44, %v5087_v35  ;;  %v5082_v44 = vunpack.i.h.bf16 %v5080_v43  ;;  %v5092_v3 = vunpack.i.h.bf16 %v5090_v24  ;;  %v9169_v43 = vld [vmem:[#allocation68_spill] sm:$0xff] }
 0x2bb   : > { %v5095_v7 = vpop.permute.xlu1 %5094  ;;  %v2919_v62 = vpack.c.bf16 %v2879_v5, %v2878_v25  ;;  %v5091_v8 = vunpack.i.l.bf16 %v5090_v24 }
 0x2bc   : > { %v2863_v24 = vsel %vm230_vm0, %v7845_v52, %v5092_v3  ;;  %v5097_v30 = vunpack.i.h.bf16 %v5095_v7 }
 0x2bd   : > { %v5100_v36 = vpop.permute.xlu0 %5099  ;;  %3516 = vmatmul.mubr.bf16.gmra.mxu0 %v2919_v62  ;;  %v2862_v22 = vsel %vm230_vm0, %v7842_v6, %v5091_v8  ;;  %v5096_v62 = vunpack.i.l.bf16 %v5095_v7  ;;  %v9172_v8 = vld [vmem:[#allocation77_spill] sm:$0xff]  ;;  %v9173_v7 = vld [vmem:[#allocation76_spill] sm:$0xff] }
 0x2be   : > { %v5102_v4 = vunpack.i.h.bf16 %v5100_v36  ;;  %v5101_v1 = vunpack.i.l.bf16 %v5100_v36  ;;  %3523 = vmatprep.mubr.bf16.mxu0 %v8006_v61  ;;  %3403 = vmatmul.mubr.bf16.gmra.mxu1 %v8046_v40  ;;  %v2829_v61 = vsel %vm230_vm0, %v9169_v43, %v5082_v44  ;;  %v2950_v34 = vpack.c.bf16 %v2863_v24, %v2862_v22  ;;  %v9170_v44 = vld [vmem:[#allocation73_spill] sm:$0xff] }
 0x2bf   : > { %v5105_v58 = vpop.permute.xlu1 %5104  ;;  %3410 = vmatprep.mubr.bf16.mxu1 %v2946_v31  ;;  %v8062_v50 = vpack.c.bf16 %v2829_v61, %v2828_v14  ;;  %v9171_v31 = vld [vmem:[#allocation74_spill] sm:$0xff] }
 0x2c0   : > { %v2880_v20 = vsel %vm230_vm0, %v7363_v55, %v5101_v1  ;;  %v2881_v21 = vsel %vm230_vm0, %v9167_v13, %v5102_v4  ;;  %v5107_v15 = vunpack.i.h.bf16 %v5105_v58  ;;  %v5106_v36 = vunpack.i.l.bf16 %v5105_v58 }
 0x2c1   : > { %v5110_v46 = vpop.permute.xlu0 %5109  ;;  %v2923_v35 = vpack.c.bf16 %v2881_v21, %v2880_v20  ;;  %v2830_v20 = vsel %vm230_vm0, %v9172_v8, %v5096_v62  ;;  %v9174_v62 = vld [vmem:[#allocation64_spill] sm:$0xff] }
 0x2c2   : > { %v2864_v58 = vsel %vm230_vm0, %v7861_v27, %v5106_v36  ;;  %v2865_v2 = vsel %vm230_vm0, %v7864_v51, %v5107_v15  ;;  %v5111_v22 = vunpack.i.l.bf16 %v5110_v46  ;;  %v9175_v15 = vld [vmem:[#allocation63_spill] sm:$0xff] }
 0x2c3   : > { %v5115_v49 = vpop.permute.xlu1 %5114  ;;  %v2954_v24 = vpack.c.bf16 %v2865_v2, %v2864_v58 }
 0x2c4   : > { %v5117_v25 = vunpack.i.h.bf16 %v5115_v49  ;;  %v5116_v55 = vunpack.i.l.bf16 %v5115_v49 }
 0x2c5   : > { %v5120_v5 = vpop.permute.xlu0 %5119  ;;  %3524 = vmatmul.mubr.bf16.gmra.mxu0 %v2923_v35  ;;  %v5112_v35 = vunpack.i.h.bf16 %v5110_v46  ;;  %v9176_v46 = vld [vmem:[#allocation70_spill] sm:$0xff] }
 0x2c6   : > { %3531 = vmatprep.mubr.bf16.mxu0 %v8016_v59  ;;  %3411 = vmatmul.mubr.bf16.gmra.mxu1 %v8062_v50  ;;  %v2882_v26 = vsel %vm230_vm0, %v9170_v44, %v5116_v55  ;;  %v2883_v3 = vsel %vm230_vm0, %v9171_v31, %v5117_v25  ;;  %v2831_v59 = vsel %vm230_vm0, %v9173_v7, %v5097_v30  ;;  %v5122_v25 = vunpack.i.h.bf16 %v5120_v5 }
 0x2c7   : > { %v5125_v4 = vpop.permute.xlu1 %5124  ;;  %3418 = vmatprep.mubr.bf16.mxu1 %v2950_v34  ;;  %v2927_v21 = vpack.c.bf16 %v2883_v3, %v2882_v26  ;;  %v8078_v49 = vpack.c.bf16 %v2831_v59, %v2830_v20  ;;  %v5121_v55 = vunpack.i.l.bf16 %v5120_v5  ;;  %v2832_v44 = vsel %vm230_vm0, %v7623_v17, %v5111_v22  ;;  %v9178_v22 = vld [vmem:[#allocation65_spill] sm:$0xff] }
 0x2c8   : > { %v2867_v31 = vsel %vm230_vm0, %v7880_v39, %v5122_v25  ;;  %v5127_v59 = vunpack.i.h.bf16 %v5125_v4 }
 0x2c9   : > { %v5130_v1 = vpop.permute.xlu0 %5129  ;;  %v2866_v5 = vsel %vm230_vm0, %v7877_v56, %v5121_v55 }
 0x2ca   : > { %v5132_v14 = vunpack.i.h.bf16 %v5130_v1  ;;  %v5131_v43 = vunpack.i.l.bf16 %v5130_v1  ;;  %v2958_v17 = vpack.c.bf16 %v2867_v31, %v2866_v5  ;;  %v9180_v31 = vld [vmem:[#allocation69_spill] sm:$0xff] }
 0x2cb   : > { %v5135_v13 = vpop.permute.xlu1 %5134 }
 0x2cc   : > { %v2885_v34 = vsel %vm230_vm0, %v9174_v62, %v5132_v14  ;;  %v2884_v36 = vsel %vm230_vm0, %v9175_v15, %v5131_v43  ;;  %v5137_v58 = vunpack.i.h.bf16 %v5135_v13  ;;  %v5136_v2 = vunpack.i.l.bf16 %v5135_v13  ;;  %v9177_v43 = vld [vmem:[#allocation66_spill] sm:$0xff] }
 0x2cd   : > { %v5140_v61 = vpop.permute.xlu0 %5139  ;;  %3532 = vmatmul.mubr.bf16.gmra.mxu0 %v2927_v21  ;;  %v2931_v26 = vpack.c.bf16 %v2885_v34, %v2884_v36  ;;  %v5126_v21 = vunpack.i.l.bf16 %v5125_v4  ;;  %v2835_v4 = vsel %vm230_vm0, %v7653_v47, %v5127_v59 }
 0x2ce   : > { %3539 = vmatprep.mubr.bf16.mxu0 %v8031_v19  ;;  %3419 = vmatmul.mubr.bf16.gmra.mxu1 %v8078_v49  ;;  %v2833_v19 = vsel %vm230_vm0, %v9176_v46, %v5112_v35  ;;  %v2868_v13 = vsel %vm230_vm0, %v7888_v38, %v5136_v2  ;;  %v5141_v46 = vunpack.i.l.bf16 %v5140_v61 }
 0x2cf   : > { %v5145_v30 = vpop.permute.xlu1 %5144  ;;  %3426 = vmatprep.mubr.bf16.mxu1 %v2954_v24  ;;  %v8094_v7 = vpack.c.bf16 %v2833_v19, %v2832_v44  ;;  %v2834_v25 = vsel %vm230_vm0, %v7667_v54, %v5126_v21  ;;  %v5142_v44 = vunpack.i.h.bf16 %v5140_v61  ;;  %v9181_v21 = vld [vmem:[#allocation55_spill] sm:$0xff] }
 0x2d0   : > { %v5147_v3 = vunpack.i.h.bf16 %v5145_v30  ;;  %v5146_v8 = vunpack.i.l.bf16 %v5145_v30  ;;  %v2869_v30 = vsel %vm230_vm0, %v7891_v23, %v5137_v58  ;;  %v8110_v36 = vpack.c.bf16 %v2835_v4, %v2834_v25  ;;  %v9182_v58 = vld [vmem:[#allocation79_spill] sm:$0xff] }
 0x2d1   : > { %v5150_v1 = vpop.permute.xlu0 %5149  ;;  %v2962_v54 = vpack.c.bf16 %v2869_v30, %v2868_v13  ;;  %v2837_v59 = vsel %vm230_vm0, %v7681_v16, %v5142_v44  ;;  %v2836_v61 = vsel %vm230_vm0, %v9181_v21, %v5141_v46  ;;  %v9184_v30 = vld [vmem:[#allocation78_spill] sm:$0xff]  ;;  %v9185_v44 = vld [vmem:[#allocation49_spill] sm:$0xff] }
 0x2d2   : > { %v2887_v35 = vsel %vm230_vm0, %v9177_v43, %v5147_v3  ;;  %v2886_v24 = vsel %vm230_vm0, %v9178_v22, %v5146_v8  ;;  %v5152_v47 = vunpack.i.h.bf16 %v5150_v1  ;;  %v5151_v19 = vunpack.i.l.bf16 %v5150_v1 }
 0x2d3   : > { %v5155_v20 = vpop.permute.xlu1 %5154 }
 0x2d4   : > { %v2870_v1 = vsel %vm230_vm0, %v7894_v48, %v5151_v19  ;;  %v2871_v2 = vsel %vm230_vm0, %v9182_v58, %v5152_v47  ;;  %v5157_v22 = vunpack.i.h.bf16 %v5155_v20 }
 0x2d5   : > { %3540 = vmatmul.mubr.bf16.gmra.mxu0 %v2931_v26  ;;  %v5160_v14 = vpop.permute.xlu0 %5159  ;;  %v9179_v26 = vld [vmem:[#allocation67_spill] sm:$0xff]  ;;  %v2966_v16 = vpack.c.bf16 %v2871_v2, %v2870_v1  ;;  %v9188_v2 = vld [vmem:[#allocation56_spill] sm:$0xff] }
 0x2d6   : > { %3547 = vmatprep.mubr.bf16.mxu0 %v8046_v40  ;;  %3427 = vmatmul.mubr.bf16.gmra.mxu1 %v8094_v7  ;;  %v2935_v40 = vpack.c.bf16 %v2887_v35, %v2886_v24  ;;  %v5162_v62 = vunpack.i.h.bf16 %v5160_v14  ;;  %v5161_v34 = vunpack.i.l.bf16 %v5160_v14  ;;  %v2956_v35 = vpack.c.bf16 %v2837_v59, %v2836_v61 }
 0x2d7   : > { %3434 = vmatprep.mubr.bf16.mxu1 %v2958_v17  ;;  %v5165_v55 = vpop.permute.xlu1 %5164  ;;  %v5156_v24 = vunpack.i.l.bf16 %v5155_v20  ;;  %v2839_v46 = vsel %vm230_vm0, %v9185_v44, %v5157_v22  ;;  %v9189_v22 = vld [vmem:[#allocation72_spill] sm:$0xff]  ;;  %v9191_v44 = vld [vmem:[#allocation54_spill] sm:$0xff] }
 0x2d8   : > { %v2889_v5 = vsel %vm230_vm0, %v9179_v26, %v5162_v62  ;;  %v2888_v3 = vsel %vm230_vm0, %v9180_v31, %v5161_v34  ;;  %v5167_v25 = vunpack.i.h.bf16 %v5165_v55  ;;  %v5166_v4 = vunpack.i.l.bf16 %v5165_v55 }
 0x2d9   : > { %v5170_v15 = vpop.permute.xlu0 %5169 }
 0x2da   : > { %v2872_v55 = vsel %vm230_vm0, %v7923_v32, %v5166_v4  ;;  %v2873_v19 = vsel %vm230_vm0, %v7926_v9, %v5167_v25 }
 0x2db   : > { %v5175_v8 = vpop.permute.xlu1 %5174  ;;  %v2970_v59 = vpack.c.bf16 %v2873_v19, %v2872_v55  ;;  %v9194_v19 = vld [vmem:[#allocation42_spill] sm:$0xff] }
 0x2dc   : > { %v5177_v14 = vunpack.i.h.bf16 %v5175_v8  ;;  %v5176_v43 = vunpack.i.l.bf16 %v5175_v8  ;;  %v5171_v8 = vunpack.i.l.bf16 %v5170_v15 }
 0x2dd   : > { %3548 = vmatmul.mubr.bf16.gmra.mxu0 %v2935_v40  ;;  %v5180_v17 = vpop.permute.xlu0 %5179  ;;  %v9183_v40 = vld [vmem:[#allocation71_spill] sm:$0xff] }
 0x2de   : > { %3555 = vmatprep.mubr.bf16.mxu0 %v8062_v50  ;;  %3435 = vmatmul.mubr.bf16.gmra.mxu1 %v8110_v36  ;;  %v2939_v50 = vpack.c.bf16 %v2889_v5, %v2888_v3  ;;  %v2891_v13 = vsel %vm230_vm0, %v9183_v40, %v5177_v14  ;;  %v2890_v62 = vsel %vm230_vm0, %v9184_v30, %v5176_v43  ;;  %v5172_v3 = vunpack.i.h.bf16 %v5170_v15 }
 0x2df   : > { %3442 = vmatprep.mubr.bf16.mxu1 %v2962_v54  ;;  %v9186_v54 = vld [vmem:[#allocation28_spill] sm:$0xff]  ;;  %v2943_v47 = vpack.c.bf16 %v2891_v13, %v2890_v62  ;;  %v5182_v21 = vunpack.i.h.bf16 %v5180_v17  ;;  %v5181_v61 = vunpack.i.l.bf16 %v5180_v17  ;;  %v2840_v15 = vsel %vm230_vm0, %v7757_v10, %v5171_v8  ;;  %v9190_v17 = vld [vmem:[#allocation85_spill] sm:$0xff] }
 0x2e0   : > { %v2838_v20 = vsel %vm230_vm0, %v9186_v54, %v5156_v24  ;;  %v2841_v24 = vsel %vm230_vm0, %v9189_v22, %v5172_v3  ;;  %v2916_v8 = vpack.c.bf16 %v7616_v28, %v7606_v41  ;;  %v2921_v22 = vpack.c.bf16 %v7643_v53, %v7640_v18  ;;  %v9197_v28 = vld [vmem:[#allocation29_spill] sm:$0xff] }
 0x2e1   : > { %v5190_v34 = vpop.permute.xlu0 %5189  ;;  %v2960_v31 = vpack.c.bf16 %v2839_v46, %v2838_v20  ;;  %v2875_v25 = vsel %vm230_vm0, %v9190_v17, %v5182_v21  ;;  %v2964_v13 = vpack.c.bf16 %v2841_v24, %v2840_v15  ;;  %v9192_v46 = vld [vmem:[#allocation47_spill] sm:$0xff]  ;;  %v2925_v41 = vpack.c.bf16 %v7679_v0, %v7676_v45  ;;  %v9198_v24 = vld [vmem:[#allocation50_spill] sm:$0xff] }
 0x2e2   : > { %v5192_v26 = vunpack.i.h.bf16 %v5190_v34  ;;  %v5191_v5 = vunpack.i.l.bf16 %v5190_v34  ;;  %v2929_v18 = vpack.c.bf16 %v7711_v29, %v7708_v37  ;;  %v2933_v53 = vpack.c.bf16 %v7746_v12, %v7743_v11  ;;  %v9199_v45 = vld [vmem:[#allocation30_spill] sm:$0xff] }
 0x2e3   : > { %v2937_v29 = vpack.c.bf16 %v7774_v57, %v7771_v63  ;;  %v2941_v12 = vpack.c.bf16 %v7816_v33, %v7813_v60  ;;  %v9203_v63 = vld [vmem:[#allocation53_spill] sm:$0xff] }
 0x2e4   : > { %v2892_v14 = vsel %vm230_vm0, %v9188_v2, %v5191_v5 }
 0x2e5   : > { %3556 = vmatmul.mubr.bf16.gmra.mxu0 %v2939_v50  ;;  %v9187_v50 = vld [vmem:[#allocation46_spill] sm:$0xff]  ;;  %v5200_v20 = vpop.permute.xlu0 %5199 }
 0x2e6   : > { %3563 = vmatprep.mubr.bf16.mxu0 %v8078_v49  ;;  %3443 = vmatmul.mubr.bf16.gmra.mxu1 %v2956_v35  ;;  %v5185_v49 = vpop.permute.xlu1 %5184  ;;  %v2893_v1 = vsel %vm230_vm0, %v9187_v50, %v5192_v26  ;;  %v5201_v3 = vunpack.i.l.bf16 %v5200_v20 }
 0x2e7   : > { %3450 = vmatprep.mubr.bf16.mxu1 %v2966_v16  ;;  %v2947_v16 = vpack.c.bf16 %v2893_v1, %v2892_v14  ;;  %v5187_v30 = vunpack.i.h.bf16 %v5185_v49  ;;  %v5186_v62 = vunpack.i.l.bf16 %v5185_v49  ;;  %v5202_v49 = vunpack.i.h.bf16 %v5200_v20 }
 0x2e9   : > { %v2842_v26 = vsel %vm230_vm0, %v9194_v19, %v5186_v62  ;;  %v9204_v19 = vld [vmem:[#allocation48_spill] sm:$0xff] }
 0x2ea   : > { %v5195_v43 = vpop.permute.xlu1 %5194 }
 0x2eb   : > { %v5197_v4 = vunpack.i.h.bf16 %v5195_v43  ;;  %v5196_v40 = vunpack.i.l.bf16 %v5195_v43 }
 0x2ed   : > { %3564 = vmatmul.mubr.bf16.gmra.mxu0 %v2943_v47  ;;  %v2895_v10 = vsel %vm230_vm0, %v9191_v44, %v5197_v4  ;;  %v2894_v54 = vsel %vm230_vm0, %v9192_v46, %v5196_v40  ;;  %v9193_v47 = vld [vmem:[#allocation32_spill] sm:$0xff] }
 0x2ee   : > { %3571 = vmatprep.mubr.bf16.mxu0 %v8094_v7  ;;  %3451 = vmatmul.mubr.bf16.gmra.mxu1 %v2960_v31  ;;  %v2874_v7 = vsel %vm230_vm0, %v7946_v42, %v5181_v61  ;;  %v2843_v55 = vsel %vm230_vm0, %v9193_v47, %v5187_v30  ;;  %v2951_v5 = vpack.c.bf16 %v2895_v10, %v2894_v54  ;;  %v9196_v61 = vld [vmem:[#allocation58_spill] sm:$0xff]  ;;  %v5205_v1 = vpop.permute.xlu1 %5204  ;;  %v9201_v10 = vld [vmem:[#allocation41_spill] sm:$0xff] }
 0x2ef   : > { %3458 = vmatprep.mubr.bf16.mxu1 %v2970_v59  ;;  %v2974_v34 = vpack.c.bf16 %v2875_v25, %v2874_v7  ;;  %v9195_v59 = vld [vmem:[#allocation27_spill] sm:$0xff]  ;;  %v2896_v50 = vsel %vm230_vm0, %v9196_v61, %v5201_v3  ;;  %v5207_v14 = vunpack.i.h.bf16 %v5205_v1  ;;  %v5206_v43 = vunpack.i.l.bf16 %v5205_v1  ;;  %v9202_v54 = vld [vmem:[#allocation33_spill] sm:$0xff] }
 0x2f0   : > { %v2897_v21 = vsel %vm230_vm0, %v9195_v59, %v5202_v49  ;;  %v2949_v59 = vpack.c.bf16 %v7864_v51, %v7861_v27 }
 0x2f1   : > { %v2955_v2 = vpack.c.bf16 %v2897_v21, %v2896_v50  ;;  %v2898_v15 = vsel %vm230_vm0, %v9198_v24, %v5206_v43  ;;  %v9205_v21 = vld [vmem:[#allocation80_spill] sm:$0xff]  ;;  %v9206_v50 = vld [vmem:[#allocation81_spill] sm:$0xff]  ;;  %v9208_v43 = vld [vmem:[#allocation51_spill] sm:$0xff] }
 0x2f2   : > { %v5215_v30 = vpop.permute.xlu1 %5214  ;;  %v9209_v24 = vld [vmem:[#allocation84_spill] sm:$0xff] }
 0x2f3   : > { %v5217_v44 = vunpack.i.h.bf16 %v5215_v30  ;;  %v5216_v37 = vunpack.i.l.bf16 %v5215_v30 }
 0x2f5   : > { %3572 = vmatmul.mubr.bf16.gmra.mxu0 %v2947_v16  ;;  %v5210_v16 = vpop.permute.xlu0 %5209  ;;  %v2903_v46 = vsel %vm230_vm0, %v9201_v10, %v5217_v44  ;;  %v2902_v20 = vsel %vm230_vm0, %v9202_v54, %v5216_v37 }
 0x2f6   : > { %3579 = vmatprep.mubr.bf16.mxu0 %v8110_v36  ;;  %3459 = vmatmul.mubr.bf16.gmra.mxu1 %v2964_v13  ;;  %v2968_v36 = vpack.c.bf16 %v2843_v55, %v2842_v26  ;;  %v5212_v25 = vunpack.i.h.bf16 %v5210_v16  ;;  %v5211_v4 = vunpack.i.l.bf16 %v5210_v16  ;;  %v5225_v55 = vpop.permute.xlu1 %5224  ;;  %v9210_v16 = vld [vmem:[#allocation83_spill] sm:$0xff] }
 0x2f7   : > { %3466 = vmatprep.mubr.bf16.mxu1 %v2974_v34  ;;  %v5227_v49 = vunpack.i.h.bf16 %v5225_v55  ;;  %v5226_v3 = vunpack.i.l.bf16 %v5225_v55 }
 0x2f8   : > { %v2901_v0 = vsel %vm230_vm0, %v9199_v45, %v5212_v25 }
 0x2f9   : > { %v5220_v62 = vpop.permute.xlu0 %5219 }
 0x2fa   : > { %v5221_v11 = vunpack.i.l.bf16 %v5220_v62 }
 0x2fc   : > { %v2908_v57 = vsel %vm230_vm0, %v9203_v63, %v5221_v11 }
 0x2fd   : > { %3580 = vmatmul.mubr.bf16.gmra.mxu0 %v2951_v5  ;;  %v5230_v47 = vpop.permute.xlu0 %5229  ;;  %v2967_v5 = vpack.c.bf16 %v2903_v46, %v2902_v20 }
 0x2fe   : > { %3587 = vmatprep.mubr.bf16.mxu0 %v2956_v35  ;;  %3467 = vmatmul.mubr.bf16.gmra.mxu1 %v2968_v36  ;;  %v2899_v35 = vsel %vm230_vm0, %v9197_v28, %v5207_v14  ;;  %v5232_v33 = vunpack.i.h.bf16 %v5230_v47  ;;  %v5231_v60 = vunpack.i.l.bf16 %v5230_v47  ;;  %v2953_v28 = vpack.c.bf16 %v7880_v39, %v7877_v56 }
 0x2ff   : > { %4663 = vmatprep.mubr.msk.bf16.mxu1 %vm230_vm0, %v2916_v8  ;;  %v2959_v7 = vpack.c.bf16 %v2899_v35, %v2898_v15  ;;  %v2945_v8 = vpack.c.bf16 %v7845_v52, %v7842_v6  ;;  %v5235_v6 = vpop.permute.xlu1 %5234  ;;  %v2957_v35 = vpack.c.bf16 %v7891_v23, %v7888_v38  ;;  %v2965_v56 = vpack.c.bf16 %v7926_v9, %v7923_v32  ;;  %v9211_v38 = vld [vmem:[#allocation82_spill] sm:$0xff] }
 0x300   : > { %v2910_v61 = vsel %vm230_vm0, %v9205_v21, %v5231_v60  ;;  %v2911_v1 = vsel %vm230_vm0, %v9206_v50, %v5232_v33  ;;  %v5237_v27 = vunpack.i.h.bf16 %v5235_v6  ;;  %v5236_v51 = vunpack.i.l.bf16 %v5235_v6 }
 0x301   : > { %v2976_v52 = vpack.c.bf16 %v2911_v1, %v2910_v61  ;;  %v2506_v39 = vrot.slane %v9211_v38, 2  ;;  %v2503_v23 = vrot.slane %v9205_v21, 2 }
 0x302   : > { %v2907_v15 = vsel %vm230_vm0, %v9209_v24, %v5237_v27 }
 0x305   : > { %3588 = vmatmul.mubr.bf16.gmra.mxu0 %v2955_v2  ;;  %v9207_v2 = vld [vmem:[#allocation57_spill] sm:$0xff] }
 0x306   : > { %3595 = vmatprep.mubr.bf16.mxu0 %v2960_v31  ;;  %4664 = vmatmul.mubr.msk.bf16.vlgmr.msra.gmra.mxu1 %vm230_vm0, %v2921_v22  ;;  %v9200_v31 = vld [vmem:[#allocation61_spill] sm:$0xff]  ;;  %v2905_v14 = vsel %vm230_vm0, %v9207_v2, %v5227_v49  ;;  %v2904_v22 = vsel %vm230_vm0, %v9208_v43, %v5226_v3 }
 0x307   : > { %4667 = vmatprep.mubr.msk.bf16.mxu1 %vm230_vm0, %v2925_v41  ;;  %v2900_v40 = vsel %vm230_vm0, %v9200_v31, %v5211_v4  ;;  %v2971_v41 = vpack.c.bf16 %v2905_v14, %v2904_v22  ;;  %v2961_v4 = vpack.c.bf16 %v9182_v58, %v7894_v48  ;;  %v9212_v48 = vld [vmem:[#allocation60_spill] sm:$0xff] }
 0x308   : > { %v2963_v34 = vpack.c.bf16 %v2901_v0, %v2900_v40  ;;  %v9213_v58 = vld [vmem:[#allocation52_spill] sm:$0xff] }
 0x309   : > { %v9214_v45 = vpack.c.bf16 %v9212_v48, %v9213_v58 }
 0x30d   : > { %3596 = vmatmul.mubr.bf16.gmra.mxu0 %v2959_v7  ;;  %v2906_v7 = vsel %vm230_vm0, %v9210_v16, %v5236_v51 }
 0x30e   : > { %3603 = vmatprep.mubr.bf16.mxu0 %v2964_v13  ;;  %4668 = vmatmul.mubr.msk.bf16.gmra.mxu1 %vm230_vm0, %v2929_v18  ;;  %v5222_v13 = vunpack.i.h.bf16 %v5220_v62  ;;  %v2975_v25 = vpack.c.bf16 %v2907_v15, %v2906_v7  ;;  %v2504_v18 = vrot.slane %v9206_v50, 2 }
 0x30f   : > { %4671 = vmatprep.mubr.msk.bf16.mxu1 %vm230_vm0, %v2933_v53  ;;  %v2969_v53 = vpack.c.bf16 %v9190_v17, %v7946_v42 }
 0x310   : > { %v2909_v26 = vsel %vm230_vm0, %v9204_v19, %v5222_v13  ;;  %v2505_v32 = vsel %vm492_vm4, %v2503_v23, %v2504_v18  ;;  %v2507_v9 = vsel %vm492_vm4, %v2504_v18, %v2506_v39 }
 0x311   : > { %v2977_v0 = vpack.c.bf16 %v2507_v9, %v2505_v32 }
 0x315   : > { %3604 = vmatmul.mubr.bf16.gmra.mxu0 %v2963_v34 }
 0x316   : > { %3611 = vmatprep.mubr.bf16.mxu0 %v2968_v36  ;;  %4672 = vmatmul.mubr.msk.bf16.gmra.mxu1 %vm230_vm0, %v2937_v29  ;;  %v2972_v36 = vpack.c.bf16 %v2909_v26, %v2908_v57 }
 0x317   : > { %4675 = vmatprep.mubr.msk.bf16.mxu1 %vm230_vm0, %v2941_v12 }
 0x31d   : > { %3612 = vmatmul.mubr.bf16.gmra.mxu0 %v2967_v5 }
 0x31e   : > { %3619 = vmatprep.mubr.bf16.mxu0 %v2972_v36  ;;  %4676 = vmatmul.mubr.msk.bf16.gmra.mxu1 %vm230_vm0, %v2945_v8 }
 0x31f   : > { %4679 = vmatprep.mubr.msk.bf16.mxu1 %vm230_vm0, %v2949_v59 }
 0x325   : > { %3620 = vmatmul.mubr.bf16.gmra.mxu0 %v2971_v41 }
 0x326   : > { %3627 = vmatprep.mubr.bf16.mxu0 %v2976_v52  ;;  %4680 = vmatmul.mubr.msk.bf16.gmra.mxu1 %vm230_vm0, %v2953_v28 }
 0x327   : > { %4683 = vmatprep.mubr.msk.bf16.mxu1 %vm230_vm0, %v2957_v35 }
 0x32d   : > { %3628 = vmatmul.mubr.bf16.gmra.mxu0 %v2975_v25 }
 0x32e   : > { %4684 = vmatmul.mubr.msk.bf16.gmra.mxu1 %vm230_vm0, %v2961_v4 }
 0x32f   : > { %4687 = vmatprep.mubr.msk.bf16.mxu1 %vm230_vm0, %v2965_v56 }
 0x336   : > { %4688 = vmatmul.mubr.msk.bf16.gmra.mxu1 %vm230_vm0, %v2969_v53 }
 0x337   : > { %4691 = vmatprep.mubr.msk.bf16.mxu1 %vm230_vm0, %v9214_v45 }
 0x33e   : > { %4692 = vmatmul.mubr.msk.bf16.gmra.mxu1 %vm230_vm0, %v2977_v0 }
 0x346   : > { %v4387_v31 = vpop.f32.mrf.mxu1 }
 0x348   : > { %v4388_v40 = vpop.f32.mrf.mxu1 }
 0x349   : > { %v4389_v30 = vadd.f32 %v4388_v40, %v4387_v31 }
 0x34a   : > { %v4390_v62 = vpop.f32.mrf.mxu1 }
 0x34c   : > { %v4391_v34 = vpop.f32.mrf.mxu1 }
 0x34d   : > { %v4392_v42 = vadd.f32 %v4391_v34, %v4390_v62 }
 0x34e   : > { %v4393_v17 = vpop.f32.mrf.mxu1 }
 0x350   : > { %v4394_v44 = vpop.f32.mrf.mxu1 }
 0x351   : > { %v8245_v37 = vadd.f32 %v4394_v44, %v4393_v17 }
 0x352   : > { %v4396_v29 = vpop.f32.mrf.mxu1 }
 0x354   : > { %v4397_v13 = vpop.f32.mrf.mxu1 }
 0x355   : > { %v8247_v11 = vadd.f32 %v4397_v13, %v4396_v29 }
 0x356   : > { %v4399_v12 = vpop.f32.mrf.mxu1 }
 0x358   : > { %v4400_v10 = vpop.f32.mrf.mxu1 }
 0x359   : > { %v8249_v46 = vadd.f32 %v4400_v10, %v4399_v12 }
 0x35a   : > { %v4402_v54 = vpop.f32.mrf.mxu1 }
 0x35c   : > { %v4403_v20 = vpop.f32.mrf.mxu1 }
 0x35d   : > { %v8251_v47 = vadd.f32 %v4403_v20, %v4402_v54 }
 0x35e   : > { %v4405_v55 = vpop.f32.mrf.mxu1 }
 0x360   : > { %v4406_v63 = vpop.f32.mrf.mxu1 }
 0x361   : > { %v8253_v57 = vadd.f32 %v4406_v63, %v4405_v55 }
 0x362   : > { %v4408_v19 = vpop.f32.mrf.mxu1 }
 0x364   : > { %v4409_v26 = vpop.f32.mrf.mxu1 }
 0x365   : > { %v8255_v5 = vadd.f32 %v4409_v26, %v4408_v19 }
 0x366   : > { %v4411_v33 = vpop.f32.mrf.mxu1 }
 0x368   : > { %v4412_v60 = vpop.f32.mrf.mxu1 }
 0x369   : > { %v8257_v49 = vadd.f32 %v4412_v60, %v4411_v33 }
 0x36a   : > { %v4414_v3 = vpop.f32.mrf.mxu1 }
 0x36c   : > { %v4415_v36 = vpop.f32.mrf.mxu1 }
 0x36d   : > { %v8259_v8 = vadd.f32 %v4415_v36, %v4414_v3 }
 0x36e   : > { %v4417_v59 = vpop.f32.mrf.mxu1 }
 0x370   : > { %v4418_v21 = vpop.f32.mrf.mxu1 }
 0x371   : > { %v8261_v61 = vadd.f32 %v4418_v21, %v4417_v59 }
 0x372   : > { %v4420_v1 = vpop.f32.mrf.mxu1 }
 0x374   : > { %v4499_v50 = vpop.f32.mrf.mxu0  ;;  %v4421_v14 = vpop.f32.mrf.mxu1 }
 0x375   : > { %v8263_v22 = vadd.f32 %v4421_v14, %v4420_v1 }
 0x376   : > { %v4500_v2 = vpop.f32.mrf.mxu0  ;;  %v4423_v52 = vpop.f32.mrf.mxu1 }
 0x377   : > { %v4501_v43 = vadd.f32 %v4500_v2, %v4499_v50 }
 0x378   : > { %v4502_v6 = vpop.f32.mrf.mxu0  ;;  %v4424_v51 = vpop.f32.mrf.mxu1 }
 0x379   : > { %v8265_v41 = vadd.f32 %v4501_v43, %v4389_v30  ;;  %v8267_v35 = vadd.f32 %v4424_v51, %v4423_v52 }
 0x37a   : > { %v4503_v27 = vpop.f32.mrf.mxu0  ;;  %v4426_v24 = vpop.f32.mrf.mxu1 }
 0x37b   : > { %v4504_v28 = vadd.f32 %v4503_v27, %v4502_v6 }
 0x37c   : > { %v4427_v7 = vpop.f32.mrf.mxu1 }
 0x37d   : > { %v8269_v15 = vadd.f32 %v4504_v28, %v4392_v42  ;;  %v8271_v16 = vpop.f32.mrf.mxu0  ;;  %v8273_v25 = vadd.f32 %v4427_v7, %v4426_v24 }
 0x37e   : > { %v4429_v56 = vpop.f32.mrf.mxu1 }
 0x37f   : > { %v8275_v4 = vpop.f32.mrf.mxu0 }
 0x380   : > { %v4430_v39 = vpop.f32.mrf.mxu1 }
 0x381   : > { %v8277_v38 = vpop.f32.mrf.mxu0  ;;  %v8279_v23 = vadd.f32 %v4430_v39, %v4429_v56 }
 0x382   : > { %v4432_v53 = vpop.f32.mrf.mxu1 }
 0x383   : > { %v8281_v18 = vpop.f32.mrf.mxu0 }
 0x384   : > { %v4433_v58 = vpop.f32.mrf.mxu1 }
 0x385   : > { %v8283_v48 = vpop.f32.mrf.mxu0  ;;  %v8285_v45 = vadd.f32 %v4433_v58, %v4432_v53 }
 0x386   : > { %v4435_v9 = vpop.f32.mrf.mxu1 }
 0x387   : > { %v8287_v32 = vpop.f32.mrf.mxu0 }
 0x388   : > { %v4436_v31 = vpop.f32.mrf.mxu1 }
 0x389   : > { %v8289_v0 = vpop.f32.mrf.mxu0  ;;  %v8291_v40 = vadd.f32 %v4436_v31, %v4435_v9 }
 0x38a   : > { %v4438_v62 = vpop.f32.mrf.mxu1 }
 0x38b   : > { %v8293_v30 = vpop.f32.mrf.mxu0 }
 0x38c   : > { %v4439_v42 = vpop.f32.mrf.mxu1 }
 0x38d   : > { %v8295_v34 = vpop.f32.mrf.mxu0  ;;  %v8297_v17 = vadd.f32 %v4439_v42, %v4438_v62 }
 0x38e   : > { %v4441_v29 = vpop.f32.mrf.mxu1 }
 0x38f   : > { %9215 = vst [vmem:[#allocation62_spill] sm:$0xff] %v8297_v17  ;;  %v8299_v44 = vpop.f32.mrf.mxu0 }
 0x390   : > { %v4442_v12 = vpop.f32.mrf.mxu1 }
 0x391   : > { %v8301_v13 = vpop.f32.mrf.mxu0  ;;  %v8303_v10 = vadd.f32 %v4442_v12, %v4441_v29 }
 0x392   : > { %v4444_v20 = vpop.f32.mrf.mxu1 }
 0x393   : > { %v8305_v54 = vpop.f32.mrf.mxu0 }
 0x394   : > { %v4445_v63 = vpop.f32.mrf.mxu1 }
 0x395   : > { %v8307_v55 = vpop.f32.mrf.mxu0  ;;  %v8309_v19 = vadd.f32 %v4445_v63, %v4444_v20 }
 0x396   : > { %v4447_v33 = vpop.f32.mrf.mxu1 }
 0x397   : > { %9216 = vst [vmem:[#allocation75_spill] sm:$0xff] %v8309_v19  ;;  %v8311_v26 = vpop.f32.mrf.mxu0 }
 0x398   : > { %v4448_v3 = vpop.f32.mrf.mxu1 }
 0x399   : > { %v8313_v60 = vpop.f32.mrf.mxu0  ;;  %v8315_v36 = vadd.f32 %v4448_v3, %v4447_v33 }
 0x39a   : > { %v4450_v21 = vpop.f32.mrf.mxu1 }
 0x39b   : > { %9217 = vst [vmem:[#allocation68_spill] sm:$0xff] %v8315_v36  ;;  %v8317_v59 = vpop.f32.mrf.mxu0 }
 0x39c   : > { %v4451_v1 = vpop.f32.mrf.mxu1 }
 0x39d   : > { %v8319_v50 = vpop.f32.mrf.mxu0  ;;  %v8321_v2 = vadd.f32 %v4451_v1, %v4450_v21 }
 0x39e   : > { %v4453_v43 = vpop.f32.mrf.mxu1 }
 0x39f   : > { %9218 = vst [vmem:[#allocation73_spill] sm:$0xff] %v8321_v2  ;;  %v8323_v14 = vpop.f32.mrf.mxu0 }
 0x3a0   : > { %v4454_v52 = vpop.f32.mrf.mxu1 }
 0x3a1   : > { %v8325_v6 = vpop.f32.mrf.mxu0  ;;  %v8327_v27 = vadd.f32 %v4454_v52, %v4453_v43 }
 0x3a2   : > { %v4456_v28 = vpop.f32.mrf.mxu1 }
 0x3a3   : > { %9219 = vst [vmem:[#allocation74_spill] sm:$0xff] %v8327_v27  ;;  %v8329_v51 = vpop.f32.mrf.mxu0  ;;  %v9230_v27 = vld [vmem:[#allocation59_spill] sm:$0xff] }
 0x3a4   : > { %v4457_v7 = vpop.f32.mrf.mxu1 }
 0x3a5   : > { %v8331_v24 = vpop.f32.mrf.mxu0  ;;  %v8333_v56 = vadd.f32 %v4457_v7, %v4456_v28 }
 0x3a6   : > { %v4459_v53 = vpop.f32.mrf.mxu1 }
 0x3a7   : > { %9220 = vst [vmem:[#allocation77_spill] sm:$0xff] %v8333_v56  ;;  %v8335_v39 = vpop.f32.mrf.mxu0 }
 0x3a8   : > { %v4460_v9 = vpop.f32.mrf.mxu1 }
 0x3a9   : > { %v8337_v58 = vpop.f32.mrf.mxu0  ;;  %v8339_v31 = vadd.f32 %v4460_v9, %v4459_v53 }
 0x3aa   : > { %v4462_v42 = vpop.f32.mrf.mxu1 }
 0x3ab   : > { %9221 = vst [vmem:[#allocation76_spill] sm:$0xff] %v8339_v31  ;;  %v8341_v62 = vpop.f32.mrf.mxu0 }
 0x3ac   : > { %v4463_v12 = vpop.f32.mrf.mxu1 }
 0x3ad   : > { %v8343_v29 = vpop.f32.mrf.mxu0  ;;  %v8345_v20 = vadd.f32 %v4463_v12, %v4462_v42 }
 0x3ae   : > { %v4465_v33 = vpop.f32.mrf.mxu1 }
 0x3af   : > { %9222 = vst [vmem:[#allocation64_spill] sm:$0xff] %v8345_v20  ;;  %v8347_v63 = vpop.f32.mrf.mxu0 }
 0x3b0   : > { %v4466_v21 = vpop.f32.mrf.mxu1 }
 0x3b1   : > { %v8349_v3 = vpop.f32.mrf.mxu0  ;;  %v8351_v1 = vadd.f32 %v4466_v21, %v4465_v33 }
 0x3b2   : > { %v4468_v52 = vpop.f32.mrf.mxu1 }
 0x3b3   : > { %9223 = vst [vmem:[#allocation63_spill] sm:$0xff] %v8351_v1  ;;  %v8353_v43 = vpop.f32.mrf.mxu0 }
 0x3b4   : > { %v4469_v7 = vpop.f32.mrf.mxu1 }
 0x3b5   : > { %v8355_v28 = vpop.f32.mrf.mxu0  ;;  %v8357_v53 = vadd.f32 %v4469_v7, %v4468_v52 }
 0x3b6   : > { %v4471_v42 = vpop.f32.mrf.mxu1 }
 0x3b7   : > { %9224 = vst [vmem:[#allocation70_spill] sm:$0xff] %v8357_v53  ;;  %v8359_v9 = vpop.f32.mrf.mxu0 }
 0x3b8   : > { %v4472_v20 = vpop.f32.mrf.mxu1 }
 0x3b9   : > { %v8361_v12 = vpop.f32.mrf.mxu0  ;;  %v8363_v31 = vadd.f32 %v4472_v20, %v4471_v42  ;;  %v3799_v20 = vsub.s32 2, %v9230_v27  ;;  %v4507_v42 = vadd.f32 %v8275_v4, %v8271_v16  ;;  %v5358_v16 = vld [vmem:[%s8743_s3] sm:$0x1f] }
 0x3ba   : > { %v4474_v33 = vpop.f32.mrf.mxu1 }
 0x3bb   : > { %9225 = vst [vmem:[#allocation66_spill] sm:$0xff] %v8363_v31  ;;  %v8365_v2 = vpop.f32.mrf.mxu0  ;;  %v8397_v4 = vrot.slane %v5358_v16, %v3799_v20  ;;  %v4513_v20 = vadd.f32 %v8287_v32, %v8283_v48 }
 0x3bc   : > { %9226 = vst [vmem:[#allocation65_spill] sm:$0xff] %v8365_v2  ;;  %v4475_v1 = vpop.f32.mrf.mxu1 }
 0x3bd   : > { %v8367_v21 = vpop.f32.mrf.mxu0  ;;  %v8369_v56 = vadd.f32 %v4475_v1, %v4474_v33  ;;  %v3835_v1 = vsub.s32 3, %v9230_v27 }
 0x3be   : > { %v8373_v52 = vpop.f32.mrf.mxu1 }
 0x3bf   : > { %9227 = vst [vmem:[#allocation67_spill] sm:$0xff] %v8369_v56  ;;  %v8371_v36 = vpop.f32.mrf.mxu0  ;;  %9228 = vst [vmem:[#allocation69_spill] sm:$0xff] %v8373_v52  ;;  %v4510_v52 = vadd.f32 %v8281_v18, %v8277_v38  ;;  %v8402_v2 = vrot.slane %v5358_v16, %v3835_v1 }
 0x3c0   : > { %v8377_v53 = vpop.f32.mrf.mxu1 }
 0x3c1   : > { %v8375_v7 = vpop.f32.mrf.mxu0  ;;  %9229 = vst [vmem:[#allocation55_spill] sm:$0xff] %v8377_v53  ;;  %v3518_v53 = vadd.f32 %v4507_v42, %v8245_v37  ;;  %v3521_v18 = vadd.f32 %v4510_v52, %v8247_v11  ;;  %v4519_v42 = vadd.f32 %v8299_v44, %v8295_v34 }
 0x3c2   : > { %v8384_v17 = vpop.f32.mrf.mxu1 }
 0x3c3   : > { %v8382_v31 = vpop.f32.mrf.mxu0  ;;  %9231 = vst [vmem:[#allocation79_spill] sm:$0xff] %v8384_v17 }
 0x3c4   : > { %v8389_v56 = vpop.f32.mrf.mxu1 }
 0x3c5   : > { %v8387_v33 = vpop.f32.mrf.mxu0  ;;  %9233 = vst [vmem:[#allocation78_spill] sm:$0xff] %v8389_v56 }
 0x3c6   : > { %9232 = vst [vmem:[#allocation71_spill] sm:$0xff] %v8387_v33  ;;  %v4665_v17 = vpop.f32.mrf.mxu1 }
 0x3c7   : > { %v8399_v19 = vpop.f32.mrf.mxu0  ;;  %v3679_v27 = vadd.f32 %v4665_v17, %v3518_v53 }
 0x3c8   : > { %v3670_v56 = vpop.f32.mrf.mxu1 }
 0x3c9   : > { %v8404_v33 = vpop.f32.mrf.mxu0  ;;  %v3803_v37 = vmul.f32 %v8397_v4, %v3679_v27  ;;  %v3671_v38 = vadd.f32 %v3670_v56, %v8265_v41  ;;  %v4522_v27 = vadd.f32 %v8305_v54, %v8301_v13  ;;  %v9235_v56 = vld [vmem:[#allocation8_spill] sm:$0xff]  ;;  %v4516_v13 = vadd.f32 %v8293_v30, %v8289_v0  ;;  %v9236_v54 = vld [vmem:[#allocation6_spill] sm:$0xff]  ;;  %v9237_v0 = vld [vmem:[#allocation9_spill] sm:$0xff] }
 0x3ca   : > { %9234 = vst [vmem:[#allocation49_spill] sm:$0xff] %v8404_v33  ;;  %v4666_v53 = vpop.f32.mrf.mxu1 }
 0x3cb   : > { %v8415_v17 = vpop.f32.mrf.mxu0  ;;  %v3839_v1 = vadd.f32 %v8402_v2, %v3803_v37  ;;  %v3801_v16 = vmul.f32 %v8397_v4, %v3671_v38  ;;  %v3682_v33 = vadd.f32 %v4666_v53, %v3521_v18  ;;  %v3534_v37 = vadd.f32 %v4519_v42, %v8253_v57 }
 0x3cc   : > { %v3673_v11 = vpop.f32.mrf.mxu1  ;;  %v3526_v18 = vadd.f32 %v4513_v20, %v8249_v46 }
 0x3cd   : > { %v8421_v41 = vpop.f32.mrf.mxu0  ;;  %v3871_v52 = vadd.f32 %v3839_v1, %v9235_v56  ;;  %v3837_v48 = vadd.f32 %v8402_v2, %v3801_v16  ;;  %v3804_v32 = vmul.f32 %v8397_v4, %v3682_v33  ;;  %v3674_v34 = vadd.f32 %v3673_v11, %v8269_v15 }
 0x3ce   : > { %v4669_v38 = vpop.f32.mrf.mxu1  ;;  %v3537_v16 = vadd.f32 %v4522_v27, %v8255_v5  ;;  %v4525_v11 = vadd.f32 %v8311_v26, %v8307_v55  ;;  %v4531_v56 = vadd.f32 %v8323_v14, %v8319_v50  ;;  %v3529_v5 = vadd.f32 %v4516_v13, %v8251_v47  ;;  %v9239_v47 = vld [vmem:[#allocation12_spill] sm:$0xff] }
 0x3cf   : > { %v8427_v44 = vpop.f32.mrf.mxu0  ;;  %3903 = vst.msk [vmem:[%s8433_s13 + $0x10] sm:$0xff] %vm230_vm0, %v3871_v52  ;;  %v3869_v33 = vadd.f32 %v3837_v48, %v9236_v54  ;;  %v3840_v15 = vadd.f32 %v8402_v2, %v3804_v32  ;;  %v3802_v53 = vmul.f32 %v8397_v4, %v3674_v34  ;;  %v3695_v42 = vadd.f32 %v4669_v38, %v3534_v37  ;;  %v9238_v34 = vld [vmem:[#allocation7_spill] sm:$0xff] }
 0x3d0   : > { %v3686_v46 = vpop.f32.mrf.mxu1  ;;  %v4534_v50 = vadd.f32 %v8329_v51, %v8325_v6  ;;  %v4528_v6 = vadd.f32 %v8317_v59, %v8313_v60  ;;  %v9240_v51 = vld [vmem:[#allocation10_spill] sm:$0xff] }
 0x3d1   : > { %v8440_v57 = vpop.f32.mrf.mxu0  ;;  %3901 = vst.msk [vmem:[%s8433_s13] sm:$0xff] %vm230_vm0, %v3869_v33  ;;  %v3872_v30 = vadd.f32 %v3840_v15, %v9237_v0  ;;  %v3838_v20 = vadd.f32 %v8402_v2, %v3802_v53  ;;  %v3687_v1 = vadd.f32 %v3686_v46, %v3526_v18  ;;  %v3807_v48 = vmul.f32 %v8397_v4, %v3695_v42 }
 0x3d2   : > { %v4670_v32 = vpop.f32.mrf.mxu1  ;;  %v3550_v53 = vadd.f32 %v4531_v56, %v8261_v61  ;;  %v3542_v46 = vadd.f32 %v4525_v11, %v8257_v49  ;;  %v9241_v61 = vld [vmem:[#allocation13_spill] sm:$0xff]  ;;  %v3553_v59 = vadd.f32 %v4534_v50, %v8263_v22  ;;  %v4537_v56 = vadd.f32 %v8335_v39, %v8331_v24 }
 0x3d3   : > { %v8451_v52 = vpop.f32.mrf.mxu0  ;;  %3904 = vst.msk [vmem:[%s8433_s13 + $0x18] sm:$0xff] %vm230_vm0, %v3872_v30  ;;  %v3870_v37 = vadd.f32 %v3838_v20, %v9238_v34  ;;  %v3805_v38 = vmul.f32 %v8397_v4, %v3687_v1  ;;  %v3698_v18 = vadd.f32 %v4670_v32, %v3537_v16  ;;  %v3843_v55 = vadd.f32 %v8402_v2, %v3807_v48 }
 0x3d4   : > { %v3689_v26 = vpop.f32.mrf.mxu1  ;;  %v4543_v32 = vadd.f32 %v8347_v63, %v8343_v29  ;;  %v3545_v22 = vadd.f32 %v4528_v6, %v8259_v8  ;;  %v4546_v29 = vadd.f32 %v8353_v43, %v8349_v3  ;;  %v9243_v8 = vld [vmem:[#allocation16_spill] sm:$0xff]  ;;  %v4540_v3 = vadd.f32 %v8341_v62, %v8337_v58  ;;  %v9244_v43 = vld [vmem:[#allocation14_spill] sm:$0xff] }
 0x3d5   : > { %v8459_v27 = vpop.f32.mrf.mxu0  ;;  %3902 = vst.msk [vmem:[%s8433_s13 + $0x8] sm:$0xff] %vm230_vm0, %v3870_v37  ;;  %v3841_v14 = vadd.f32 %v8402_v2, %v3805_v38  ;;  %v3808_v54 = vmul.f32 %v8397_v4, %v3698_v18  ;;  %v3690_v33 = vadd.f32 %v3689_v26, %v3529_v5  ;;  %v3875_v13 = vadd.f32 %v3843_v55, %v9239_v47  ;;  %v9242_v18 = vld [vmem:[#allocation11_spill] sm:$0xff] }
 0x3d6   : > { %v4673_v42 = vpop.f32.mrf.mxu1  ;;  %v3569_v62 = vadd.f32 %v4546_v29, %v8285_v45  ;;  %v3561_v45 = vadd.f32 %v4540_v3, %v8273_v25  ;;  %v9247_v25 = vld [vmem:[#allocation20_spill] sm:$0xff]  ;;  %v9248_v29 = vld [vmem:[#allocation65_spill] sm:$0xff] }
 0x3d7   : > { %v8468_v15 = vpop.f32.mrf.mxu0  ;;  %v3873_v0 = vadd.f32 %v3841_v14, %v9240_v51  ;;  %v3844_v30 = vadd.f32 %v8402_v2, %v3808_v54  ;;  %v3806_v20 = vmul.f32 %v8397_v4, %v3690_v33  ;;  %3907 = vst.msk [vmem:[%s8433_s13 + $0x30] sm:$0xff] %vm230_vm0, %v3875_v13  ;;  %v3711_v16 = vadd.f32 %v4673_v42, %v3550_v53 }
 0x3d8   : > { %v3702_v48 = vpop.f32.mrf.mxu1  ;;  %v3566_v13 = vadd.f32 %v4543_v32, %v8279_v23  ;;  %v3558_v42 = vadd.f32 %v4537_v56, %v8267_v35  ;;  %v9245_v23 = vld [vmem:[#allocation17_spill] sm:$0xff] }
 0x3d9   : > { %v8478_v1 = vpop.f32.mrf.mxu0  ;;  %3905 = vst.msk [vmem:[%s8433_s13 + $0x20] sm:$0xff] %vm230_vm0, %v3873_v0  ;;  %v3876_v49 = vadd.f32 %v3844_v30, %v9241_v61  ;;  %v3842_v11 = vadd.f32 %v8402_v2, %v3806_v20  ;;  %v3703_v60 = vadd.f32 %v3702_v48, %v3542_v46  ;;  %v3811_v37 = vmul.f32 %v8397_v4, %v3711_v16 }
 0x3da   : > { %v4674_v38 = vpop.f32.mrf.mxu1  ;;  %v4549_v48 = vadd.f32 %v8359_v9, %v8355_v28  ;;  %v4555_v61 = vadd.f32 %v8371_v36, %v8367_v21  ;;  %v4558_v36 = vadd.f32 %v8382_v31, %v8375_v7  ;;  %v4552_v31 = vadd.f32 %v9248_v29, %v8361_v12  ;;  %v9249_v7 = vld [vmem:[#allocation18_spill] sm:$0xff] }
 0x3db   : > { %v8491_v34 = vpop.f32.mrf.mxu0  ;;  %3908 = vst.msk [vmem:[%s8433_s13 + $0x38] sm:$0xff] %vm230_vm0, %v3876_v49  ;;  %v3874_v5 = vadd.f32 %v3842_v11, %v9242_v18  ;;  %v3809_v55 = vmul.f32 %v8397_v4, %v3703_v60  ;;  %v3714_v26 = vadd.f32 %v4674_v38, %v3553_v59  ;;  %v3847_v24 = vadd.f32 %v8402_v2, %v3811_v37  ;;  %v9246_v59 = vld [vmem:[#allocation15_spill] sm:$0xff] }
 0x3dc   : > { %v3705_v39 = vpop.f32.mrf.mxu1 }
 0x3dd   : > { %v8499_v50 = vpop.f32.mrf.mxu0  ;;  %3906 = vst.msk [vmem:[%s8433_s13 + $0x28] sm:$0xff] %vm230_vm0, %v3874_v5  ;;  %v3845_v63 = vadd.f32 %v8402_v2, %v3809_v55  ;;  %v3812_v14 = vmul.f32 %v8397_v4, %v3714_v26  ;;  %v3706_v54 = vadd.f32 %v3705_v39, %v3545_v22  ;;  %v3879_v47 = vadd.f32 %v3847_v24, %v9243_v8 }
 0x3de   : > { %v4677_v53 = vpop.f32.mrf.mxu1  ;;  %v3582_v22 = vadd.f32 %v4555_v61, %v8303_v10  ;;  %v3574_v39 = vadd.f32 %v4549_v48, %v8291_v40  ;;  %v9250_v10 = vld [vmem:[#allocation21_spill] sm:$0xff] }
 0x3df   : > { %v8508_v33 = vpop.f32.mrf.mxu0  ;;  %v3877_v46 = vadd.f32 %v3845_v63, %v9244_v43  ;;  %v3848_v6 = vadd.f32 %v8402_v2, %v3812_v14  ;;  %v3810_v51 = vmul.f32 %v8397_v4, %v3706_v54  ;;  %3911 = vst.msk [vmem:[%s8433_s13 + $0x50] sm:$0xff] %vm230_vm0, %v3879_v47  ;;  %v3727_v30 = vadd.f32 %v4677_v53, %v3566_v13  ;;  %v9252_v43 = vld [vmem:[#allocation71_spill] sm:$0xff] }
 0x3e0   : > { %v3718_v20 = vpop.f32.mrf.mxu1  ;;  %v4579_v29 = vadd.f32 %v8508_v33, %v8499_v50 }
 0x3e1   : > { %v8518_v0 = vpop.f32.mrf.mxu0  ;;  %3909 = vst.msk [vmem:[%s8433_s13 + $0x40] sm:$0xff] %vm230_vm0, %v3877_v46  ;;  %v3880_v35 = vadd.f32 %v3848_v6, %v9245_v23  ;;  %v3846_v16 = vadd.f32 %v8402_v2, %v3810_v51  ;;  %v3719_v58 = vadd.f32 %v3718_v20, %v3558_v42  ;;  %v3815_v11 = vmul.f32 %v8397_v4, %v3727_v30  ;;  %v9251_v42 = vld [vmem:[#allocation75_spill] sm:$0xff] }
 0x3e2   : > { %v4678_v60 = vpop.f32.mrf.mxu1  ;;  %v3585_v3 = vadd.f32 %v4558_v36, %v9251_v42  ;;  %v4561_v46 = vadd.f32 %v8399_v19, %v9252_v43  ;;  %v4567_v6 = vadd.f32 %v8427_v44, %v8421_v41  ;;  %v9253_v23 = vld [vmem:[#allocation19_spill] sm:$0xff]  ;;  %v4570_v19 = vadd.f32 %v8451_v52, %v8440_v57  ;;  %v9258_v52 = vld [vmem:[#allocation49_spill] sm:$0xff] }
 0x3e3   : > { %v8531_v49 = vpop.f32.mrf.mxu0  ;;  %3912 = vst.msk [vmem:[%s8433_s13 + $0x58] sm:$0xff] %vm230_vm0, %v3880_v35  ;;  %v3878_v56 = vadd.f32 %v3846_v16, %v9246_v59  ;;  %v3813_v32 = vmul.f32 %v8397_v4, %v3719_v58  ;;  %v3730_v37 = vadd.f32 %v4678_v60, %v3569_v62  ;;  %v3851_v28 = vadd.f32 %v8402_v2, %v3815_v11  ;;  %v9254_v62 = vld [vmem:[#allocation62_spill] sm:$0xff] }
 0x3e4   : > { %v3721_v9 = vpop.f32.mrf.mxu1  ;;  %v3577_v48 = vadd.f32 %v4552_v31, %v9254_v62  ;;  %v4564_v36 = vadd.f32 %v8415_v17, %v9258_v52  ;;  %v9261_v17 = vld [vmem:[#allocation25_spill] sm:$0xff]  ;;  %v4582_v42 = vadd.f32 %v8531_v49, %v8518_v0  ;;  %v9267_v62 = vld [vmem:[#allocation26_spill] sm:$0xff] }
 0x3e5   : > { %v8539_v38 = vpop.f32.mrf.mxu0  ;;  %3910 = vst.msk [vmem:[%s8433_s13 + $0x48] sm:$0xff] %vm230_vm0, %v3878_v56  ;;  %v3849_v21 = vadd.f32 %v8402_v2, %v3813_v32  ;;  %v3816_v18 = vmul.f32 %v8397_v4, %v3730_v37  ;;  %v3722_v5 = vadd.f32 %v3721_v9, %v3561_v45  ;;  %v3883_v26 = vadd.f32 %v3851_v28, %v9247_v25  ;;  %v9255_v56 = vld [vmem:[#allocation24_spill] sm:$0xff]  ;;  %v9256_v37 = vld [vmem:[#allocation74_spill] sm:$0xff] }
 0x3e6   : > { %v4681_v24 = vpop.f32.mrf.mxu1  ;;  %v3598_v45 = vadd.f32 %v4567_v6, %v9256_v37  ;;  %v9257_v9 = vld [vmem:[#allocation68_spill] sm:$0xff] }
 0x3e7   : > { %v8548_v55 = vpop.f32.mrf.mxu0  ;;  %v3881_v63 = vadd.f32 %v3849_v21, %v9249_v7  ;;  %v3852_v14 = vadd.f32 %v8402_v2, %v3816_v18  ;;  %v3814_v54 = vmul.f32 %v8397_v4, %v3722_v5  ;;  %3915 = vst.msk [vmem:[%s8433_s13 + $0x70] sm:$0xff] %vm230_vm0, %v3883_v26  ;;  %v3743_v47 = vadd.f32 %v4681_v24, %v3582_v22  ;;  %v9259_v21 = vld [vmem:[#allocation22_spill] sm:$0xff]  ;;  %v9260_v24 = vld [vmem:[#allocation77_spill] sm:$0xff] }
 0x3e8   : > { %v3734_v13 = vpop.f32.mrf.mxu1  ;;  %v3590_v57 = vadd.f32 %v4561_v46, %v9257_v9  ;;  %v9270_v9 = vld [vmem:[#allocation69_spill] sm:$0xff] }
 0x3e9   : > { %v8558_v8 = vpop.f32.mrf.mxu0  ;;  %3913 = vst.msk [vmem:[%s8433_s13 + $0x60] sm:$0xff] %vm230_vm0, %v3881_v63  ;;  %v3884_v40 = vadd.f32 %v3852_v14, %v9250_v10  ;;  %v3850_v53 = vadd.f32 %v8402_v2, %v3814_v54  ;;  %v3735_v12 = vadd.f32 %v3734_v13, %v3574_v39  ;;  %v3819_v30 = vmul.f32 %v8397_v4, %v3743_v47  ;;  %v9262_v10 = vld [vmem:[#allocation23_spill] sm:$0xff] }
 0x3ea   : > { %v4682_v20 = vpop.f32.mrf.mxu1  ;;  %v3601_v39 = vadd.f32 %v4570_v19, %v9260_v24  ;;  %v4573_v54 = vadd.f32 %v8468_v15, %v8459_v27 }
 0x3eb   : > { %v8571_v51 = vpop.f32.mrf.mxu0  ;;  %3916 = vst.msk [vmem:[%s8433_s13 + $0x78] sm:$0xff] %vm230_vm0, %v3884_v40  ;;  %v3882_v35 = vadd.f32 %v3850_v53, %v9253_v23  ;;  %v3817_v16 = vmul.f32 %v8397_v4, %v3735_v12  ;;  %v3746_v58 = vadd.f32 %v4682_v20, %v3585_v3  ;;  %v3855_v41 = vadd.f32 %v8402_v2, %v3819_v30  ;;  %v9263_v53 = vld [vmem:[#allocation73_spill] sm:$0xff]  ;;  %v9264_v30 = vld [vmem:[#allocation63_spill] sm:$0xff] }
 0x3ec   : > { %v3737_v44 = vpop.f32.mrf.mxu1  ;;  %v3593_v12 = vadd.f32 %v4564_v36, %v9263_v53  ;;  %v3614_v20 = vadd.f32 %v4579_v29, %v9264_v30  ;;  %v4576_v23 = vadd.f32 %v8491_v34, %v8478_v1  ;;  %v9269_v34 = vld [vmem:[#allocation35_spill] sm:$0xff] }
 0x3ed   : > { %v4589_v61 = vpop.f32.mrf.mxu0  ;;  %3914 = vst.msk [vmem:[%s8433_s13 + $0x68] sm:$0xff] %vm230_vm0, %v3882_v35  ;;  %v3853_v11 = vadd.f32 %v8402_v2, %v3817_v16  ;;  %v3820_v60 = vmul.f32 %v8397_v4, %v3746_v58  ;;  %v3738_v59 = vadd.f32 %v3737_v44, %v3577_v48  ;;  %v3887_v32 = vadd.f32 %v3855_v41, %v9255_v56  ;;  %v9265_v35 = vld [vmem:[#allocation34_spill] sm:$0xff]  ;;  %v9266_v16 = vld [vmem:[#allocation76_spill] sm:$0xff] }
 0x3ee   : > { %v4685_v28 = vpop.f32.mrf.mxu1  ;;  %v3606_v58 = vadd.f32 %v4573_v54, %v9266_v16  ;;  %v9276_v54 = vld [vmem:[#allocation78_spill] sm:$0xff] }
 0x3ef   : > { %v3885_v18 = vadd.f32 %v3853_v11, %v9259_v21  ;;  %v3856_v5 = vadd.f32 %v8402_v2, %v3820_v60  ;;  %v3818_v25 = vmul.f32 %v8397_v4, %v3738_v59  ;;  %3919 = vst.msk [vmem:[%s8433_s13 + $0x90] sm:$0xff] %vm230_vm0, %v3887_v32  ;;  %v3759_v26 = vadd.f32 %v4685_v28, %v3598_v45  ;;  %v4590_v31 = vpop.f32.mrf.mxu0  ;;  %v9268_v59 = vld [vmem:[#allocation70_spill] sm:$0xff]  ;;  %v9272_v21 = vld [vmem:[#allocation64_spill] sm:$0xff] }
 0x3f0   : > { %v3750_v22 = vpop.f32.mrf.mxu1  ;;  %v4591_v11 = vadd.f32 %v4590_v31, %v4589_v61  ;;  %v3617_v56 = vadd.f32 %v4582_v42, %v9268_v59  ;;  %v4585_v61 = vadd.f32 %v8548_v55, %v8539_v38 }
 0x3f1   : > { %3917 = vst.msk [vmem:[%s8433_s13 + $0x80] sm:$0xff] %vm230_vm0, %v3885_v18  ;;  %v3888_v7 = vadd.f32 %v3856_v5, %v9261_v17  ;;  %v3854_v63 = vadd.f32 %v8402_v2, %v3818_v25  ;;  %v3751_v14 = vadd.f32 %v3750_v22, %v3590_v57  ;;  %v3823_v47 = vmul.f32 %v8397_v4, %v3759_v26  ;;  %v4592_v27 = vpop.f32.mrf.mxu0  ;;  %v9271_v57 = vld [vmem:[#allocation55_spill] sm:$0xff]  ;;  %v9274_v17 = vld [vmem:[#allocation38_spill] sm:$0xff] }
 0x3f2   : > { %v4686_v13 = vpop.f32.mrf.mxu1  ;;  %v4479_v52 = vadd.f32 %v9271_v57, %v9270_v9  ;;  %v3609_v18 = vadd.f32 %v4576_v23, %v9272_v21  ;;  %v9273_v5 = vld [vmem:[#allocation31_spill] sm:$0xff] }
 0x3f3   : > { %3920 = vst.msk [vmem:[%s8433_s13 + $0x98] sm:$0xff] %vm230_vm0, %v3888_v7  ;;  %v3886_v40 = vadd.f32 %v3854_v63, %v9262_v10  ;;  %v3821_v50 = vmul.f32 %v8397_v4, %v3751_v14  ;;  %v3762_v33 = vadd.f32 %v4686_v13, %v3601_v39  ;;  %v3859_v3 = vadd.f32 %v8402_v2, %v3823_v47  ;;  %v4593_v1 = vpop.f32.mrf.mxu0  ;;  %v9275_v14 = vld [vmem:[#allocation79_spill] sm:$0xff] }
 0x3f4   : > { %v3753_v43 = vpop.f32.mrf.mxu1  ;;  %v4594_v39 = vadd.f32 %v4593_v1, %v4592_v27  ;;  %v3630_v31 = vadd.f32 %v4591_v11, %v4479_v52  ;;  %v4482_v47 = vadd.f32 %v9276_v54, %v9275_v14  ;;  %v4588_v13 = vadd.f32 %v8571_v51, %v8558_v8 }
 0x3f5   : > { %3918 = vst.msk [vmem:[%s8433_s13 + $0x88] sm:$0xff] %vm230_vm0, %v3886_v40  ;;  %v3857_v15 = vadd.f32 %v8402_v2, %v3821_v50  ;;  %v3824_v46 = vmul.f32 %v8397_v4, %v3762_v33  ;;  %v3754_v6 = vadd.f32 %v3753_v43, %v3593_v12  ;;  %v3891_v0 = vadd.f32 %v3859_v3, %v9265_v35  ;;  %v9277_v40 = vld [vmem:[#allocation66_spill] sm:$0xff]  ;;  %v9278_v33 = vld [vmem:[#allocation36_spill] sm:$0xff]  ;;  %v9281_v35 = vld [vmem:[#allocation37_spill] sm:$0xff] }
 0x3f6   : > { %v4689_v49 = vpop.f32.mrf.mxu1  ;;  %v3622_v50 = vadd.f32 %v4585_v61, %v9277_v40  ;;  %v3633_v27 = vadd.f32 %v4594_v39, %v4482_v47 }
 0x3f7   : > { %v3889_v48 = vadd.f32 %v3857_v15, %v9267_v62  ;;  %v3860_v19 = vadd.f32 %v8402_v2, %v3824_v46  ;;  %v3822_v41 = vmul.f32 %v8397_v4, %v3754_v6  ;;  %v3775_v44 = vadd.f32 %v4689_v49, %v3614_v20  ;;  %3923 = vst.msk [vmem:[%s8433_s13 + $0xb0] sm:$0xff] %vm230_vm0, %v3891_v0  ;;  %v9279_v15 = vld [vmem:[#allocation39_spill] sm:$0xff] }
 0x3f8   : > { %v3766_v60 = vpop.f32.mrf.mxu1  ;;  %v9280_v20 = vld [vmem:[#allocation67_spill] sm:$0xff] }
 0x3f9   : > { %3921 = vst.msk [vmem:[%s8433_s13 + $0xa0] sm:$0xff] %vm230_vm0, %v3889_v48  ;;  %v3892_v32 = vadd.f32 %v3860_v19, %v9269_v34  ;;  %v3858_v37 = vadd.f32 %v8402_v2, %v3822_v41  ;;  %v3827_v45 = vmul.f32 %v8397_v4, %v3775_v44  ;;  %v3767_v28 = vadd.f32 %v3766_v60, %v3606_v58  ;;  %v9282_v48 = vld [vmem:[#allocation44_spill] sm:$0xff]  ;;  %v9284_v34 = vld [vmem:[#allocation45_spill] sm:$0xff] }
 0x3fa   : > { %v4690_v36 = vpop.f32.mrf.mxu1  ;;  %v3625_v23 = vadd.f32 %v4588_v13, %v9280_v20  ;;  %v9283_v60 = vld [vmem:[#allocation40_spill] sm:$0xff] }
 0x3fb   : > { %3924 = vst.msk [vmem:[%s8433_s13 + $0xb8] sm:$0xff] %vm230_vm0, %v3892_v32  ;;  %v3890_v25 = vadd.f32 %v3858_v37, %v9273_v5  ;;  %v3863_v26 = vadd.f32 %v8402_v2, %v3827_v45  ;;  %v3825_v22 = vmul.f32 %v8397_v4, %v3767_v28  ;;  %v3778_v24 = vadd.f32 %v4690_v36, %v3617_v56 }
 0x3fc   : > { %v3769_v29 = vpop.f32.mrf.mxu1 }
 0x3fd   : > { %3922 = vst.msk [vmem:[%s8433_s13 + $0xa8] sm:$0xff] %vm230_vm0, %v3890_v25  ;;  %v3895_v38 = vadd.f32 %v3863_v26, %v9274_v17  ;;  %v3861_v55 = vadd.f32 %v8402_v2, %v3825_v22  ;;  %v3828_v7 = vmul.f32 %v8397_v4, %v3778_v24  ;;  %v3770_v63 = vadd.f32 %v3769_v29, %v3609_v18 }
 0x3fe   : > { %v4693_v10 = vpop.f32.mrf.mxu1 }
 0x3ff   : > { %3927 = vst.msk [vmem:[%s8433_s13 + $0xd0] sm:$0xff] %vm230_vm0, %v3895_v38  ;;  %v3893_v53 = vadd.f32 %v3861_v55, %v9278_v33  ;;  %v3864_v12 = vadd.f32 %v8402_v2, %v3828_v7  ;;  %v3826_v42 = vmul.f32 %v8397_v4, %v3770_v63  ;;  %v3791_v3 = vadd.f32 %v4693_v10, %v3630_v31 }
 0x400   : > { %v3782_v43 = vpop.f32.mrf.mxu1 }
 0x401   : > { %3925 = vst.msk [vmem:[%s8433_s13 + $0xc0] sm:$0xff] %vm230_vm0, %v3893_v53  ;;  %v3896_v8 = vadd.f32 %v3864_v12, %v9279_v15  ;;  %v3862_v51 = vadd.f32 %v8402_v2, %v3826_v42  ;;  %v3831_v46 = vmul.f32 %v8397_v4, %v3791_v3  ;;  %v3783_v6 = vadd.f32 %v3782_v43, %v3622_v50 }
 0x402   : > { %v4694_v30 = vpop.f32.mrf.mxu1 }
 0x403   : > { %3928 = vst.msk [vmem:[%s8433_s13 + $0xd8] sm:$0xff] %vm230_vm0, %v3896_v8  ;;  %v3894_v0 = vadd.f32 %v3862_v51, %v9281_v35  ;;  %v3867_v49 = vadd.f32 %v8402_v2, %v3831_v46  ;;  %v3829_v16 = vmul.f32 %v8397_v4, %v3783_v6  ;;  %v3794_v58 = vadd.f32 %v4694_v30, %v3633_v27 }
 0x404   : > { %v3785_v62 = vpop.f32.mrf.mxu1 }
 0x405   : > { %3926 = vst.msk [vmem:[%s8433_s13 + $0xc8] sm:$0xff] %vm230_vm0, %v3894_v0  ;;  %v3899_v19 = vadd.f32 %v3867_v49, %v9282_v48  ;;  %v3865_v41 = vadd.f32 %v8402_v2, %v3829_v16  ;;  %v3832_v44 = vmul.f32 %v8397_v4, %v3794_v58  ;;  %v3786_v11 = vadd.f32 %v3785_v62, %v3625_v23 }
 0x407   : > { %3931 = vst.msk [vmem:[%s8433_s13 + $0xf0] sm:$0xff] %vm230_vm0, %v3899_v19  ;;  %v3897_v59 = vadd.f32 %v3865_v41, %v9283_v60  ;;  %v3868_v56 = vadd.f32 %v8402_v2, %v3832_v44  ;;  %v3830_v1 = vmul.f32 %v8397_v4, %v3786_v11  ;;  %v9285_v4 = vld [vmem:[#allocation43_spill] sm:$0xff] }
 0x409   : > { %3929 = vst.msk [vmem:[%s8433_s13 + $0xe0] sm:$0xff] %vm230_vm0, %v3897_v59  ;;  %v3900_v32 = vadd.f32 %v3868_v56, %v9284_v34  ;;  %v3866_v37 = vadd.f32 %v8402_v2, %v3830_v1 }
 0x40b   : > { %3932 = vst.msk [vmem:[%s8433_s13 + $0xf8] sm:$0xff] %vm230_vm0, %v3900_v32  ;;  %v3898_v45 = vadd.f32 %v3866_v37, %v9285_v4 }
 0x40d   : > { %3930 = vst.msk [vmem:[%s8433_s13 + $0xe8] sm:$0xff] %vm230_vm0, %v3898_v45 }
 0x40e   : > { %5372 = shalt.err (!%p5369_p3)
}
 0x40f   : > { %s5373_s6 = scalar_lea.hbm %s8689_s28, 4096  ;;  %s5377_s9 = scalar_lea.hbm %s8744_s4, 8192 }
 0x410   : > { %p5374_p4 = scmp.ne.s32.totalorder %s8689_s28, %s5373_s6  ;;  %p5378_p9 = scmp.lt.s32.totalorder %s8689_s28, %s8744_s4 }
 0x411   : > { %p5379_p10 = scmp.lt.s32.totalorder %s5377_s9, %s5373_s6 }
 0x412   : > { %p5375_p7 = pnand %p5374_p4, %p5489_p5 }
 0x413   : > { %p5380_p11 = por %p5379_p10, %p5378_p9 }
 0x414   : > { %p5376_p8 = pneg %p5375_p7 }
 0x416   : > { %p5381_p12 = pnand %p5380_p11, %p5376_p8 }
 0x418   : > { %5384 = shalt.err (!%p5381_p12)
}
 0x419   : > { %s5424_s12 = smov 128   ;;  %s5425_s13 = smov 8  }
 0x41a   : > { %4695 = dma.vmem_to_hbm [thread:$0]  (%p5489_p5), %s8691_s22, 4096, %s8689_s28, %s8700_s19, %s5424_s12, %s5424_s12, %s5425_s13  }
 0x41b PF: > { %p4701_p13 = scmp.ge.s32.totalorder %s5419_s18, 2  ;;  %s3962_s20 = sand.u32 1, %s5407_s15  }
 0x41c   : > { %s3963_s23 = scalar_lea.sflag [#allocation4], %s3962_s20 }
 0x41d   : > { %p4698_p0 = pnand %p4701_p13, %p5493_p6 }
 0x41f   : > { %p4699_p1 = pneg %p4698_p0 }
 0x421   : > { %5402 = dma.done.wait (%p4699_p1), %s3963_s23, 4096  }
 0x422   : > { %5404 = vsyncadd (%p4699_p1), %s3963_s23, 4294963200  ;;  %p14_p2 = scmp.ge.s32.totalorder %s5476_s21, 4   ;;  %s9286_s15 = smov %s5411_s16 }
 0x423   : > { %s9287_s16 = smov %s5415_s17  ;;  %s9288_s17 = smov %s5487_s24 }
 0x424   : > { %s9289_s18 = smov %s5476_s21  ;;  %16 = sbr.rel (!%p14_p2) target bundleno = 3 (0x3), region = 73 }
 0x429   :  { %3968 = vsyncpa [#allocation4], 1 }
 0x42a   :  { %3970 = vsyncpa [#allocation4 + $0x1], 1 }

</bundles_post_ra>
